<compile_context>
chip_gen: v7x
topology: tpu7x:2x2x1
jax: 0.10.0
libtpu: 0.0.40
codegen_flags: <defaults>
</compile_context>

<pallas_src>
import math

import jax
import jax.numpy as jnp
from jax.experimental import pallas as pl
from jax.experimental.pallas import tpu as pltpu


# ---------------------------------------------------------------------------
# Static branch configurations (conv1: (K, stride, pad); pools: (k, pad))
# ---------------------------------------------------------------------------
BRANCH1_CFG = dict(conv1=(49, 6, 24), pool1=(8, 4), conv_same=(9, 4), pool2=(4, 2))
BRANCH2_CFG = dict(conv1=(400, 50, 0), pool1=(4, 0), conv_same=(7, 3), pool2=(2, 0))


def _round_up(x, m):
    return (x + m - 1) // m * m


def _conv_len(L, K, stride, pad):
    return (L + 2 * pad - K) // stride + 1


def _im2col(x, K, stride, pad):
    # x: (B, L, C_in) -> patches (B, L_out, K*C_in); flatten order (k, c)
    B, L, C = x.shape
    xp = jnp.pad(x, ((0, 0), (pad, pad), (0, 0)))
    L_out = _conv_len(L, K, stride, pad)
    idx = jnp.arange(L_out)[:, None] * stride + jnp.arange(K)[None, :]
    return xp[:, idx, :].reshape(B, L_out, K * C)


# ---------------------------------------------------------------------------
# Fused per-branch Pallas kernel
# ---------------------------------------------------------------------------
def _make_branch_kernel(L1, L2, L3, k_same, pad_same,
                        pool1_k, pool1_pad, pool2_k, pool2_pad):
    """One grid step == one batch element, the whole branch computed in VMEM."""

    def kernel(patches_ref, w1_ref, s1_ref, b1_ref,
               w2_ref, s2_ref, b2_ref,
               w3_ref, s3_ref, b3_ref,
               w4_ref, s4_ref, b4_ref,
               o_ref, cp2, cp3, cp4):
        # ---- stage 1: strided Conv1d(1, 64) as one im2col patch matmul + BN + ReLU
        h1 = jnp.dot(patches_ref[0], w1_ref[...],
                     preferred_element_type=jnp.float32)          # (L1, 64) f32
        h1 = jnp.maximum(h1 * s1_ref[...] + b1_ref[...], 0.0)

        # ---- stage 2: MaxPool1d(pool1_k, stride=pool1_k, pad) fused.
        # Pooled rows go straight into the zero-padded VMEM scratch feeding conv2,
        # so the 64-channel activation never leaves VMEM.
        cp2[...] = jnp.zeros_like(cp2)
        for j in range(L2):
            lo = j * pool1_k - pool1_pad
            hi = min(lo + pool1_k, L1)
            lo = max(lo, 0)
            cp2[pad_same + j:pad_same + j + 1, :] = jnp.max(
                h1[lo:hi, :], axis=0, keepdims=True)

        def conv_same(src, w_ref, s_ref, b_ref):
            # 'same' conv as k_same shifted matmuls (no im2col); bf16 MXU inputs,
            # f32 accumulation, f32 BN + ReLU epilogue.
            acc = jnp.dot(src[0:L2, :].astype(jnp.bfloat16), w_ref[0],
                          preferred_element_type=jnp.float32)
            for k in range(1, k_same):
                acc = acc + jnp.dot(src[k:k + L2, :].astype(jnp.bfloat16), w_ref[k],
                                    preferred_element_type=jnp.float32)
            return jnp.maximum(acc * s_ref[...] + b_ref[...], 0.0)

        # ---- stages 3-5: three 'same' conv + BN + ReLU layers
        h2 = conv_same(cp2, w2_ref, s2_ref, b2_ref)               # (L2, 128)
        cp3[...] = jnp.zeros_like(cp3)
        cp3[pad_same:pad_same + L2, :] = h2
        h3 = conv_same(cp3, w3_ref, s3_ref, b3_ref)               # (L2, 128)
        cp4[...] = jnp.zeros_like(cp4)
        cp4[pad_same:pad_same + L2, :] = h3
        h4 = conv_same(cp4, w4_ref, s4_ref, b4_ref)               # (L2, 256)

        # ---- stage 6: MaxPool1d(pool2) + AdaptiveAvgPool1d(1) fused epilogue
        total = jnp.zeros((1, h4.shape[1]), jnp.float32)
        for j in range(L3):
            lo = j * pool2_k - pool2_pad
            hi = min(lo + pool2_k, L2)
            lo = max(lo, 0)
            total = total + jnp.max(h4[lo:hi, :], axis=0, keepdims=True)
        o_ref[0] = (total * (1.0 / L3)).astype(o_ref.dtype)       # (1, 256)

    return kernel


def run_branch(x_blc, prep, cfg):
    # x_blc: (B, L, 1) f32 channels-last input
    K1, st1, pd1 = cfg["conv1"]
    pk1, pp1 = cfg["pool1"]
    Ks, ps = cfg["conv_same"]
    pk2, pp2 = cfg["pool2"]

    patches = _im2col(x_blc, K1, st1, pd1).astype(jnp.bfloat16)   # (B, L1, K1)
    B, L1, KC1 = patches.shape
    L2 = _conv_len(L1, pk1, pk1, pp1)
    L3 = _conv_len(L2, pk2, pk2, pp2)
    S = _round_up(L2 + Ks - 1, 8)        # padded scratch length for the 'same' convs

    kernel = _make_branch_kernel(L1, L2, L3, Ks, ps, pk1, pp1, pk2, pp2)

    out = pl.pallas_call(
        kernel,
        out_shape=jax.ShapeDtypeStruct((B, 1, 256), jnp.float32),
        grid=(B,),
        in_specs=[
            pl.BlockSpec((1, L1, KC1), lambda b: (b, 0, 0)),
            pl.BlockSpec(prep["w1"].shape, lambda b: (0, 0)),
            pl.BlockSpec(prep["s1"].shape, lambda b: (0, 0)),
            pl.BlockSpec(prep["b1"].shape, lambda b: (0, 0)),
            pl.BlockSpec(prep["w2"].shape, lambda b: (0, 0, 0)),
            pl.BlockSpec(prep["s2"].shape, lambda b: (0, 0)),
            pl.BlockSpec(prep["b2"].shape, lambda b: (0, 0)),
            pl.BlockSpec(prep["w3"].shape, lambda b: (0, 0, 0)),
            pl.BlockSpec(prep["s3"].shape, lambda b: (0, 0)),
            pl.BlockSpec(prep["b3"].shape, lambda b: (0, 0)),
            pl.BlockSpec(prep["w4"].shape, lambda b: (0, 0, 0)),
            pl.BlockSpec(prep["s4"].shape, lambda b: (0, 0)),
            pl.BlockSpec(prep["b4"].shape, lambda b: (0, 0)),
        ],
        out_specs=pl.BlockSpec((1, 1, 256), lambda b: (b, 0, 0)),
        scratch_shapes=[
            pltpu.VMEM((S, 64), jnp.float32),    # padded input of conv2
            pltpu.VMEM((S, 128), jnp.float32),   # padded input of conv3
            pltpu.VMEM((S, 128), jnp.float32),   # padded input of conv4
        ],
        compiler_params=pltpu.CompilerParams(
            dimension_semantics=("parallel",),
            vmem_limit_bytes=32 * 1024 * 1024,
        ),
    )(patches, prep["w1"], prep["s1"], prep["b1"],
      prep["w2"], prep["s2"], prep["b2"],
      prep["w3"], prep["s3"], prep["b3"],
      prep["w4"], prep["s4"], prep["b4"])
    return out[:, 0, :]                                           # (B, 256)


def epoch_encoder_forward(x_ncw, prep1, prep2):
    # x_ncw: (B, 1, L) as in the PyTorch module; convert to channels-last.
    # NOTE: matches torch .squeeze()/concat behaviour for B >= 2 -> (B, 512).
    x = jnp.transpose(x_ncw, (0, 2, 1)).astype(jnp.float32)       # (B, L, 1)
    x1 = run_branch(x, prep1, BRANCH1_CFG)
    x2 = run_branch(x, prep2, BRANCH2_CFG)
    return jnp.concatenate([x1, x2], axis=-1)                     # (B, 512)


# ---------------------------------------------------------------------------
# Parameter setup (deterministic, synthetic) + one-time preparation (hoisted)
# ---------------------------------------------------------------------------
def init_conv_bn(key, c_in, c_out, k):
    k1, k2, k3, k4, k5, k6 = jax.random.split(key, 6)
    fan_in = c_in * k
    return dict(
        w=jax.random.normal(k1, (c_out, c_in, k), jnp.float32) / math.sqrt(fan_in),
        b=0.01 * jax.random.normal(k2, (c_out,), jnp.float32),
        gamma=1.0 + 0.1 * jax.random.normal(k3, (c_out,), jnp.float32),
        beta=0.1 * jax.random.normal(k4, (c_out,), jnp.float32),
        mean=0.05 * jax.random.normal(k5, (c_out,), jnp.float32),
        var=1.0 + 0.1 * jax.random.uniform(k6, (c_out,), jnp.float32),
    )


def _fold_bn(p, eps=1e-5):
    scale = p["gamma"] / jnp.sqrt(p["var"] + eps)
    bias = p["beta"] + (p["b"] - p["mean"]) * scale
    return scale.astype(jnp.float32)[None, :], bias.astype(jnp.float32)[None, :]


def prepare_branch_params(raw_layers):
    """Fold BN(+conv bias) into per-channel scale/bias, reshape weights for the fused
    kernel, cast matmul operands to bf16.  Done ONCE, outside the jitted forward."""
    prep = {}
    w = raw_layers[0]["w"]                                        # (C_out, 1, K1)
    prep["w1"] = (jnp.transpose(w, (2, 1, 0))
                  .reshape(w.shape[2] * w.shape[1], w.shape[0])
                  .astype(jnp.bfloat16))                          # (K1*C_in, C_out)
    prep["s1"], prep["b1"] = _fold_bn(raw_layers[0])
    for i in (1, 2, 3):
        w = raw_layers[i]["w"]                                    # (C_out, C_in, K)
        prep[f"w{i + 1}"] = jnp.transpose(w, (2, 1, 0)).astype(jnp.bfloat16)  # (K,Cin,Cout)
        prep[f"s{i + 1}"], prep[f"b{i + 1}"] = _fold_bn(raw_layers[i])
    return prep


# ---------------------------------------------------------------------------
# Pure-JAX reference (mirrors the kernel's bf16-input / f32-accumulate math)
# ---------------------------------------------------------------------------
def _ref_maxpool(h, k, pad):
    # stride == kernel_size for every pool in this module; -inf implicit padding.
    B, L, C = h.shape
    L_out = _conv_len(L, k, k, pad)
    hp = jnp.pad(h, ((0, 0), (pad, pad), (0, 0)), constant_values=-jnp.inf)
    hp = hp[:, :L_out * k, :].reshape(B, L_out, k, C)
    return jnp.max(hp, axis=2)


def _ref_conv_same(h, w3d, s, b, K, pad):
    B, L, _ = h.shape
    Cout = w3d.shape[2]
    hp = jnp.pad(h, ((0, 0), (pad, pad), (0, 0)))
    acc = jnp.zeros((B, L, Cout), jnp.float32)
    for k in range(K):
        xs = hp[:, k:k + L, :].astype(jnp.bfloat16).astype(jnp.float32)
        acc = acc + jnp.einsum("blc,cd->bld", xs, w3d[k].astype(jnp.float32))
    return jnp.maximum(acc * s + b, 0.0)


def _ref_branch(x_blc, prep, cfg):
    K1, st1, pd1 = cfg["conv1"]
    pk1, pp1 = cfg["pool1"]
    Ks, ps = cfg["conv_same"]
    pk2, pp2 = cfg["pool2"]
    patches = _im2col(x_blc, K1, st1, pd1).astype(jnp.bfloat16).astype(jnp.float32)
    h = jnp.einsum("blk,kc->blc", patches, prep["w1"].astype(jnp.float32))
    h = jnp.maximum(h * prep["s1"] + prep["b1"], 0.0)
    h = _ref_maxpool(h, pk1, pp1)
    h = _ref_conv_same(h, prep["w2"], prep["s2"], prep["b2"], Ks, ps)
    h = _ref_conv_same(h, prep["w3"], prep["s3"], prep["b3"], Ks, ps)
    h = _ref_conv_same(h, prep["w4"], prep["s4"], prep["b4"], Ks, ps)
    h = _ref_maxpool(h, pk2, pp2)
    return jnp.mean(h, axis=1)


def _ref_forward(x_ncw, prep1, prep2):
    x = jnp.transpose(x_ncw, (0, 2, 1)).astype(jnp.float32)
    return jnp.concatenate(
        [_ref_branch(x, prep1, BRANCH1_CFG), _ref_branch(x, prep2, BRANCH2_CFG)],
        axis=-1)


# ---------------------------------------------------------------------------
if __name__ == "__main__":
    key = jax.random.PRNGKey(0)
    kx, kp = jax.random.split(key)
    B, L = 2, 1000  # L must be >= 400 for branch2's first conv
    x = jax.random.normal(kx, (B, 1, L), jnp.float32)

    ks = jax.random.split(kp, 8)
    raw1 = [
        init_conv_bn(ks[0], 1, 64, 49),
        init_conv_bn(ks[1], 64, 128, 9),
        init_conv_bn(ks[2], 128, 128, 9),
        init_conv_bn(ks[3], 128, 256, 9),
    ]
    raw2 = [
        init_conv_bn(ks[4], 1, 64, 400),
        init_conv_bn(ks[5], 64, 128, 7),
        init_conv_bn(ks[6], 128, 128, 7),
        init_conv_bn(ks[7], 128, 256, 7),
    ]

    # Weight prep / BN folding hoisted out of the forward (done once).
    prep1 = prepare_branch_params(raw1)
    prep2 = prepare_branch_params(raw2)

    fwd = jax.jit(epoch_encoder_forward)
    out = jax.block_until_ready(fwd(x, prep1, prep2))

    ref = jax.block_until_ready(jax.jit(_ref_forward)(x, prep1, prep2))

    assert out.shape == (B, 512), out.shape
    assert bool(jnp.all(jnp.isfinite(out)))
    assert bool(jnp.allclose(out, ref, rtol=1e-2, atol=1e-2)), float(
        jnp.max(jnp.abs(out - ref)))
    print("KERNEL_OK")
</pallas_src>

<mosaic_0001>
module attributes {stable_mosaic.version = 11 : i64} {
  func.func @kernel(%arg0: i32, %arg1: memref<1x13x400xbf16, #tpu.memory_space<vmem>>, %arg2: memref<400x64xbf16, #tpu.memory_space<vmem>>, %arg3: memref<1x64xf32, #tpu.memory_space<vmem>>, %arg4: memref<1x64xf32, #tpu.memory_space<vmem>>, %arg5: memref<7x64x128xbf16, #tpu.memory_space<vmem>>, %arg6: memref<1x128xf32, #tpu.memory_space<vmem>>, %arg7: memref<1x128xf32, #tpu.memory_space<vmem>>, %arg8: memref<7x128x128xbf16, #tpu.memory_space<vmem>>, %arg9: memref<1x128xf32, #tpu.memory_space<vmem>>, %arg10: memref<1x128xf32, #tpu.memory_space<vmem>>, %arg11: memref<7x128x256xbf16, #tpu.memory_space<vmem>>, %arg12: memref<1x256xf32, #tpu.memory_space<vmem>>, %arg13: memref<1x256xf32, #tpu.memory_space<vmem>>, %arg14: memref<1x1x256xf32, #tpu.memory_space<vmem>>, %arg15: memref<16x64xf32, #tpu.memory_space<vmem>>, %arg16: memref<16x128xf32, #tpu.memory_space<vmem>>, %arg17: memref<16x128xf32, #tpu.memory_space<vmem>>) attributes {dimension_semantics = [#tpu.dimension_semantics<parallel>], iteration_bounds = array<i64: 2>, scalar_prefetch = 0 : i64, scratch_operands = 3 : i64, tpu.core_type = #tpu.core_type<tc>, window_params = [{transform_indices = @transform_0, window_bounds = array<i64: 1, 13, 400>}, {pipeline_mode = #tpu.pipeline_mode<synchronous>, transform_indices = @transform_1, window_bounds = array<i64: 400, 64>}, {pipeline_mode = #tpu.pipeline_mode<synchronous>, transform_indices = @transform_2, window_bounds = array<i64: 1, 64>}, {pipeline_mode = #tpu.pipeline_mode<synchronous>, transform_indices = @transform_3, window_bounds = array<i64: 1, 64>}, {pipeline_mode = #tpu.pipeline_mode<synchronous>, transform_indices = @transform_4, window_bounds = array<i64: 7, 64, 128>}, {pipeline_mode = #tpu.pipeline_mode<synchronous>, transform_indices = @transform_5, window_bounds = array<i64: 1, 128>}, {pipeline_mode = #tpu.pipeline_mode<synchronous>, transform_indices = @transform_6, window_bounds = array<i64: 1, 128>}, {pipeline_mode = #tpu.pipeline_mode<synchronous>, transform_indices = @transform_7, window_bounds = array<i64: 7, 128, 128>}, {pipeline_mode = #tpu.pipeline_mode<synchronous>, transform_indices = @transform_8, window_bounds = array<i64: 1, 128>}, {pipeline_mode = #tpu.pipeline_mode<synchronous>, transform_indices = @transform_9, window_bounds = array<i64: 1, 128>}, {pipeline_mode = #tpu.pipeline_mode<synchronous>, transform_indices = @transform_10, window_bounds = array<i64: 7, 128, 256>}, {pipeline_mode = #tpu.pipeline_mode<synchronous>, transform_indices = @transform_11, window_bounds = array<i64: 1, 256>}, {pipeline_mode = #tpu.pipeline_mode<synchronous>, transform_indices = @transform_12, window_bounds = array<i64: 1, 256>}, {transform_indices = @transform_13, window_bounds = array<i64: 1, 1, 256>}]} {
    %c0 = arith.constant 0 : index
    %c0_0 = arith.constant 0 : index
    %c0_1 = arith.constant 0 : index
    %0 = vector.load %arg1[%c0, %c0_0, %c0_1] : memref<1x13x400xbf16, #tpu.memory_space<vmem>>, vector<1x13x400xbf16>
    %1 = vector.shape_cast %0 : vector<1x13x400xbf16> to vector<13x400xbf16>
    %c0_2 = arith.constant 0 : index
    %c0_3 = arith.constant 0 : index
    %2 = vector.load %arg2[%c0_2, %c0_3] : memref<400x64xbf16, #tpu.memory_space<vmem>>, vector<400x64xbf16>
    %cst = arith.constant dense<0.000000e+00> : vector<13x64xf32>
    %3 = tpu.matmul %1, %2, %cst {dimension_numbers = #tpu.dot_dimension_numbers<[1], [0], [0], [1], [0, 0, 1, 1], [], []>} : vector<13x400xbf16>, vector<400x64xbf16>, vector<13x64xf32> -> vector<13x64xf32>
    %c0_4 = arith.constant 0 : index
    %c0_5 = arith.constant 0 : index
    %4 = vector.load %arg3[%c0_4, %c0_5] : memref<1x64xf32, #tpu.memory_space<vmem>>, vector<1x64xf32>
    %5 = vector.broadcast %4 : vector<1x64xf32> to vector<13x64xf32>
    %6 = arith.mulf %3, %5 : vector<13x64xf32>
    %c0_6 = arith.constant 0 : index
    %c0_7 = arith.constant 0 : index
    %7 = vector.load %arg4[%c0_6, %c0_7] : memref<1x64xf32, #tpu.memory_space<vmem>>, vector<1x64xf32>
    %8 = vector.broadcast %7 : vector<1x64xf32> to vector<13x64xf32>
    %9 = arith.addf %6, %8 : vector<13x64xf32>
    %cst_8 = arith.constant 0.000000e+00 : f32
    %10 = vector.broadcast %cst_8 : f32 to vector<13x64xf32>
    %11 = arith.maximumf %9, %10 : vector<13x64xf32>
    %cst_9 = arith.constant 0.000000e+00 : f32
    %12 = vector.broadcast %cst_9 : f32 to vector<16x64xf32>
    %c0_10 = arith.constant 0 : index
    %c0_11 = arith.constant 0 : index
    %13 = vector.load %arg15[%c0_10, %c0_11] : memref<16x64xf32, #tpu.memory_space<vmem>>, vector<16x64xf32>
    tpu.vector_store %arg15[%c0_10, %c0_11], %12 {strides = array<i32>} : memref<16x64xf32, #tpu.memory_space<vmem>>, vector<16x64xf32>,
    %14 = vector.extract_strided_slice %11 {offsets = [0, 0], sizes = [4, 64], strides = [1, 1]} : vector<13x64xf32> to vector<4x64xf32>
    %cst_12 = arith.constant dense<0xFF800000> : vector<64xf32>
    %15 = vector.multi_reduction <maximumf>, %14, %cst_12 [0] : vector<4x64xf32> to vector<64xf32>
    %16 = vector.shape_cast %15 : vector<64xf32> to vector<1x64xf32>
    %c3 = arith.constant 3 : index
    %c0_13 = arith.constant 0 : index
    %17 = vector.load %arg15[%c3, %c0_13] : memref<16x64xf32, #tpu.memory_space<vmem>>, vector<1x64xf32>
    tpu.vector_store %arg15[%c3, %c0_13], %16 {strides = array<i32>} : memref<16x64xf32, #tpu.memory_space<vmem>>, vector<1x64xf32>,
    %18 = vector.extract_strided_slice %11 {offsets = [4, 0], sizes = [4, 64], strides = [1, 1]} : vector<13x64xf32> to vector<4x64xf32>
    %cst_14 = arith.constant dense<0xFF800000> : vector<64xf32>
    %19 = vector.multi_reduction <maximumf>, %18, %cst_14 [0] : vector<4x64xf32> to vector<64xf32>
    %20 = vector.shape_cast %19 : vector<64xf32> to vector<1x64xf32>
    %c4 = arith.constant 4 : index
    %c0_15 = arith.constant 0 : index
    %21 = vector.load %arg15[%c4, %c0_15] : memref<16x64xf32, #tpu.memory_space<vmem>>, vector<1x64xf32>
    tpu.vector_store %arg15[%c4, %c0_15], %20 {strides = array<i32>} : memref<16x64xf32, #tpu.memory_space<vmem>>, vector<1x64xf32>,
    %22 = vector.extract_strided_slice %11 {offsets = [8, 0], sizes = [4, 64], strides = [1, 1]} : vector<13x64xf32> to vector<4x64xf32>
    %cst_16 = arith.constant dense<0xFF800000> : vector<64xf32>
    %23 = vector.multi_reduction <maximumf>, %22, %cst_16 [0] : vector<4x64xf32> to vector<64xf32>
    %24 = vector.shape_cast %23 : vector<64xf32> to vector<1x64xf32>
    %c5 = arith.constant 5 : index
    %c0_17 = arith.constant 0 : index
    %25 = vector.load %arg15[%c5, %c0_17] : memref<16x64xf32, #tpu.memory_space<vmem>>, vector<1x64xf32>
    tpu.vector_store %arg15[%c5, %c0_17], %24 {strides = array<i32>} : memref<16x64xf32, #tpu.memory_space<vmem>>, vector<1x64xf32>,
    %c0_18 = arith.constant 0 : index
    %c0_19 = arith.constant 0 : index
    %26 = vector.load %arg15[%c0_18, %c0_19] : memref<16x64xf32, #tpu.memory_space<vmem>>, vector<3x64xf32>
    %27 = arith.truncf %26 : vector<3x64xf32> to vector<3x64xbf16>
    %c0_20 = arith.constant 0 : index
    %c0_21 = arith.constant 0 : index
    %c0_22 = arith.constant 0 : index
    %28 = vector.load %arg5[%c0_20, %c0_21, %c0_22] : memref<7x64x128xbf16, #tpu.memory_space<vmem>>, vector<1x64x128xbf16>
    %29 = vector.shape_cast %28 : vector<1x64x128xbf16> to vector<64x128xbf16>
    %cst_23 = arith.constant dense<0.000000e+00> : vector<3x128xf32>
    %30 = tpu.matmul %27, %29, %cst_23 {dimension_numbers = #tpu.dot_dimension_numbers<[1], [0], [0], [1], [0, 0, 1, 1], [], []>} : vector<3x64xbf16>, vector<64x128xbf16>, vector<3x128xf32> -> vector<3x128xf32>
    %c1 = arith.constant 1 : index
    %c0_24 = arith.constant 0 : index
    %31 = vector.load %arg15[%c1, %c0_24] : memref<16x64xf32, #tpu.memory_space<vmem>>, vector<3x64xf32>
    %32 = arith.truncf %31 : vector<3x64xf32> to vector<3x64xbf16>
    %c1_25 = arith.constant 1 : index
    %c0_26 = arith.constant 0 : index
    %c0_27 = arith.constant 0 : index
    %33 = vector.load %arg5[%c1_25, %c0_26, %c0_27] : memref<7x64x128xbf16, #tpu.memory_space<vmem>>, vector<1x64x128xbf16>
    %34 = vector.shape_cast %33 : vector<1x64x128xbf16> to vector<64x128xbf16>
    %cst_28 = arith.constant dense<0.000000e+00> : vector<3x128xf32>
    %35 = tpu.matmul %32, %34, %cst_28 {dimension_numbers = #tpu.dot_dimension_numbers<[1], [0], [0], [1], [0, 0, 1, 1], [], []>} : vector<3x64xbf16>, vector<64x128xbf16>, vector<3x128xf32> -> vector<3x128xf32>
    %36 = arith.addf %30, %35 : vector<3x128xf32>
    %c2 = arith.constant 2 : index
    %c0_29 = arith.constant 0 : index
    %37 = vector.load %arg15[%c2, %c0_29] : memref<16x64xf32, #tpu.memory_space<vmem>>, vector<3x64xf32>
    %38 = arith.truncf %37 : vector<3x64xf32> to vector<3x64xbf16>
    %c2_30 = arith.constant 2 : index
    %c0_31 = arith.constant 0 : index
    %c0_32 = arith.constant 0 : index
    %39 = vector.load %arg5[%c2_30, %c0_31, %c0_32] : memref<7x64x128xbf16, #tpu.memory_space<vmem>>, vector<1x64x128xbf16>
    %40 = vector.shape_cast %39 : vector<1x64x128xbf16> to vector<64x128xbf16>
    %cst_33 = arith.constant dense<0.000000e+00> : vector<3x128xf32>
    %41 = tpu.matmul %38, %40, %cst_33 {dimension_numbers = #tpu.dot_dimension_numbers<[1], [0], [0], [1], [0, 0, 1, 1], [], []>} : vector<3x64xbf16>, vector<64x128xbf16>, vector<3x128xf32> -> vector<3x128xf32>
    %42 = arith.addf %36, %41 : vector<3x128xf32>
    %c3_34 = arith.constant 3 : index
    %c0_35 = arith.constant 0 : index
    %43 = vector.load %arg15[%c3_34, %c0_35] : memref<16x64xf32, #tpu.memory_space<vmem>>, vector<3x64xf32>
    %44 = arith.truncf %43 : vector<3x64xf32> to vector<3x64xbf16>
    %c3_36 = arith.constant 3 : index
    %c0_37 = arith.constant 0 : index
    %c0_38 = arith.constant 0 : index
    %45 = vector.load %arg5[%c3_36, %c0_37, %c0_38] : memref<7x64x128xbf16, #tpu.memory_space<vmem>>, vector<1x64x128xbf16>
    %46 = vector.shape_cast %45 : vector<1x64x128xbf16> to vector<64x128xbf16>
    %cst_39 = arith.constant dense<0.000000e+00> : vector<3x128xf32>
    %47 = tpu.matmul %44, %46, %cst_39 {dimension_numbers = #tpu.dot_dimension_numbers<[1], [0], [0], [1], [0, 0, 1, 1], [], []>} : vector<3x64xbf16>, vector<64x128xbf16>, vector<3x128xf32> -> vector<3x128xf32>
    %48 = arith.addf %42, %47 : vector<3x128xf32>
    %c4_40 = arith.constant 4 : index
    %c0_41 = arith.constant 0 : index
    %49 = vector.load %arg15[%c4_40, %c0_41] : memref<16x64xf32, #tpu.memory_space<vmem>>, vector<3x64xf32>
    %50 = arith.truncf %49 : vector<3x64xf32> to vector<3x64xbf16>
    %c4_42 = arith.constant 4 : index
    %c0_43 = arith.constant 0 : index
    %c0_44 = arith.constant 0 : index
    %51 = vector.load %arg5[%c4_42, %c0_43, %c0_44] : memref<7x64x128xbf16, #tpu.memory_space<vmem>>, vector<1x64x128xbf16>
    %52 = vector.shape_cast %51 : vector<1x64x128xbf16> to vector<64x128xbf16>
    %cst_45 = arith.constant dense<0.000000e+00> : vector<3x128xf32>
    %53 = tpu.matmul %50, %52, %cst_45 {dimension_numbers = #tpu.dot_dimension_numbers<[1], [0], [0], [1], [0, 0, 1, 1], [], []>} : vector<3x64xbf16>, vector<64x128xbf16>, vector<3x128xf32> -> vector<3x128xf32>
    %54 = arith.addf %48, %53 : vector<3x128xf32>
    %c5_46 = arith.constant 5 : index
    %c0_47 = arith.constant 0 : index
    %55 = vector.load %arg15[%c5_46, %c0_47] : memref<16x64xf32, #tpu.memory_space<vmem>>, vector<3x64xf32>
    %56 = arith.truncf %55 : vector<3x64xf32> to vector<3x64xbf16>
    %c5_48 = arith.constant 5 : index
    %c0_49 = arith.constant 0 : index
    %c0_50 = arith.constant 0 : index
    %57 = vector.load %arg5[%c5_48, %c0_49, %c0_50] : memref<7x64x128xbf16, #tpu.memory_space<vmem>>, vector<1x64x128xbf16>
    %58 = vector.shape_cast %57 : vector<1x64x128xbf16> to vector<64x128xbf16>
    %cst_51 = arith.constant dense<0.000000e+00> : vector<3x128xf32>
    %59 = tpu.matmul %56, %58, %cst_51 {dimension_numbers = #tpu.dot_dimension_numbers<[1], [0], [0], [1], [0, 0, 1, 1], [], []>} : vector<3x64xbf16>, vector<64x128xbf16>, vector<3x128xf32> -> vector<3x128xf32>
    %60 = arith.addf %54, %59 : vector<3x128xf32>
    %c6 = arith.constant 6 : index
    %c0_52 = arith.constant 0 : index
    %61 = vector.load %arg15[%c6, %c0_52] : memref<16x64xf32, #tpu.memory_space<vmem>>, vector<3x64xf32>
    %62 = arith.truncf %61 : vector<3x64xf32> to vector<3x64xbf16>
    %c6_53 = arith.constant 6 : index
    %c0_54 = arith.constant 0 : index
    %c0_55 = arith.constant 0 : index
    %63 = vector.load %arg5[%c6_53, %c0_54, %c0_55] : memref<7x64x128xbf16, #tpu.memory_space<vmem>>, vector<1x64x128xbf16>
    %64 = vector.shape_cast %63 : vector<1x64x128xbf16> to vector<64x128xbf16>
    %cst_56 = arith.constant dense<0.000000e+00> : vector<3x128xf32>
    %65 = tpu.matmul %62, %64, %cst_56 {dimension_numbers = #tpu.dot_dimension_numbers<[1], [0], [0], [1], [0, 0, 1, 1], [], []>} : vector<3x64xbf16>, vector<64x128xbf16>, vector<3x128xf32> -> vector<3x128xf32>
    %66 = arith.addf %60, %65 : vector<3x128xf32>
    %c0_57 = arith.constant 0 : index
    %c0_58 = arith.constant 0 : index
    %67 = vector.load %arg6[%c0_57, %c0_58] : memref<1x128xf32, #tpu.memory_space<vmem>>, vector<1x128xf32>
    %68 = vector.broadcast %67 : vector<1x128xf32> to vector<3x128xf32>
    %69 = arith.mulf %66, %68 : vector<3x128xf32>
    %c0_59 = arith.constant 0 : index
    %c0_60 = arith.constant 0 : index
    %70 = vector.load %arg7[%c0_59, %c0_60] : memref<1x128xf32, #tpu.memory_space<vmem>>, vector<1x128xf32>
    %71 = vector.broadcast %70 : vector<1x128xf32> to vector<3x128xf32>
    %72 = arith.addf %69, %71 : vector<3x128xf32>
    %cst_61 = arith.constant 0.000000e+00 : f32
    %73 = vector.broadcast %cst_61 : f32 to vector<3x128xf32>
    %74 = arith.maximumf %72, %73 : vector<3x128xf32>
    %cst_62 = arith.constant 0.000000e+00 : f32
    %75 = vector.broadcast %cst_62 : f32 to vector<16x128xf32>
    %c0_63 = arith.constant 0 : index
    %c0_64 = arith.constant 0 : index
    %76 = vector.load %arg16[%c0_63, %c0_64] : memref<16x128xf32, #tpu.memory_space<vmem>>, vector<16x128xf32>
    tpu.vector_store %arg16[%c0_63, %c0_64], %75 {strides = array<i32>} : memref<16x128xf32, #tpu.memory_space<vmem>>, vector<16x128xf32>,
    %c3_65 = arith.constant 3 : index
    %c0_66 = arith.constant 0 : index
    %77 = vector.load %arg16[%c3_65, %c0_66] : memref<16x128xf32, #tpu.memory_space<vmem>>, vector<3x128xf32>
    tpu.vector_store %arg16[%c3_65, %c0_66], %74 {strides = array<i32>} : memref<16x128xf32, #tpu.memory_space<vmem>>, vector<3x128xf32>,
    %c0_67 = arith.constant 0 : index
    %c0_68 = arith.constant 0 : index
    %78 = vector.load %arg16[%c0_67, %c0_68] : memref<16x128xf32, #tpu.memory_space<vmem>>, vector<3x128xf32>
    %79 = arith.truncf %78 : vector<3x128xf32> to vector<3x128xbf16>
    %c0_69 = arith.constant 0 : index
    %c0_70 = arith.constant 0 : index
    %c0_71 = arith.constant 0 : index
    %80 = vector.load %arg8[%c0_69, %c0_70, %c0_71] : memref<7x128x128xbf16, #tpu.memory_space<vmem>>, vector<1x128x128xbf16>
    %81 = vector.shape_cast %80 : vector<1x128x128xbf16> to vector<128x128xbf16>
    %cst_72 = arith.constant dense<0.000000e+00> : vector<3x128xf32>
    %82 = tpu.matmul %79, %81, %cst_72 {dimension_numbers = #tpu.dot_dimension_numbers<[1], [0], [0], [1], [0, 0, 1, 1], [], []>} : vector<3x128xbf16>, vector<128x128xbf16>, vector<3x128xf32> -> vector<3x128xf32>
    %c1_73 = arith.constant 1 : index
    %c0_74 = arith.constant 0 : index
    %83 = vector.load %arg16[%c1_73, %c0_74] : memref<16x128xf32, #tpu.memory_space<vmem>>, vector<3x128xf32>
    %84 = arith.truncf %83 : vector<3x128xf32> to vector<3x128xbf16>
    %c1_75 = arith.constant 1 : index
    %c0_76 = arith.constant 0 : index
    %c0_77 = arith.constant 0 : index
    %85 = vector.load %arg8[%c1_75, %c0_76, %c0_77] : memref<7x128x128xbf16, #tpu.memory_space<vmem>>, vector<1x128x128xbf16>
    %86 = vector.shape_cast %85 : vector<1x128x128xbf16> to vector<128x128xbf16>
    %cst_78 = arith.constant dense<0.000000e+00> : vector<3x128xf32>
    %87 = tpu.matmul %84, %86, %cst_78 {dimension_numbers = #tpu.dot_dimension_numbers<[1], [0], [0], [1], [0, 0, 1, 1], [], []>} : vector<3x128xbf16>, vector<128x128xbf16>, vector<3x128xf32> -> vector<3x128xf32>
    %88 = arith.addf %82, %87 : vector<3x128xf32>
    %c2_79 = arith.constant 2 : index
    %c0_80 = arith.constant 0 : index
    %89 = vector.load %arg16[%c2_79, %c0_80] : memref<16x128xf32, #tpu.memory_space<vmem>>, vector<3x128xf32>
    %90 = arith.truncf %89 : vector<3x128xf32> to vector<3x128xbf16>
    %c2_81 = arith.constant 2 : index
    %c0_82 = arith.constant 0 : index
    %c0_83 = arith.constant 0 : index
    %91 = vector.load %arg8[%c2_81, %c0_82, %c0_83] : memref<7x128x128xbf16, #tpu.memory_space<vmem>>, vector<1x128x128xbf16>
    %92 = vector.shape_cast %91 : vector<1x128x128xbf16> to vector<128x128xbf16>
    %cst_84 = arith.constant dense<0.000000e+00> : vector<3x128xf32>
    %93 = tpu.matmul %90, %92, %cst_84 {dimension_numbers = #tpu.dot_dimension_numbers<[1], [0], [0], [1], [0, 0, 1, 1], [], []>} : vector<3x128xbf16>, vector<128x128xbf16>, vector<3x128xf32> -> vector<3x128xf32>
    %94 = arith.addf %88, %93 : vector<3x128xf32>
    %c3_85 = arith.constant 3 : index
    %c0_86 = arith.constant 0 : index
    %95 = vector.load %arg16[%c3_85, %c0_86] : memref<16x128xf32, #tpu.memory_space<vmem>>, vector<3x128xf32>
    %96 = arith.truncf %95 : vector<3x128xf32> to vector<3x128xbf16>
    %c3_87 = arith.constant 3 : index
    %c0_88 = arith.constant 0 : index
    %c0_89 = arith.constant 0 : index
    %97 = vector.load %arg8[%c3_87, %c0_88, %c0_89] : memref<7x128x128xbf16, #tpu.memory_space<vmem>>, vector<1x128x128xbf16>
    %98 = vector.shape_cast %97 : vector<1x128x128xbf16> to vector<128x128xbf16>
    %cst_90 = arith.constant dense<0.000000e+00> : vector<3x128xf32>
    %99 = tpu.matmul %96, %98, %cst_90 {dimension_numbers = #tpu.dot_dimension_numbers<[1], [0], [0], [1], [0, 0, 1, 1], [], []>} : vector<3x128xbf16>, vector<128x128xbf16>, vector<3x128xf32> -> vector<3x128xf32>
    %100 = arith.addf %94, %99 : vector<3x128xf32>
    %c4_91 = arith.constant 4 : index
    %c0_92 = arith.constant 0 : index
    %101 = vector.load %arg16[%c4_91, %c0_92] : memref<16x128xf32, #tpu.memory_space<vmem>>, vector<3x128xf32>
    %102 = arith.truncf %101 : vector<3x128xf32> to vector<3x128xbf16>
    %c4_93 = arith.constant 4 : index
    %c0_94 = arith.constant 0 : index
    %c0_95 = arith.constant 0 : index
    %103 = vector.load %arg8[%c4_93, %c0_94, %c0_95] : memref<7x128x128xbf16, #tpu.memory_space<vmem>>, vector<1x128x128xbf16>
    %104 = vector.shape_cast %103 : vector<1x128x128xbf16> to vector<128x128xbf16>
    %cst_96 = arith.constant dense<0.000000e+00> : vector<3x128xf32>
    %105 = tpu.matmul %102, %104, %cst_96 {dimension_numbers = #tpu.dot_dimension_numbers<[1], [0], [0], [1], [0, 0, 1, 1], [], []>} : vector<3x128xbf16>, vector<128x128xbf16>, vector<3x128xf32> -> vector<3x128xf32>
    %106 = arith.addf %100, %105 : vector<3x128xf32>
    %c5_97 = arith.constant 5 : index
    %c0_98 = arith.constant 0 : index
    %107 = vector.load %arg16[%c5_97, %c0_98] : memref<16x128xf32, #tpu.memory_space<vmem>>, vector<3x128xf32>
    %108 = arith.truncf %107 : vector<3x128xf32> to vector<3x128xbf16>
    %c5_99 = arith.constant 5 : index
    %c0_100 = arith.constant 0 : index
    %c0_101 = arith.constant 0 : index
    %109 = vector.load %arg8[%c5_99, %c0_100, %c0_101] : memref<7x128x128xbf16, #tpu.memory_space<vmem>>, vector<1x128x128xbf16>
    %110 = vector.shape_cast %109 : vector<1x128x128xbf16> to vector<128x128xbf16>
    %cst_102 = arith.constant dense<0.000000e+00> : vector<3x128xf32>
    %111 = tpu.matmul %108, %110, %cst_102 {dimension_numbers = #tpu.dot_dimension_numbers<[1], [0], [0], [1], [0, 0, 1, 1], [], []>} : vector<3x128xbf16>, vector<128x128xbf16>, vector<3x128xf32> -> vector<3x128xf32>
    %112 = arith.addf %106, %111 : vector<3x128xf32>
    %c6_103 = arith.constant 6 : index
    %c0_104 = arith.constant 0 : index
    %113 = vector.load %arg16[%c6_103, %c0_104] : memref<16x128xf32, #tpu.memory_space<vmem>>, vector<3x128xf32>
    %114 = arith.truncf %113 : vector<3x128xf32> to vector<3x128xbf16>
    %c6_105 = arith.constant 6 : index
    %c0_106 = arith.constant 0 : index
    %c0_107 = arith.constant 0 : index
    %115 = vector.load %arg8[%c6_105, %c0_106, %c0_107] : memref<7x128x128xbf16, #tpu.memory_space<vmem>>, vector<1x128x128xbf16>
    %116 = vector.shape_cast %115 : vector<1x128x128xbf16> to vector<128x128xbf16>
    %cst_108 = arith.constant dense<0.000000e+00> : vector<3x128xf32>
    %117 = tpu.matmul %114, %116, %cst_108 {dimension_numbers = #tpu.dot_dimension_numbers<[1], [0], [0], [1], [0, 0, 1, 1], [], []>} : vector<3x128xbf16>, vector<128x128xbf16>, vector<3x128xf32> -> vector<3x128xf32>
    %118 = arith.addf %112, %117 : vector<3x128xf32>
    %c0_109 = arith.constant 0 : index
    %c0_110 = arith.constant 0 : index
    %119 = vector.load %arg9[%c0_109, %c0_110] : memref<1x128xf32, #tpu.memory_space<vmem>>, vector<1x128xf32>
    %120 = vector.broadcast %119 : vector<1x128xf32> to vector<3x128xf32>
    %121 = arith.mulf %118, %120 : vector<3x128xf32>
    %c0_111 = arith.constant 0 : index
    %c0_112 = arith.constant 0 : index
    %122 = vector.load %arg10[%c0_111, %c0_112] : memref<1x128xf32, #tpu.memory_space<vmem>>, vector<1x128xf32>
    %123 = vector.broadcast %122 : vector<1x128xf32> to vector<3x128xf32>
    %124 = arith.addf %121, %123 : vector<3x128xf32>
    %cst_113 = arith.constant 0.000000e+00 : f32
    %125 = vector.broadcast %cst_113 : f32 to vector<3x128xf32>
    %126 = arith.maximumf %124, %125 : vector<3x128xf32>
    %cst_114 = arith.constant 0.000000e+00 : f32
    %127 = vector.broadcast %cst_114 : f32 to vector<16x128xf32>
    %c0_115 = arith.constant 0 : index
    %c0_116 = arith.constant 0 : index
    %128 = vector.load %arg17[%c0_115, %c0_116] : memref<16x128xf32, #tpu.memory_space<vmem>>, vector<16x128xf32>
    tpu.vector_store %arg17[%c0_115, %c0_116], %127 {strides = array<i32>} : memref<16x128xf32, #tpu.memory_space<vmem>>, vector<16x128xf32>,
    %c3_117 = arith.constant 3 : index
    %c0_118 = arith.constant 0 : index
    %129 = vector.load %arg17[%c3_117, %c0_118] : memref<16x128xf32, #tpu.memory_space<vmem>>, vector<3x128xf32>
    tpu.vector_store %arg17[%c3_117, %c0_118], %126 {strides = array<i32>} : memref<16x128xf32, #tpu.memory_space<vmem>>, vector<3x128xf32>,
    %c0_119 = arith.constant 0 : index
    %c0_120 = arith.constant 0 : index
    %130 = vector.load %arg17[%c0_119, %c0_120] : memref<16x128xf32, #tpu.memory_space<vmem>>, vector<3x128xf32>
    %131 = arith.truncf %130 : vector<3x128xf32> to vector<3x128xbf16>
    %c0_121 = arith.constant 0 : index
    %c0_122 = arith.constant 0 : index
    %c0_123 = arith.constant 0 : index
    %132 = vector.load %arg11[%c0_121, %c0_122, %c0_123] : memref<7x128x256xbf16, #tpu.memory_space<vmem>>, vector<1x128x256xbf16>
    %133 = vector.shape_cast %132 : vector<1x128x256xbf16> to vector<128x256xbf16>
    %cst_124 = arith.constant dense<0.000000e+00> : vector<3x256xf32>
    %134 = tpu.matmul %131, %133, %cst_124 {dimension_numbers = #tpu.dot_dimension_numbers<[1], [0], [0], [1], [0, 0, 1, 1], [], []>} : vector<3x128xbf16>, vector<128x256xbf16>, vector<3x256xf32> -> vector<3x256xf32>
    %c1_125 = arith.constant 1 : index
    %c0_126 = arith.constant 0 : index
    %135 = vector.load %arg17[%c1_125, %c0_126] : memref<16x128xf32, #tpu.memory_space<vmem>>, vector<3x128xf32>
    %136 = arith.truncf %135 : vector<3x128xf32> to vector<3x128xbf16>
    %c1_127 = arith.constant 1 : index
    %c0_128 = arith.constant 0 : index
    %c0_129 = arith.constant 0 : index
    %137 = vector.load %arg11[%c1_127, %c0_128, %c0_129] : memref<7x128x256xbf16, #tpu.memory_space<vmem>>, vector<1x128x256xbf16>
    %138 = vector.shape_cast %137 : vector<1x128x256xbf16> to vector<128x256xbf16>
    %cst_130 = arith.constant dense<0.000000e+00> : vector<3x256xf32>
    %139 = tpu.matmul %136, %138, %cst_130 {dimension_numbers = #tpu.dot_dimension_numbers<[1], [0], [0], [1], [0, 0, 1, 1], [], []>} : vector<3x128xbf16>, vector<128x256xbf16>, vector<3x256xf32> -> vector<3x256xf32>
    %140 = arith.addf %134, %139 : vector<3x256xf32>
    %c2_131 = arith.constant 2 : index
    %c0_132 = arith.constant 0 : index
    %141 = vector.load %arg17[%c2_131, %c0_132] : memref<16x128xf32, #tpu.memory_space<vmem>>, vector<3x128xf32>
    %142 = arith.truncf %141 : vector<3x128xf32> to vector<3x128xbf16>
    %c2_133 = arith.constant 2 : index
    %c0_134 = arith.constant 0 : index
    %c0_135 = arith.constant 0 : index
    %143 = vector.load %arg11[%c2_133, %c0_134, %c0_135] : memref<7x128x256xbf16, #tpu.memory_space<vmem>>, vector<1x128x256xbf16>
    %144 = vector.shape_cast %143 : vector<1x128x256xbf16> to vector<128x256xbf16>
    %cst_136 = arith.constant dense<0.000000e+00> : vector<3x256xf32>
    %145 = tpu.matmul %142, %144, %cst_136 {dimension_numbers = #tpu.dot_dimension_numbers<[1], [0], [0], [1], [0, 0, 1, 1], [], []>} : vector<3x128xbf16>, vector<128x256xbf16>, vector<3x256xf32> -> vector<3x256xf32>
    %146 = arith.addf %140, %145 : vector<3x256xf32>
    %c3_137 = arith.constant 3 : index
    %c0_138 = arith.constant 0 : index
    %147 = vector.load %arg17[%c3_137, %c0_138] : memref<16x128xf32, #tpu.memory_space<vmem>>, vector<3x128xf32>
    %148 = arith.truncf %147 : vector<3x128xf32> to vector<3x128xbf16>
    %c3_139 = arith.constant 3 : index
    %c0_140 = arith.constant 0 : index
    %c0_141 = arith.constant 0 : index
    %149 = vector.load %arg11[%c3_139, %c0_140, %c0_141] : memref<7x128x256xbf16, #tpu.memory_space<vmem>>, vector<1x128x256xbf16>
    %150 = vector.shape_cast %149 : vector<1x128x256xbf16> to vector<128x256xbf16>
    %cst_142 = arith.constant dense<0.000000e+00> : vector<3x256xf32>
    %151 = tpu.matmul %148, %150, %cst_142 {dimension_numbers = #tpu.dot_dimension_numbers<[1], [0], [0], [1], [0, 0, 1, 1], [], []>} : vector<3x128xbf16>, vector<128x256xbf16>, vector<3x256xf32> -> vector<3x256xf32>
    %152 = arith.addf %146, %151 : vector<3x256xf32>
    %c4_143 = arith.constant 4 : index
    %c0_144 = arith.constant 0 : index
    %153 = vector.load %arg17[%c4_143, %c0_144] : memref<16x128xf32, #tpu.memory_space<vmem>>, vector<3x128xf32>
    %154 = arith.truncf %153 : vector<3x128xf32> to vector<3x128xbf16>
    %c4_145 = arith.constant 4 : index
    %c0_146 = arith.constant 0 : index
    %c0_147 = arith.constant 0 : index
    %155 = vector.load %arg11[%c4_145, %c0_146, %c0_147] : memref<7x128x256xbf16, #tpu.memory_space<vmem>>, vector<1x128x256xbf16>
    %156 = vector.shape_cast %155 : vector<1x128x256xbf16> to vector<128x256xbf16>
    %cst_148 = arith.constant dense<0.000000e+00> : vector<3x256xf32>
    %157 = tpu.matmul %154, %156, %cst_148 {dimension_numbers = #tpu.dot_dimension_numbers<[1], [0], [0], [1], [0, 0, 1, 1], [], []>} : vector<3x128xbf16>, vector<128x256xbf16>, vector<3x256xf32> -> vector<3x256xf32>
    %158 = arith.addf %152, %157 : vector<3x256xf32>
    %c5_149 = arith.constant 5 : index
    %c0_150 = arith.constant 0 : index
    %159 = vector.load %arg17[%c5_149, %c0_150] : memref<16x128xf32, #tpu.memory_space<vmem>>, vector<3x128xf32>
    %160 = arith.truncf %159 : vector<3x128xf32> to vector<3x128xbf16>
    %c5_151 = arith.constant 5 : index
    %c0_152 = arith.constant 0 : index
    %c0_153 = arith.constant 0 : index
    %161 = vector.load %arg11[%c5_151, %c0_152, %c0_153] : memref<7x128x256xbf16, #tpu.memory_space<vmem>>, vector<1x128x256xbf16>
    %162 = vector.shape_cast %161 : vector<1x128x256xbf16> to vector<128x256xbf16>
    %cst_154 = arith.constant dense<0.000000e+00> : vector<3x256xf32>
    %163 = tpu.matmul %160, %162, %cst_154 {dimension_numbers = #tpu.dot_dimension_numbers<[1], [0], [0], [1], [0, 0, 1, 1], [], []>} : vector<3x128xbf16>, vector<128x256xbf16>, vector<3x256xf32> -> vector<3x256xf32>
    %164 = arith.addf %158, %163 : vector<3x256xf32>
    %c6_155 = arith.constant 6 : index
    %c0_156 = arith.constant 0 : index
    %165 = vector.load %arg17[%c6_155, %c0_156] : memref<16x128xf32, #tpu.memory_space<vmem>>, vector<3x128xf32>
    %166 = arith.truncf %165 : vector<3x128xf32> to vector<3x128xbf16>
    %c6_157 = arith.constant 6 : index
    %c0_158 = arith.constant 0 : index
    %c0_159 = arith.constant 0 : index
    %167 = vector.load %arg11[%c6_157, %c0_158, %c0_159] : memref<7x128x256xbf16, #tpu.memory_space<vmem>>, vector<1x128x256xbf16>
    %168 = vector.shape_cast %167 : vector<1x128x256xbf16> to vector<128x256xbf16>
    %cst_160 = arith.constant dense<0.000000e+00> : vector<3x256xf32>
    %169 = tpu.matmul %166, %168, %cst_160 {dimension_numbers = #tpu.dot_dimension_numbers<[1], [0], [0], [1], [0, 0, 1, 1], [], []>} : vector<3x128xbf16>, vector<128x256xbf16>, vector<3x256xf32> -> vector<3x256xf32>
    %170 = arith.addf %164, %169 : vector<3x256xf32>
    %c0_161 = arith.constant 0 : index
    %c0_162 = arith.constant 0 : index
    %171 = vector.load %arg12[%c0_161, %c0_162] : memref<1x256xf32, #tpu.memory_space<vmem>>, vector<1x256xf32>
    %172 = vector.broadcast %171 : vector<1x256xf32> to vector<3x256xf32>
    %173 = arith.mulf %170, %172 : vector<3x256xf32>
    %c0_163 = arith.constant 0 : index
    %c0_164 = arith.constant 0 : index
    %174 = vector.load %arg13[%c0_163, %c0_164] : memref<1x256xf32, #tpu.memory_space<vmem>>, vector<1x256xf32>
    %175 = vector.broadcast %174 : vector<1x256xf32> to vector<3x256xf32>
    %176 = arith.addf %173, %175 : vector<3x256xf32>
    %cst_165 = arith.constant 0.000000e+00 : f32
    %177 = vector.broadcast %cst_165 : f32 to vector<3x256xf32>
    %178 = arith.maximumf %176, %177 : vector<3x256xf32>
    %cst_166 = arith.constant 0.000000e+00 : f32
    %179 = vector.broadcast %cst_166 : f32 to vector<1x256xf32>
    %180 = vector.extract_strided_slice %178 {offsets = [0, 0], sizes = [2, 256], strides = [1, 1]} : vector<3x256xf32> to vector<2x256xf32>
    %cst_167 = arith.constant dense<0xFF800000> : vector<256xf32>
    %181 = vector.multi_reduction <maximumf>, %180, %cst_167 [0] : vector<2x256xf32> to vector<256xf32>
    %182 = vector.shape_cast %181 : vector<256xf32> to vector<1x256xf32>
    %183 = arith.addf %179, %182 : vector<1x256xf32>
    %cst_168 = arith.constant 1.000000e+00 : f32
    %184 = vector.broadcast %cst_168 : f32 to vector<1x256xf32>
    %185 = arith.mulf %183, %184 : vector<1x256xf32>
    %c0_169 = arith.constant 0 : index
    %c0_170 = arith.constant 0 : index
    %c0_171 = arith.constant 0 : index
    %186 = vector.load %arg14[%c0_169, %c0_170, %c0_171] : memref<1x1x256xf32, #tpu.memory_space<vmem>>, vector<1x1x256xf32>
    %187 = vector.shape_cast %186 : vector<1x1x256xf32> to vector<1x256xf32>
    %188 = vector.shape_cast %185 : vector<1x256xf32> to vector<1x1x256xf32>
    tpu.vector_store %arg14[%c0_169, %c0_170, %c0_171], %188 {strides = array<i32>} : memref<1x1x256xf32, #tpu.memory_space<vmem>>, vector<1x1x256xf32>,
    return
  }
  func.func @transform_0(%arg0: i32) -> (i32, i32, i32) {
    %c0_i32 = arith.constant 0 : i32
    %c0_i32_0 = arith.constant 0 : i32
    %c0_i32_1 = arith.constant 0 : i32
    return %arg0, %c0_i32, %c0_i32_0 : i32, i32, i32
  }
  func.func @transform_1(%arg0: i32) -> (i32, i32) {
    %c0_i32 = arith.constant 0 : i32
    %c0_i32_0 = arith.constant 0 : i32
    %c0_i32_1 = arith.constant 0 : i32
    return %c0_i32, %c0_i32_0 : i32, i32
  }
  func.func @transform_2(%arg0: i32) -> (i32, i32) {
    %c0_i32 = arith.constant 0 : i32
    %c0_i32_0 = arith.constant 0 : i32
    %c0_i32_1 = arith.constant 0 : i32
    return %c0_i32, %c0_i32_0 : i32, i32
  }
  func.func @transform_3(%arg0: i32) -> (i32, i32) {
    %c0_i32 = arith.constant 0 : i32
    %c0_i32_0 = arith.constant 0 : i32
    %c0_i32_1 = arith.constant 0 : i32
    return %c0_i32, %c0_i32_0 : i32, i32
  }
  func.func @transform_4(%arg0: i32) -> (i32, i32, i32) {
    %c0_i32 = arith.constant 0 : i32
    %c0_i32_0 = arith.constant 0 : i32
    %c0_i32_1 = arith.constant 0 : i32
    %c0_i32_2 = arith.constant 0 : i32
    return %c0_i32, %c0_i32_0, %c0_i32_1 : i32, i32, i32
  }
  func.func @transform_5(%arg0: i32) -> (i32, i32) {
    %c0_i32 = arith.constant 0 : i32
    %c0_i32_0 = arith.constant 0 : i32
    %c0_i32_1 = arith.constant 0 : i32
    return %c0_i32, %c0_i32_0 : i32, i32
  }
  func.func @transform_6(%arg0: i32) -> (i32, i32) {
    %c0_i32 = arith.constant 0 : i32
    %c0_i32_0 = arith.constant 0 : i32
    %c0_i32_1 = arith.constant 0 : i32
    return %c0_i32, %c0_i32_0 : i32, i32
  }
  func.func @transform_7(%arg0: i32) -> (i32, i32, i32) {
    %c0_i32 = arith.constant 0 : i32
    %c0_i32_0 = arith.constant 0 : i32
    %c0_i32_1 = arith.constant 0 : i32
    %c0_i32_2 = arith.constant 0 : i32
    return %c0_i32, %c0_i32_0, %c0_i32_1 : i32, i32, i32
  }
  func.func @transform_8(%arg0: i32) -> (i32, i32) {
    %c0_i32 = arith.constant 0 : i32
    %c0_i32_0 = arith.constant 0 : i32
    %c0_i32_1 = arith.constant 0 : i32
    return %c0_i32, %c0_i32_0 : i32, i32
  }
  func.func @transform_9(%arg0: i32) -> (i32, i32) {
    %c0_i32 = arith.constant 0 : i32
    %c0_i32_0 = arith.constant 0 : i32
    %c0_i32_1 = arith.constant 0 : i32
    return %c0_i32, %c0_i32_0 : i32, i32
  }
  func.func @transform_10(%arg0: i32) -> (i32, i32, i32) {
    %c0_i32 = arith.constant 0 : i32
    %c0_i32_0 = arith.constant 0 : i32
    %c0_i32_1 = arith.constant 0 : i32
    %c0_i32_2 = arith.constant 0 : i32
    return %c0_i32, %c0_i32_0, %c0_i32_1 : i32, i32, i32
  }
  func.func @transform_11(%arg0: i32) -> (i32, i32) {
    %c0_i32 = arith.constant 0 : i32
    %c0_i32_0 = arith.constant 0 : i32
    %c0_i32_1 = arith.constant 0 : i32
    return %c0_i32, %c0_i32_0 : i32, i32
  }
  func.func @transform_12(%arg0: i32) -> (i32, i32) {
    %c0_i32 = arith.constant 0 : i32
    %c0_i32_0 = arith.constant 0 : i32
    %c0_i32_1 = arith.constant 0 : i32
    return %c0_i32, %c0_i32_0 : i32, i32
  }
  func.func @transform_13(%arg0: i32) -> (i32, i32, i32) {
    %c0_i32 = arith.constant 0 : i32
    %c0_i32_0 = arith.constant 0 : i32
    %c0_i32_1 = arith.constant 0 : i32
    return %arg0, %c0_i32, %c0_i32_0 : i32, i32, i32
  }
}

module attributes {stable_mosaic.version = 11 : i64} {
  func.func @kernel(%arg0: i32, %arg1: memref<1x167x49xbf16, #tpu.memory_space<vmem>>, %arg2: memref<49x64xbf16, #tpu.memory_space<vmem>>, %arg3: memref<1x64xf32, #tpu.memory_space<vmem>>, %arg4: memref<1x64xf32, #tpu.memory_space<vmem>>, %arg5: memref<9x64x128xbf16, #tpu.memory_space<vmem>>, %arg6: memref<1x128xf32, #tpu.memory_space<vmem>>, %arg7: memref<1x128xf32, #tpu.memory_space<vmem>>, %arg8: memref<9x128x128xbf16, #tpu.memory_space<vmem>>, %arg9: memref<1x128xf32, #tpu.memory_space<vmem>>, %arg10: memref<1x128xf32, #tpu.memory_space<vmem>>, %arg11: memref<9x128x256xbf16, #tpu.memory_space<vmem>>, %arg12: memref<1x256xf32, #tpu.memory_space<vmem>>, %arg13: memref<1x256xf32, #tpu.memory_space<vmem>>, %arg14: memref<1x1x256xf32, #tpu.memory_space<vmem>>, %arg15: memref<32x64xf32, #tpu.memory_space<vmem>>, %arg16: memref<32x128xf32, #tpu.memory_space<vmem>>, %arg17: memref<32x128xf32, #tpu.memory_space<vmem>>) attributes {dimension_semantics = [#tpu.dimension_semantics<parallel>], iteration_bounds = array<i64: 2>, scalar_prefetch = 0 : i64, scratch_operands = 3 : i64, tpu.core_type = #tpu.core_type<tc>, window_params = [{transform_indices = @transform_0, window_bounds = array<i64: 1, 167, 49>}, {pipeline_mode = #tpu.pipeline_mode<synchronous>, transform_indices = @transform_1, window_bounds = array<i64: 49, 64>}, {pipeline_mode = #tpu.pipeline_mode<synchronous>, transform_indices = @transform_2, window_bounds = array<i64: 1, 64>}, {pipeline_mode = #tpu.pipeline_mode<synchronous>, transform_indices = @transform_3, window_bounds = array<i64: 1, 64>}, {pipeline_mode = #tpu.pipeline_mode<synchronous>, transform_indices = @transform_4, window_bounds = array<i64: 9, 64, 128>}, {pipeline_mode = #tpu.pipeline_mode<synchronous>, transform_indices = @transform_5, window_bounds = array<i64: 1, 128>}, {pipeline_mode = #tpu.pipeline_mode<synchronous>, transform_indices = @transform_6, window_bounds = array<i64: 1, 128>}, {pipeline_mode = #tpu.pipeline_mode<synchronous>, transform_indices = @transform_7, window_bounds = array<i64: 9, 128, 128>}, {pipeline_mode = #tpu.pipeline_mode<synchronous>, transform_indices = @transform_8, window_bounds = array<i64: 1, 128>}, {pipeline_mode = #tpu.pipeline_mode<synchronous>, transform_indices = @transform_9, window_bounds = array<i64: 1, 128>}, {pipeline_mode = #tpu.pipeline_mode<synchronous>, transform_indices = @transform_10, window_bounds = array<i64: 9, 128, 256>}, {pipeline_mode = #tpu.pipeline_mode<synchronous>, transform_indices = @transform_11, window_bounds = array<i64: 1, 256>}, {pipeline_mode = #tpu.pipeline_mode<synchronous>, transform_indices = @transform_12, window_bounds = array<i64: 1, 256>}, {transform_indices = @transform_13, window_bounds = array<i64: 1, 1, 256>}]} {
    %c0 = arith.constant 0 : index
    %c0_0 = arith.constant 0 : index
    %c0_1 = arith.constant 0 : index
    %0 = vector.load %arg1[%c0, %c0_0, %c0_1] : memref<1x167x49xbf16, #tpu.memory_space<vmem>>, vector<1x167x49xbf16>
    %1 = vector.shape_cast %0 : vector<1x167x49xbf16> to vector<167x49xbf16>
    %c0_2 = arith.constant 0 : index
    %c0_3 = arith.constant 0 : index
    %2 = vector.load %arg2[%c0_2, %c0_3] : memref<49x64xbf16, #tpu.memory_space<vmem>>, vector<49x64xbf16>
    %cst = arith.constant dense<0.000000e+00> : vector<167x64xf32>
    %3 = tpu.matmul %1, %2, %cst {dimension_numbers = #tpu.dot_dimension_numbers<[1], [0], [0], [1], [0, 0, 1, 1], [], []>} : vector<167x49xbf16>, vector<49x64xbf16>, vector<167x64xf32> -> vector<167x64xf32>
    %c0_4 = arith.constant 0 : index
    %c0_5 = arith.constant 0 : index
    %4 = vector.load %arg3[%c0_4, %c0_5] : memref<1x64xf32, #tpu.memory_space<vmem>>, vector<1x64xf32>
    %5 = vector.broadcast %4 : vector<1x64xf32> to vector<167x64xf32>
    %6 = arith.mulf %3, %5 : vector<167x64xf32>
    %c0_6 = arith.constant 0 : index
    %c0_7 = arith.constant 0 : index
    %7 = vector.load %arg4[%c0_6, %c0_7] : memref<1x64xf32, #tpu.memory_space<vmem>>, vector<1x64xf32>
    %8 = vector.broadcast %7 : vector<1x64xf32> to vector<167x64xf32>
    %9 = arith.addf %6, %8 : vector<167x64xf32>
    %cst_8 = arith.constant 0.000000e+00 : f32
    %10 = vector.broadcast %cst_8 : f32 to vector<167x64xf32>
    %11 = arith.maximumf %9, %10 : vector<167x64xf32>
    %cst_9 = arith.constant 0.000000e+00 : f32
    %12 = vector.broadcast %cst_9 : f32 to vector<32x64xf32>
    %c0_10 = arith.constant 0 : index
    %c0_11 = arith.constant 0 : index
    %13 = vector.load %arg15[%c0_10, %c0_11] : memref<32x64xf32, #tpu.memory_space<vmem>>, vector<32x64xf32>
    tpu.vector_store %arg15[%c0_10, %c0_11], %12 {strides = array<i32>} : memref<32x64xf32, #tpu.memory_space<vmem>>, vector<32x64xf32>,
    %14 = vector.extract_strided_slice %11 {offsets = [0, 0], sizes = [4, 64], strides = [1, 1]} : vector<167x64xf32> to vector<4x64xf32>
    %cst_12 = arith.constant dense<0xFF800000> : vector<64xf32>
    %15 = vector.multi_reduction <maximumf>, %14, %cst_12 [0] : vector<4x64xf32> to vector<64xf32>
    %16 = vector.shape_cast %15 : vector<64xf32> to vector<1x64xf32>
    %c4 = arith.constant 4 : index
    %c0_13 = arith.constant 0 : index
    %17 = vector.load %arg15[%c4, %c0_13] : memref<32x64xf32, #tpu.memory_space<vmem>>, vector<1x64xf32>
    tpu.vector_store %arg15[%c4, %c0_13], %16 {strides = array<i32>} : memref<32x64xf32, #tpu.memory_space<vmem>>, vector<1x64xf32>,
    %18 = vector.extract_strided_slice %11 {offsets = [4, 0], sizes = [8, 64], strides = [1, 1]} : vector<167x64xf32> to vector<8x64xf32>
    %cst_14 = arith.constant dense<0xFF800000> : vector<64xf32>
    %19 = vector.multi_reduction <maximumf>, %18, %cst_14 [0] : vector<8x64xf32> to vector<64xf32>
    %20 = vector.shape_cast %19 : vector<64xf32> to vector<1x64xf32>
    %c5 = arith.constant 5 : index
    %c0_15 = arith.constant 0 : index
    %21 = vector.load %arg15[%c5, %c0_15] : memref<32x64xf32, #tpu.memory_space<vmem>>, vector<1x64xf32>
    tpu.vector_store %arg15[%c5, %c0_15], %20 {strides = array<i32>} : memref<32x64xf32, #tpu.memory_space<vmem>>, vector<1x64xf32>,
    %22 = vector.extract_strided_slice %11 {offsets = [12, 0], sizes = [8, 64], strides = [1, 1]} : vector<167x64xf32> to vector<8x64xf32>
    %cst_16 = arith.constant dense<0xFF800000> : vector<64xf32>
    %23 = vector.multi_reduction <maximumf>, %22, %cst_16 [0] : vector<8x64xf32> to vector<64xf32>
    %24 = vector.shape_cast %23 : vector<64xf32> to vector<1x64xf32>
    %c6 = arith.constant 6 : index
    %c0_17 = arith.constant 0 : index
    %25 = vector.load %arg15[%c6, %c0_17] : memref<32x64xf32, #tpu.memory_space<vmem>>, vector<1x64xf32>
    tpu.vector_store %arg15[%c6, %c0_17], %24 {strides = array<i32>} : memref<32x64xf32, #tpu.memory_space<vmem>>, vector<1x64xf32>,
    %26 = vector.extract_strided_slice %11 {offsets = [20, 0], sizes = [8, 64], strides = [1, 1]} : vector<167x64xf32> to vector<8x64xf32>
    %cst_18 = arith.constant dense<0xFF800000> : vector<64xf32>
    %27 = vector.multi_reduction <maximumf>, %26, %cst_18 [0] : vector<8x64xf32> to vector<64xf32>
    %28 = vector.shape_cast %27 : vector<64xf32> to vector<1x64xf32>
    %c7 = arith.constant 7 : index
    %c0_19 = arith.constant 0 : index
    %29 = vector.load %arg15[%c7, %c0_19] : memref<32x64xf32, #tpu.memory_space<vmem>>, vector<1x64xf32>
    tpu.vector_store %arg15[%c7, %c0_19], %28 {strides = array<i32>} : memref<32x64xf32, #tpu.memory_space<vmem>>, vector<1x64xf32>,
    %30 = vector.extract_strided_slice %11 {offsets = [28, 0], sizes = [8, 64], strides = [1, 1]} : vector<167x64xf32> to vector<8x64xf32>
    %cst_20 = arith.constant dense<0xFF800000> : vector<64xf32>
    %31 = vector.multi_reduction <maximumf>, %30, %cst_20 [0] : vector<8x64xf32> to vector<64xf32>
    %32 = vector.shape_cast %31 : vector<64xf32> to vector<1x64xf32>
    %c8 = arith.constant 8 : index
    %c0_21 = arith.constant 0 : index
    %33 = vector.load %arg15[%c8, %c0_21] : memref<32x64xf32, #tpu.memory_space<vmem>>, vector<1x64xf32>
    tpu.vector_store %arg15[%c8, %c0_21], %32 {strides = array<i32>} : memref<32x64xf32, #tpu.memory_space<vmem>>, vector<1x64xf32>,
    %34 = vector.extract_strided_slice %11 {offsets = [36, 0], sizes = [8, 64], strides = [1, 1]} : vector<167x64xf32> to vector<8x64xf32>
    %cst_22 = arith.constant dense<0xFF800000> : vector<64xf32>
    %35 = vector.multi_reduction <maximumf>, %34, %cst_22 [0] : vector<8x64xf32> to vector<64xf32>
    %36 = vector.shape_cast %35 : vector<64xf32> to vector<1x64xf32>
    %c9 = arith.constant 9 : index
    %c0_23 = arith.constant 0 : index
    %37 = vector.load %arg15[%c9, %c0_23] : memref<32x64xf32, #tpu.memory_space<vmem>>, vector<1x64xf32>
    tpu.vector_store %arg15[%c9, %c0_23], %36 {strides = array<i32>} : memref<32x64xf32, #tpu.memory_space<vmem>>, vector<1x64xf32>,
    %38 = vector.extract_strided_slice %11 {offsets = [44, 0], sizes = [8, 64], strides = [1, 1]} : vector<167x64xf32> to vector<8x64xf32>
    %cst_24 = arith.constant dense<0xFF800000> : vector<64xf32>
    %39 = vector.multi_reduction <maximumf>, %38, %cst_24 [0] : vector<8x64xf32> to vector<64xf32>
    %40 = vector.shape_cast %39 : vector<64xf32> to vector<1x64xf32>
    %c10 = arith.constant 10 : index
    %c0_25 = arith.constant 0 : index
    %41 = vector.load %arg15[%c10, %c0_25] : memref<32x64xf32, #tpu.memory_space<vmem>>, vector<1x64xf32>
    tpu.vector_store %arg15[%c10, %c0_25], %40 {strides = array<i32>} : memref<32x64xf32, #tpu.memory_space<vmem>>, vector<1x64xf32>,
    %42 = vector.extract_strided_slice %11 {offsets = [52, 0], sizes = [8, 64], strides = [1, 1]} : vector<167x64xf32> to vector<8x64xf32>
    %cst_26 = arith.constant dense<0xFF800000> : vector<64xf32>
    %43 = vector.multi_reduction <maximumf>, %42, %cst_26 [0] : vector<8x64xf32> to vector<64xf32>
    %44 = vector.shape_cast %43 : vector<64xf32> to vector<1x64xf32>
    %c11 = arith.constant 11 : index
    %c0_27 = arith.constant 0 : index
    %45 = vector.load %arg15[%c11, %c0_27] : memref<32x64xf32, #tpu.memory_space<vmem>>, vector<1x64xf32>
    tpu.vector_store %arg15[%c11, %c0_27], %44 {strides = array<i32>} : memref<32x64xf32, #tpu.memory_space<vmem>>, vector<1x64xf32>,
    %46 = vector.extract_strided_slice %11 {offsets = [60, 0], sizes = [8, 64], strides = [1, 1]} : vector<167x64xf32> to vector<8x64xf32>
    %cst_28 = arith.constant dense<0xFF800000> : vector<64xf32>
    %47 = vector.multi_reduction <maximumf>, %46, %cst_28 [0] : vector<8x64xf32> to vector<64xf32>
    %48 = vector.shape_cast %47 : vector<64xf32> to vector<1x64xf32>
    %c12 = arith.constant 12 : index
    %c0_29 = arith.constant 0 : index
    %49 = vector.load %arg15[%c12, %c0_29] : memref<32x64xf32, #tpu.memory_space<vmem>>, vector<1x64xf32>
    tpu.vector_store %arg15[%c12, %c0_29], %48 {strides = array<i32>} : memref<32x64xf32, #tpu.memory_space<vmem>>, vector<1x64xf32>,
    %50 = vector.extract_strided_slice %11 {offsets = [68, 0], sizes = [8, 64], strides = [1, 1]} : vector<167x64xf32> to vector<8x64xf32>
    %cst_30 = arith.constant dense<0xFF800000> : vector<64xf32>
    %51 = vector.multi_reduction <maximumf>, %50, %cst_30 [0] : vector<8x64xf32> to vector<64xf32>
    %52 = vector.shape_cast %51 : vector<64xf32> to vector<1x64xf32>
    %c13 = arith.constant 13 : index
    %c0_31 = arith.constant 0 : index
    %53 = vector.load %arg15[%c13, %c0_31] : memref<32x64xf32, #tpu.memory_space<vmem>>, vector<1x64xf32>
    tpu.vector_store %arg15[%c13, %c0_31], %52 {strides = array<i32>} : memref<32x64xf32, #tpu.memory_space<vmem>>, vector<1x64xf32>,
    %54 = vector.extract_strided_slice %11 {offsets = [76, 0], sizes = [8, 64], strides = [1, 1]} : vector<167x64xf32> to vector<8x64xf32>
    %cst_32 = arith.constant dense<0xFF800000> : vector<64xf32>
    %55 = vector.multi_reduction <maximumf>, %54, %cst_32 [0] : vector<8x64xf32> to vector<64xf32>
    %56 = vector.shape_cast %55 : vector<64xf32> to vector<1x64xf32>
    %c14 = arith.constant 14 : index
    %c0_33 = arith.constant 0 : index
    %57 = vector.load %arg15[%c14, %c0_33] : memref<32x64xf32, #tpu.memory_space<vmem>>, vector<1x64xf32>
    tpu.vector_store %arg15[%c14, %c0_33], %56 {strides = array<i32>} : memref<32x64xf32, #tpu.memory_space<vmem>>, vector<1x64xf32>,
    %58 = vector.extract_strided_slice %11 {offsets = [84, 0], sizes = [8, 64], strides = [1, 1]} : vector<167x64xf32> to vector<8x64xf32>
    %cst_34 = arith.constant dense<0xFF800000> : vector<64xf32>
    %59 = vector.multi_reduction <maximumf>, %58, %cst_34 [0] : vector<8x64xf32> to vector<64xf32>
    %60 = vector.shape_cast %59 : vector<64xf32> to vector<1x64xf32>
    %c15 = arith.constant 15 : index
    %c0_35 = arith.constant 0 : index
    %61 = vector.load %arg15[%c15, %c0_35] : memref<32x64xf32, #tpu.memory_space<vmem>>, vector<1x64xf32>
    tpu.vector_store %arg15[%c15, %c0_35], %60 {strides = array<i32>} : memref<32x64xf32, #tpu.memory_space<vmem>>, vector<1x64xf32>,
    %62 = vector.extract_strided_slice %11 {offsets = [92, 0], sizes = [8, 64], strides = [1, 1]} : vector<167x64xf32> to vector<8x64xf32>
    %cst_36 = arith.constant dense<0xFF800000> : vector<64xf32>
    %63 = vector.multi_reduction <maximumf>, %62, %cst_36 [0] : vector<8x64xf32> to vector<64xf32>
    %64 = vector.shape_cast %63 : vector<64xf32> to vector<1x64xf32>
    %c16 = arith.constant 16 : index
    %c0_37 = arith.constant 0 : index
    %65 = vector.load %arg15[%c16, %c0_37] : memref<32x64xf32, #tpu.memory_space<vmem>>, vector<1x64xf32>
    tpu.vector_store %arg15[%c16, %c0_37], %64 {strides = array<i32>} : memref<32x64xf32, #tpu.memory_space<vmem>>, vector<1x64xf32>,
    %66 = vector.extract_strided_slice %11 {offsets = [100, 0], sizes = [8, 64], strides = [1, 1]} : vector<167x64xf32> to vector<8x64xf32>
    %cst_38 = arith.constant dense<0xFF800000> : vector<64xf32>
    %67 = vector.multi_reduction <maximumf>, %66, %cst_38 [0] : vector<8x64xf32> to vector<64xf32>
    %68 = vector.shape_cast %67 : vector<64xf32> to vector<1x64xf32>
    %c17 = arith.constant 17 : index
    %c0_39 = arith.constant 0 : index
    %69 = vector.load %arg15[%c17, %c0_39] : memref<32x64xf32, #tpu.memory_space<vmem>>, vector<1x64xf32>
    tpu.vector_store %arg15[%c17, %c0_39], %68 {strides = array<i32>} : memref<32x64xf32, #tpu.memory_space<vmem>>, vector<1x64xf32>,
    %70 = vector.extract_strided_slice %11 {offsets = [108, 0], sizes = [8, 64], strides = [1, 1]} : vector<167x64xf32> to vector<8x64xf32>
    %cst_40 = arith.constant dense<0xFF800000> : vector<64xf32>
    %71 = vector.multi_reduction <maximumf>, %70, %cst_40 [0] : vector<8x64xf32> to vector<64xf32>
    %72 = vector.shape_cast %71 : vector<64xf32> to vector<1x64xf32>
    %c18 = arith.constant 18 : index
    %c0_41 = arith.constant 0 : index
    %73 = vector.load %arg15[%c18, %c0_41] : memref<32x64xf32, #tpu.memory_space<vmem>>, vector<1x64xf32>
    tpu.vector_store %arg15[%c18, %c0_41], %72 {strides = array<i32>} : memref<32x64xf32, #tpu.memory_space<vmem>>, vector<1x64xf32>,
    %74 = vector.extract_strided_slice %11 {offsets = [116, 0], sizes = [8, 64], strides = [1, 1]} : vector<167x64xf32> to vector<8x64xf32>
    %cst_42 = arith.constant dense<0xFF800000> : vector<64xf32>
    %75 = vector.multi_reduction <maximumf>, %74, %cst_42 [0] : vector<8x64xf32> to vector<64xf32>
    %76 = vector.shape_cast %75 : vector<64xf32> to vector<1x64xf32>
    %c19 = arith.constant 19 : index
    %c0_43 = arith.constant 0 : index
    %77 = vector.load %arg15[%c19, %c0_43] : memref<32x64xf32, #tpu.memory_space<vmem>>, vector<1x64xf32>
    tpu.vector_store %arg15[%c19, %c0_43], %76 {strides = array<i32>} : memref<32x64xf32, #tpu.memory_space<vmem>>, vector<1x64xf32>,
    %78 = vector.extract_strided_slice %11 {offsets = [124, 0], sizes = [8, 64], strides = [1, 1]} : vector<167x64xf32> to vector<8x64xf32>
    %cst_44 = arith.constant dense<0xFF800000> : vector<64xf32>
    %79 = vector.multi_reduction <maximumf>, %78, %cst_44 [0] : vector<8x64xf32> to vector<64xf32>
    %80 = vector.shape_cast %79 : vector<64xf32> to vector<1x64xf32>
    %c20 = arith.constant 20 : index
    %c0_45 = arith.constant 0 : index
    %81 = vector.load %arg15[%c20, %c0_45] : memref<32x64xf32, #tpu.memory_space<vmem>>, vector<1x64xf32>
    tpu.vector_store %arg15[%c20, %c0_45], %80 {strides = array<i32>} : memref<32x64xf32, #tpu.memory_space<vmem>>, vector<1x64xf32>,
    %82 = vector.extract_strided_slice %11 {offsets = [132, 0], sizes = [8, 64], strides = [1, 1]} : vector<167x64xf32> to vector<8x64xf32>
    %cst_46 = arith.constant dense<0xFF800000> : vector<64xf32>
    %83 = vector.multi_reduction <maximumf>, %82, %cst_46 [0] : vector<8x64xf32> to vector<64xf32>
    %84 = vector.shape_cast %83 : vector<64xf32> to vector<1x64xf32>
    %c21 = arith.constant 21 : index
    %c0_47 = arith.constant 0 : index
    %85 = vector.load %arg15[%c21, %c0_47] : memref<32x64xf32, #tpu.memory_space<vmem>>, vector<1x64xf32>
    tpu.vector_store %arg15[%c21, %c0_47], %84 {strides = array<i32>} : memref<32x64xf32, #tpu.memory_space<vmem>>, vector<1x64xf32>,
    %86 = vector.extract_strided_slice %11 {offsets = [140, 0], sizes = [8, 64], strides = [1, 1]} : vector<167x64xf32> to vector<8x64xf32>
    %cst_48 = arith.constant dense<0xFF800000> : vector<64xf32>
    %87 = vector.multi_reduction <maximumf>, %86, %cst_48 [0] : vector<8x64xf32> to vector<64xf32>
    %88 = vector.shape_cast %87 : vector<64xf32> to vector<1x64xf32>
    %c22 = arith.constant 22 : index
    %c0_49 = arith.constant 0 : index
    %89 = vector.load %arg15[%c22, %c0_49] : memref<32x64xf32, #tpu.memory_space<vmem>>, vector<1x64xf32>
    tpu.vector_store %arg15[%c22, %c0_49], %88 {strides = array<i32>} : memref<32x64xf32, #tpu.memory_space<vmem>>, vector<1x64xf32>,
    %90 = vector.extract_strided_slice %11 {offsets = [148, 0], sizes = [8, 64], strides = [1, 1]} : vector<167x64xf32> to vector<8x64xf32>
    %cst_50 = arith.constant dense<0xFF800000> : vector<64xf32>
    %91 = vector.multi_reduction <maximumf>, %90, %cst_50 [0] : vector<8x64xf32> to vector<64xf32>
    %92 = vector.shape_cast %91 : vector<64xf32> to vector<1x64xf32>
    %c23 = arith.constant 23 : index
    %c0_51 = arith.constant 0 : index
    %93 = vector.load %arg15[%c23, %c0_51] : memref<32x64xf32, #tpu.memory_space<vmem>>, vector<1x64xf32>
    tpu.vector_store %arg15[%c23, %c0_51], %92 {strides = array<i32>} : memref<32x64xf32, #tpu.memory_space<vmem>>, vector<1x64xf32>,
    %94 = vector.extract_strided_slice %11 {offsets = [156, 0], sizes = [8, 64], strides = [1, 1]} : vector<167x64xf32> to vector<8x64xf32>
    %cst_52 = arith.constant dense<0xFF800000> : vector<64xf32>
    %95 = vector.multi_reduction <maximumf>, %94, %cst_52 [0] : vector<8x64xf32> to vector<64xf32>
    %96 = vector.shape_cast %95 : vector<64xf32> to vector<1x64xf32>
    %c24 = arith.constant 24 : index
    %c0_53 = arith.constant 0 : index
    %97 = vector.load %arg15[%c24, %c0_53] : memref<32x64xf32, #tpu.memory_space<vmem>>, vector<1x64xf32>
    tpu.vector_store %arg15[%c24, %c0_53], %96 {strides = array<i32>} : memref<32x64xf32, #tpu.memory_space<vmem>>, vector<1x64xf32>,
    %c0_54 = arith.constant 0 : index
    %c0_55 = arith.constant 0 : index
    %98 = vector.load %arg15[%c0_54, %c0_55] : memref<32x64xf32, #tpu.memory_space<vmem>>, vector<21x64xf32>
    %99 = arith.truncf %98 : vector<21x64xf32> to vector<21x64xbf16>
    %c0_56 = arith.constant 0 : index
    %c0_57 = arith.constant 0 : index
    %c0_58 = arith.constant 0 : index
    %100 = vector.load %arg5[%c0_56, %c0_57, %c0_58] : memref<9x64x128xbf16, #tpu.memory_space<vmem>>, vector<1x64x128xbf16>
    %101 = vector.shape_cast %100 : vector<1x64x128xbf16> to vector<64x128xbf16>
    %cst_59 = arith.constant dense<0.000000e+00> : vector<21x128xf32>
    %102 = tpu.matmul %99, %101, %cst_59 {dimension_numbers = #tpu.dot_dimension_numbers<[1], [0], [0], [1], [0, 0, 1, 1], [], []>} : vector<21x64xbf16>, vector<64x128xbf16>, vector<21x128xf32> -> vector<21x128xf32>
    %c1 = arith.constant 1 : index
    %c0_60 = arith.constant 0 : index
    %103 = vector.load %arg15[%c1, %c0_60] : memref<32x64xf32, #tpu.memory_space<vmem>>, vector<21x64xf32>
    %104 = arith.truncf %103 : vector<21x64xf32> to vector<21x64xbf16>
    %c1_61 = arith.constant 1 : index
    %c0_62 = arith.constant 0 : index
    %c0_63 = arith.constant 0 : index
    %105 = vector.load %arg5[%c1_61, %c0_62, %c0_63] : memref<9x64x128xbf16, #tpu.memory_space<vmem>>, vector<1x64x128xbf16>
    %106 = vector.shape_cast %105 : vector<1x64x128xbf16> to vector<64x128xbf16>
    %cst_64 = arith.constant dense<0.000000e+00> : vector<21x128xf32>
    %107 = tpu.matmul %104, %106, %cst_64 {dimension_numbers = #tpu.dot_dimension_numbers<[1], [0], [0], [1], [0, 0, 1, 1], [], []>} : vector<21x64xbf16>, vector<64x128xbf16>, vector<21x128xf32> -> vector<21x128xf32>
    %108 = arith.addf %102, %107 : vector<21x128xf32>
    %c2 = arith.constant 2 : index
    %c0_65 = arith.constant 0 : index
    %109 = vector.load %arg15[%c2, %c0_65] : memref<32x64xf32, #tpu.memory_space<vmem>>, vector<21x64xf32>
    %110 = arith.truncf %109 : vector<21x64xf32> to vector<21x64xbf16>
    %c2_66 = arith.constant 2 : index
    %c0_67 = arith.constant 0 : index
    %c0_68 = arith.constant 0 : index
    %111 = vector.load %arg5[%c2_66, %c0_67, %c0_68] : memref<9x64x128xbf16, #tpu.memory_space<vmem>>, vector<1x64x128xbf16>
    %112 = vector.shape_cast %111 : vector<1x64x128xbf16> to vector<64x128xbf16>
    %cst_69 = arith.constant dense<0.000000e+00> : vector<21x128xf32>
    %113 = tpu.matmul %110, %112, %cst_69 {dimension_numbers = #tpu.dot_dimension_numbers<[1], [0], [0], [1], [0, 0, 1, 1], [], []>} : vector<21x64xbf16>, vector<64x128xbf16>, vector<21x128xf32> -> vector<21x128xf32>
    %114 = arith.addf %108, %113 : vector<21x128xf32>
    %c3 = arith.constant 3 : index
    %c0_70 = arith.constant 0 : index
    %115 = vector.load %arg15[%c3, %c0_70] : memref<32x64xf32, #tpu.memory_space<vmem>>, vector<21x64xf32>
    %116 = arith.truncf %115 : vector<21x64xf32> to vector<21x64xbf16>
    %c3_71 = arith.constant 3 : index
    %c0_72 = arith.constant 0 : index
    %c0_73 = arith.constant 0 : index
    %117 = vector.load %arg5[%c3_71, %c0_72, %c0_73] : memref<9x64x128xbf16, #tpu.memory_space<vmem>>, vector<1x64x128xbf16>
    %118 = vector.shape_cast %117 : vector<1x64x128xbf16> to vector<64x128xbf16>
    %cst_74 = arith.constant dense<0.000000e+00> : vector<21x128xf32>
    %119 = tpu.matmul %116, %118, %cst_74 {dimension_numbers = #tpu.dot_dimension_numbers<[1], [0], [0], [1], [0, 0, 1, 1], [], []>} : vector<21x64xbf16>, vector<64x128xbf16>, vector<21x128xf32> -> vector<21x128xf32>
    %120 = arith.addf %114, %119 : vector<21x128xf32>
    %c4_75 = arith.constant 4 : index
    %c0_76 = arith.constant 0 : index
    %121 = vector.load %arg15[%c4_75, %c0_76] : memref<32x64xf32, #tpu.memory_space<vmem>>, vector<21x64xf32>
    %122 = arith.truncf %121 : vector<21x64xf32> to vector<21x64xbf16>
    %c4_77 = arith.constant 4 : index
    %c0_78 = arith.constant 0 : index
    %c0_79 = arith.constant 0 : index
    %123 = vector.load %arg5[%c4_77, %c0_78, %c0_79] : memref<9x64x128xbf16, #tpu.memory_space<vmem>>, vector<1x64x128xbf16>
    %124 = vector.shape_cast %123 : vector<1x64x128xbf16> to vector<64x128xbf16>
    %cst_80 = arith.constant dense<0.000000e+00> : vector<21x128xf32>
    %125 = tpu.matmul %122, %124, %cst_80 {dimension_numbers = #tpu.dot_dimension_numbers<[1], [0], [0], [1], [0, 0, 1, 1], [], []>} : vector<21x64xbf16>, vector<64x128xbf16>, vector<21x128xf32> -> vector<21x128xf32>
    %126 = arith.addf %120, %125 : vector<21x128xf32>
    %c5_81 = arith.constant 5 : index
    %c0_82 = arith.constant 0 : index
    %127 = vector.load %arg15[%c5_81, %c0_82] : memref<32x64xf32, #tpu.memory_space<vmem>>, vector<21x64xf32>
    %128 = arith.truncf %127 : vector<21x64xf32> to vector<21x64xbf16>
    %c5_83 = arith.constant 5 : index
    %c0_84 = arith.constant 0 : index
    %c0_85 = arith.constant 0 : index
    %129 = vector.load %arg5[%c5_83, %c0_84, %c0_85] : memref<9x64x128xbf16, #tpu.memory_space<vmem>>, vector<1x64x128xbf16>
    %130 = vector.shape_cast %129 : vector<1x64x128xbf16> to vector<64x128xbf16>
    %cst_86 = arith.constant dense<0.000000e+00> : vector<21x128xf32>
    %131 = tpu.matmul %128, %130, %cst_86 {dimension_numbers = #tpu.dot_dimension_numbers<[1], [0], [0], [1], [0, 0, 1, 1], [], []>} : vector<21x64xbf16>, vector<64x128xbf16>, vector<21x128xf32> -> vector<21x128xf32>
    %132 = arith.addf %126, %131 : vector<21x128xf32>
    %c6_87 = arith.constant 6 : index
    %c0_88 = arith.constant 0 : index
    %133 = vector.load %arg15[%c6_87, %c0_88] : memref<32x64xf32, #tpu.memory_space<vmem>>, vector<21x64xf32>
    %134 = arith.truncf %133 : vector<21x64xf32> to vector<21x64xbf16>
    %c6_89 = arith.constant 6 : index
    %c0_90 = arith.constant 0 : index
    %c0_91 = arith.constant 0 : index
    %135 = vector.load %arg5[%c6_89, %c0_90, %c0_91] : memref<9x64x128xbf16, #tpu.memory_space<vmem>>, vector<1x64x128xbf16>
    %136 = vector.shape_cast %135 : vector<1x64x128xbf16> to vector<64x128xbf16>
    %cst_92 = arith.constant dense<0.000000e+00> : vector<21x128xf32>
    %137 = tpu.matmul %134, %136, %cst_92 {dimension_numbers = #tpu.dot_dimension_numbers<[1], [0], [0], [1], [0, 0, 1, 1], [], []>} : vector<21x64xbf16>, vector<64x128xbf16>, vector<21x128xf32> -> vector<21x128xf32>
    %138 = arith.addf %132, %137 : vector<21x128xf32>
    %c7_93 = arith.constant 7 : index
    %c0_94 = arith.constant 0 : index
    %139 = vector.load %arg15[%c7_93, %c0_94] : memref<32x64xf32, #tpu.memory_space<vmem>>, vector<21x64xf32>
    %140 = arith.truncf %139 : vector<21x64xf32> to vector<21x64xbf16>
    %c7_95 = arith.constant 7 : index
    %c0_96 = arith.constant 0 : index
    %c0_97 = arith.constant 0 : index
    %141 = vector.load %arg5[%c7_95, %c0_96, %c0_97] : memref<9x64x128xbf16, #tpu.memory_space<vmem>>, vector<1x64x128xbf16>
    %142 = vector.shape_cast %141 : vector<1x64x128xbf16> to vector<64x128xbf16>
    %cst_98 = arith.constant dense<0.000000e+00> : vector<21x128xf32>
    %143 = tpu.matmul %140, %142, %cst_98 {dimension_numbers = #tpu.dot_dimension_numbers<[1], [0], [0], [1], [0, 0, 1, 1], [], []>} : vector<21x64xbf16>, vector<64x128xbf16>, vector<21x128xf32> -> vector<21x128xf32>
    %144 = arith.addf %138, %143 : vector<21x128xf32>
    %c8_99 = arith.constant 8 : index
    %c0_100 = arith.constant 0 : index
    %145 = vector.load %arg15[%c8_99, %c0_100] : memref<32x64xf32, #tpu.memory_space<vmem>>, vector<21x64xf32>
    %146 = arith.truncf %145 : vector<21x64xf32> to vector<21x64xbf16>
    %c8_101 = arith.constant 8 : index
    %c0_102 = arith.constant 0 : index
    %c0_103 = arith.constant 0 : index
    %147 = vector.load %arg5[%c8_101, %c0_102, %c0_103] : memref<9x64x128xbf16, #tpu.memory_space<vmem>>, vector<1x64x128xbf16>
    %148 = vector.shape_cast %147 : vector<1x64x128xbf16> to vector<64x128xbf16>
    %cst_104 = arith.constant dense<0.000000e+00> : vector<21x128xf32>
    %149 = tpu.matmul %146, %148, %cst_104 {dimension_numbers = #tpu.dot_dimension_numbers<[1], [0], [0], [1], [0, 0, 1, 1], [], []>} : vector<21x64xbf16>, vector<64x128xbf16>, vector<21x128xf32> -> vector<21x128xf32>
    %150 = arith.addf %144, %149 : vector<21x128xf32>
    %c0_105 = arith.constant 0 : index
    %c0_106 = arith.constant 0 : index
    %151 = vector.load %arg6[%c0_105, %c0_106] : memref<1x128xf32, #tpu.memory_space<vmem>>, vector<1x128xf32>
    %152 = vector.broadcast %151 : vector<1x128xf32> to vector<21x128xf32>
    %153 = arith.mulf %150, %152 : vector<21x128xf32>
    %c0_107 = arith.constant 0 : index
    %c0_108 = arith.constant 0 : index
    %154 = vector.load %arg7[%c0_107, %c0_108] : memref<1x128xf32, #tpu.memory_space<vmem>>, vector<1x128xf32>
    %155 = vector.broadcast %154 : vector<1x128xf32> to vector<21x128xf32>
    %156 = arith.addf %153, %155 : vector<21x128xf32>
    %cst_109 = arith.constant 0.000000e+00 : f32
    %157 = vector.broadcast %cst_109 : f32 to vector<21x128xf32>
    %158 = arith.maximumf %156, %157 : vector<21x128xf32>
    %cst_110 = arith.constant 0.000000e+00 : f32
    %159 = vector.broadcast %cst_110 : f32 to vector<32x128xf32>
    %c0_111 = arith.constant 0 : index
    %c0_112 = arith.constant 0 : index
    %160 = vector.load %arg16[%c0_111, %c0_112] : memref<32x128xf32, #tpu.memory_space<vmem>>, vector<32x128xf32>
    tpu.vector_store %arg16[%c0_111, %c0_112], %159 {strides = array<i32>} : memref<32x128xf32, #tpu.memory_space<vmem>>, vector<32x128xf32>,
    %c4_113 = arith.constant 4 : index
    %c0_114 = arith.constant 0 : index
    %161 = vector.load %arg16[%c4_113, %c0_114] : memref<32x128xf32, #tpu.memory_space<vmem>>, vector<21x128xf32>
    tpu.vector_store %arg16[%c4_113, %c0_114], %158 {strides = array<i32>} : memref<32x128xf32, #tpu.memory_space<vmem>>, vector<21x128xf32>,
    %c0_115 = arith.constant 0 : index
    %c0_116 = arith.constant 0 : index
    %162 = vector.load %arg16[%c0_115, %c0_116] : memref<32x128xf32, #tpu.memory_space<vmem>>, vector<21x128xf32>
    %163 = arith.truncf %162 : vector<21x128xf32> to vector<21x128xbf16>
    %c0_117 = arith.constant 0 : index
    %c0_118 = arith.constant 0 : index
    %c0_119 = arith.constant 0 : index
    %164 = vector.load %arg8[%c0_117, %c0_118, %c0_119] : memref<9x128x128xbf16, #tpu.memory_space<vmem>>, vector<1x128x128xbf16>
    %165 = vector.shape_cast %164 : vector<1x128x128xbf16> to vector<128x128xbf16>
    %cst_120 = arith.constant dense<0.000000e+00> : vector<21x128xf32>
    %166 = tpu.matmul %163, %165, %cst_120 {dimension_numbers = #tpu.dot_dimension_numbers<[1], [0], [0], [1], [0, 0, 1, 1], [], []>} : vector<21x128xbf16>, vector<128x128xbf16>, vector<21x128xf32> -> vector<21x128xf32>
    %c1_121 = arith.constant 1 : index
    %c0_122 = arith.constant 0 : index
    %167 = vector.load %arg16[%c1_121, %c0_122] : memref<32x128xf32, #tpu.memory_space<vmem>>, vector<21x128xf32>
    %168 = arith.truncf %167 : vector<21x128xf32> to vector<21x128xbf16>
    %c1_123 = arith.constant 1 : index
    %c0_124 = arith.constant 0 : index
    %c0_125 = arith.constant 0 : index
    %169 = vector.load %arg8[%c1_123, %c0_124, %c0_125] : memref<9x128x128xbf16, #tpu.memory_space<vmem>>, vector<1x128x128xbf16>
    %170 = vector.shape_cast %169 : vector<1x128x128xbf16> to vector<128x128xbf16>
    %cst_126 = arith.constant dense<0.000000e+00> : vector<21x128xf32>
    %171 = tpu.matmul %168, %170, %cst_126 {dimension_numbers = #tpu.dot_dimension_numbers<[1], [0], [0], [1], [0, 0, 1, 1], [], []>} : vector<21x128xbf16>, vector<128x128xbf16>, vector<21x128xf32> -> vector<21x128xf32>
    %172 = arith.addf %166, %171 : vector<21x128xf32>
    %c2_127 = arith.constant 2 : index
    %c0_128 = arith.constant 0 : index
    %173 = vector.load %arg16[%c2_127, %c0_128] : memref<32x128xf32, #tpu.memory_space<vmem>>, vector<21x128xf32>
    %174 = arith.truncf %173 : vector<21x128xf32> to vector<21x128xbf16>
    %c2_129 = arith.constant 2 : index
    %c0_130 = arith.constant 0 : index
    %c0_131 = arith.constant 0 : index
    %175 = vector.load %arg8[%c2_129, %c0_130, %c0_131] : memref<9x128x128xbf16, #tpu.memory_space<vmem>>, vector<1x128x128xbf16>
    %176 = vector.shape_cast %175 : vector<1x128x128xbf16> to vector<128x128xbf16>
    %cst_132 = arith.constant dense<0.000000e+00> : vector<21x128xf32>
    %177 = tpu.matmul %174, %176, %cst_132 {dimension_numbers = #tpu.dot_dimension_numbers<[1], [0], [0], [1], [0, 0, 1, 1], [], []>} : vector<21x128xbf16>, vector<128x128xbf16>, vector<21x128xf32> -> vector<21x128xf32>
    %178 = arith.addf %172, %177 : vector<21x128xf32>
    %c3_133 = arith.constant 3 : index
    %c0_134 = arith.constant 0 : index
    %179 = vector.load %arg16[%c3_133, %c0_134] : memref<32x128xf32, #tpu.memory_space<vmem>>, vector<21x128xf32>
    %180 = arith.truncf %179 : vector<21x128xf32> to vector<21x128xbf16>
    %c3_135 = arith.constant 3 : index
    %c0_136 = arith.constant 0 : index
    %c0_137 = arith.constant 0 : index
    %181 = vector.load %arg8[%c3_135, %c0_136, %c0_137] : memref<9x128x128xbf16, #tpu.memory_space<vmem>>, vector<1x128x128xbf16>
    %182 = vector.shape_cast %181 : vector<1x128x128xbf16> to vector<128x128xbf16>
    %cst_138 = arith.constant dense<0.000000e+00> : vector<21x128xf32>
    %183 = tpu.matmul %180, %182, %cst_138 {dimension_numbers = #tpu.dot_dimension_numbers<[1], [0], [0], [1], [0, 0, 1, 1], [], []>} : vector<21x128xbf16>, vector<128x128xbf16>, vector<21x128xf32> -> vector<21x128xf32>
    %184 = arith.addf %178, %183 : vector<21x128xf32>
    %c4_139 = arith.constant 4 : index
    %c0_140 = arith.constant 0 : index
    %185 = vector.load %arg16[%c4_139, %c0_140] : memref<32x128xf32, #tpu.memory_space<vmem>>, vector<21x128xf32>
    %186 = arith.truncf %185 : vector<21x128xf32> to vector<21x128xbf16>
    %c4_141 = arith.constant 4 : index
    %c0_142 = arith.constant 0 : index
    %c0_143 = arith.constant 0 : index
    %187 = vector.load %arg8[%c4_141, %c0_142, %c0_143] : memref<9x128x128xbf16, #tpu.memory_space<vmem>>, vector<1x128x128xbf16>
    %188 = vector.shape_cast %187 : vector<1x128x128xbf16> to vector<128x128xbf16>
    %cst_144 = arith.constant dense<0.000000e+00> : vector<21x128xf32>
    %189 = tpu.matmul %186, %188, %cst_144 {dimension_numbers = #tpu.dot_dimension_numbers<[1], [0], [0], [1], [0, 0, 1, 1], [], []>} : vector<21x128xbf16>, vector<128x128xbf16>, vector<21x128xf32> -> vector<21x128xf32>
    %190 = arith.addf %184, %189 : vector<21x128xf32>
    %c5_145 = arith.constant 5 : index
    %c0_146 = arith.constant 0 : index
    %191 = vector.load %arg16[%c5_145, %c0_146] : memref<32x128xf32, #tpu.memory_space<vmem>>, vector<21x128xf32>
    %192 = arith.truncf %191 : vector<21x128xf32> to vector<21x128xbf16>
    %c5_147 = arith.constant 5 : index
    %c0_148 = arith.constant 0 : index
    %c0_149 = arith.constant 0 : index
    %193 = vector.load %arg8[%c5_147, %c0_148, %c0_149] : memref<9x128x128xbf16, #tpu.memory_space<vmem>>, vector<1x128x128xbf16>
    %194 = vector.shape_cast %193 : vector<1x128x128xbf16> to vector<128x128xbf16>
    %cst_150 = arith.constant dense<0.000000e+00> : vector<21x128xf32>
    %195 = tpu.matmul %192, %194, %cst_150 {dimension_numbers = #tpu.dot_dimension_numbers<[1], [0], [0], [1], [0, 0, 1, 1], [], []>} : vector<21x128xbf16>, vector<128x128xbf16>, vector<21x128xf32> -> vector<21x128xf32>
    %196 = arith.addf %190, %195 : vector<21x128xf32>
    %c6_151 = arith.constant 6 : index
    %c0_152 = arith.constant 0 : index
    %197 = vector.load %arg16[%c6_151, %c0_152] : memref<32x128xf32, #tpu.memory_space<vmem>>, vector<21x128xf32>
    %198 = arith.truncf %197 : vector<21x128xf32> to vector<21x128xbf16>
    %c6_153 = arith.constant 6 : index
    %c0_154 = arith.constant 0 : index
    %c0_155 = arith.constant 0 : index
    %199 = vector.load %arg8[%c6_153, %c0_154, %c0_155] : memref<9x128x128xbf16, #tpu.memory_space<vmem>>, vector<1x128x128xbf16>
    %200 = vector.shape_cast %199 : vector<1x128x128xbf16> to vector<128x128xbf16>
    %cst_156 = arith.constant dense<0.000000e+00> : vector<21x128xf32>
    %201 = tpu.matmul %198, %200, %cst_156 {dimension_numbers = #tpu.dot_dimension_numbers<[1], [0], [0], [1], [0, 0, 1, 1], [], []>} : vector<21x128xbf16>, vector<128x128xbf16>, vector<21x128xf32> -> vector<21x128xf32>
    %202 = arith.addf %196, %201 : vector<21x128xf32>
    %c7_157 = arith.constant 7 : index
    %c0_158 = arith.constant 0 : index
    %203 = vector.load %arg16[%c7_157, %c0_158] : memref<32x128xf32, #tpu.memory_space<vmem>>, vector<21x128xf32>
    %204 = arith.truncf %203 : vector<21x128xf32> to vector<21x128xbf16>
    %c7_159 = arith.constant 7 : index
    %c0_160 = arith.constant 0 : index
    %c0_161 = arith.constant 0 : index
    %205 = vector.load %arg8[%c7_159, %c0_160, %c0_161] : memref<9x128x128xbf16, #tpu.memory_space<vmem>>, vector<1x128x128xbf16>
    %206 = vector.shape_cast %205 : vector<1x128x128xbf16> to vector<128x128xbf16>
    %cst_162 = arith.constant dense<0.000000e+00> : vector<21x128xf32>
    %207 = tpu.matmul %204, %206, %cst_162 {dimension_numbers = #tpu.dot_dimension_numbers<[1], [0], [0], [1], [0, 0, 1, 1], [], []>} : vector<21x128xbf16>, vector<128x128xbf16>, vector<21x128xf32> -> vector<21x128xf32>
    %208 = arith.addf %202, %207 : vector<21x128xf32>
    %c8_163 = arith.constant 8 : index
    %c0_164 = arith.constant 0 : index
    %209 = vector.load %arg16[%c8_163, %c0_164] : memref<32x128xf32, #tpu.memory_space<vmem>>, vector<21x128xf32>
    %210 = arith.truncf %209 : vector<21x128xf32> to vector<21x128xbf16>
    %c8_165 = arith.constant 8 : index
    %c0_166 = arith.constant 0 : index
    %c0_167 = arith.constant 0 : index
    %211 = vector.load %arg8[%c8_165, %c0_166, %c0_167] : memref<9x128x128xbf16, #tpu.memory_space<vmem>>, vector<1x128x128xbf16>
    %212 = vector.shape_cast %211 : vector<1x128x128xbf16> to vector<128x128xbf16>
    %cst_168 = arith.constant dense<0.000000e+00> : vector<21x128xf32>
    %213 = tpu.matmul %210, %212, %cst_168 {dimension_numbers = #tpu.dot_dimension_numbers<[1], [0], [0], [1], [0, 0, 1, 1], [], []>} : vector<21x128xbf16>, vector<128x128xbf16>, vector<21x128xf32> -> vector<21x128xf32>
    %214 = arith.addf %208, %213 : vector<21x128xf32>
    %c0_169 = arith.constant 0 : index
    %c0_170 = arith.constant 0 : index
    %215 = vector.load %arg9[%c0_169, %c0_170] : memref<1x128xf32, #tpu.memory_space<vmem>>, vector<1x128xf32>
    %216 = vector.broadcast %215 : vector<1x128xf32> to vector<21x128xf32>
    %217 = arith.mulf %214, %216 : vector<21x128xf32>
    %c0_171 = arith.constant 0 : index
    %c0_172 = arith.constant 0 : index
    %218 = vector.load %arg10[%c0_171, %c0_172] : memref<1x128xf32, #tpu.memory_space<vmem>>, vector<1x128xf32>
    %219 = vector.broadcast %218 : vector<1x128xf32> to vector<21x128xf32>
    %220 = arith.addf %217, %219 : vector<21x128xf32>
    %cst_173 = arith.constant 0.000000e+00 : f32
    %221 = vector.broadcast %cst_173 : f32 to vector<21x128xf32>
    %222 = arith.maximumf %220, %221 : vector<21x128xf32>
    %cst_174 = arith.constant 0.000000e+00 : f32
    %223 = vector.broadcast %cst_174 : f32 to vector<32x128xf32>
    %c0_175 = arith.constant 0 : index
    %c0_176 = arith.constant 0 : index
    %224 = vector.load %arg17[%c0_175, %c0_176] : memref<32x128xf32, #tpu.memory_space<vmem>>, vector<32x128xf32>
    tpu.vector_store %arg17[%c0_175, %c0_176], %223 {strides = array<i32>} : memref<32x128xf32, #tpu.memory_space<vmem>>, vector<32x128xf32>,
    %c4_177 = arith.constant 4 : index
    %c0_178 = arith.constant 0 : index
    %225 = vector.load %arg17[%c4_177, %c0_178] : memref<32x128xf32, #tpu.memory_space<vmem>>, vector<21x128xf32>
    tpu.vector_store %arg17[%c4_177, %c0_178], %222 {strides = array<i32>} : memref<32x128xf32, #tpu.memory_space<vmem>>, vector<21x128xf32>,
    %c0_179 = arith.constant 0 : index
    %c0_180 = arith.constant 0 : index
    %226 = vector.load %arg17[%c0_179, %c0_180] : memref<32x128xf32, #tpu.memory_space<vmem>>, vector<21x128xf32>
    %227 = arith.truncf %226 : vector<21x128xf32> to vector<21x128xbf16>
    %c0_181 = arith.constant 0 : index
    %c0_182 = arith.constant 0 : index
    %c0_183 = arith.constant 0 : index
    %228 = vector.load %arg11[%c0_181, %c0_182, %c0_183] : memref<9x128x256xbf16, #tpu.memory_space<vmem>>, vector<1x128x256xbf16>
    %229 = vector.shape_cast %228 : vector<1x128x256xbf16> to vector<128x256xbf16>
    %cst_184 = arith.constant dense<0.000000e+00> : vector<21x256xf32>
    %230 = tpu.matmul %227, %229, %cst_184 {dimension_numbers = #tpu.dot_dimension_numbers<[1], [0], [0], [1], [0, 0, 1, 1], [], []>} : vector<21x128xbf16>, vector<128x256xbf16>, vector<21x256xf32> -> vector<21x256xf32>
    %c1_185 = arith.constant 1 : index
    %c0_186 = arith.constant 0 : index
    %231 = vector.load %arg17[%c1_185, %c0_186] : memref<32x128xf32, #tpu.memory_space<vmem>>, vector<21x128xf32>
    %232 = arith.truncf %231 : vector<21x128xf32> to vector<21x128xbf16>
    %c1_187 = arith.constant 1 : index
    %c0_188 = arith.constant 0 : index
    %c0_189 = arith.constant 0 : index
    %233 = vector.load %arg11[%c1_187, %c0_188, %c0_189] : memref<9x128x256xbf16, #tpu.memory_space<vmem>>, vector<1x128x256xbf16>
    %234 = vector.shape_cast %233 : vector<1x128x256xbf16> to vector<128x256xbf16>
    %cst_190 = arith.constant dense<0.000000e+00> : vector<21x256xf32>
    %235 = tpu.matmul %232, %234, %cst_190 {dimension_numbers = #tpu.dot_dimension_numbers<[1], [0], [0], [1], [0, 0, 1, 1], [], []>} : vector<21x128xbf16>, vector<128x256xbf16>, vector<21x256xf32> -> vector<21x256xf32>
    %236 = arith.addf %230, %235 : vector<21x256xf32>
    %c2_191 = arith.constant 2 : index
    %c0_192 = arith.constant 0 : index
    %237 = vector.load %arg17[%c2_191, %c0_192] : memref<32x128xf32, #tpu.memory_space<vmem>>, vector<21x128xf32>
    %238 = arith.truncf %237 : vector<21x128xf32> to vector<21x128xbf16>
    %c2_193 = arith.constant 2 : index
    %c0_194 = arith.constant 0 : index
    %c0_195 = arith.constant 0 : index
    %239 = vector.load %arg11[%c2_193, %c0_194, %c0_195] : memref<9x128x256xbf16, #tpu.memory_space<vmem>>, vector<1x128x256xbf16>
    %240 = vector.shape_cast %239 : vector<1x128x256xbf16> to vector<128x256xbf16>
    %cst_196 = arith.constant dense<0.000000e+00> : vector<21x256xf32>
    %241 = tpu.matmul %238, %240, %cst_196 {dimension_numbers = #tpu.dot_dimension_numbers<[1], [0], [0], [1], [0, 0, 1, 1], [], []>} : vector<21x128xbf16>, vector<128x256xbf16>, vector<21x256xf32> -> vector<21x256xf32>
    %242 = arith.addf %236, %241 : vector<21x256xf32>
    %c3_197 = arith.constant 3 : index
    %c0_198 = arith.constant 0 : index
    %243 = vector.load %arg17[%c3_197, %c0_198] : memref<32x128xf32, #tpu.memory_space<vmem>>, vector<21x128xf32>
    %244 = arith.truncf %243 : vector<21x128xf32> to vector<21x128xbf16>
    %c3_199 = arith.constant 3 : index
    %c0_200 = arith.constant 0 : index
    %c0_201 = arith.constant 0 : index
    %245 = vector.load %arg11[%c3_199, %c0_200, %c0_201] : memref<9x128x256xbf16, #tpu.memory_space<vmem>>, vector<1x128x256xbf16>
    %246 = vector.shape_cast %245 : vector<1x128x256xbf16> to vector<128x256xbf16>
    %cst_202 = arith.constant dense<0.000000e+00> : vector<21x256xf32>
    %247 = tpu.matmul %244, %246, %cst_202 {dimension_numbers = #tpu.dot_dimension_numbers<[1], [0], [0], [1], [0, 0, 1, 1], [], []>} : vector<21x128xbf16>, vector<128x256xbf16>, vector<21x256xf32> -> vector<21x256xf32>
    %248 = arith.addf %242, %247 : vector<21x256xf32>
    %c4_203 = arith.constant 4 : index
    %c0_204 = arith.constant 0 : index
    %249 = vector.load %arg17[%c4_203, %c0_204] : memref<32x128xf32, #tpu.memory_space<vmem>>, vector<21x128xf32>
    %250 = arith.truncf %249 : vector<21x128xf32> to vector<21x128xbf16>
    %c4_205 = arith.constant 4 : index
    %c0_206 = arith.constant 0 : index
    %c0_207 = arith.constant 0 : index
    %251 = vector.load %arg11[%c4_205, %c0_206, %c0_207] : memref<9x128x256xbf16, #tpu.memory_space<vmem>>, vector<1x128x256xbf16>
    %252 = vector.shape_cast %251 : vector<1x128x256xbf16> to vector<128x256xbf16>
    %cst_208 = arith.constant dense<0.000000e+00> : vector<21x256xf32>
    %253 = tpu.matmul %250, %252, %cst_208 {dimension_numbers = #tpu.dot_dimension_numbers<[1], [0], [0], [1], [0, 0, 1, 1], [], []>} : vector<21x128xbf16>, vector<128x256xbf16>, vector<21x256xf32> -> vector<21x256xf32>
    %254 = arith.addf %248, %253 : vector<21x256xf32>
    %c5_209 = arith.constant 5 : index
    %c0_210 = arith.constant 0 : index
    %255 = vector.load %arg17[%c5_209, %c0_210] : memref<32x128xf32, #tpu.memory_space<vmem>>, vector<21x128xf32>
    %256 = arith.truncf %255 : vector<21x128xf32> to vector<21x128xbf16>
    %c5_211 = arith.constant 5 : index
    %c0_212 = arith.constant 0 : index
    %c0_213 = arith.constant 0 : index
    %257 = vector.load %arg11[%c5_211, %c0_212, %c0_213] : memref<9x128x256xbf16, #tpu.memory_space<vmem>>, vector<1x128x256xbf16>
    %258 = vector.shape_cast %257 : vector<1x128x256xbf16> to vector<128x256xbf16>
    %cst_214 = arith.constant dense<0.000000e+00> : vector<21x256xf32>
    %259 = tpu.matmul %256, %258, %cst_214 {dimension_numbers = #tpu.dot_dimension_numbers<[1], [0], [0], [1], [0, 0, 1, 1], [], []>} : vector<21x128xbf16>, vector<128x256xbf16>, vector<21x256xf32> -> vector<21x256xf32>
    %260 = arith.addf %254, %259 : vector<21x256xf32>
    %c6_215 = arith.constant 6 : index
    %c0_216 = arith.constant 0 : index
    %261 = vector.load %arg17[%c6_215, %c0_216] : memref<32x128xf32, #tpu.memory_space<vmem>>, vector<21x128xf32>
    %262 = arith.truncf %261 : vector<21x128xf32> to vector<21x128xbf16>
    %c6_217 = arith.constant 6 : index
    %c0_218 = arith.constant 0 : index
    %c0_219 = arith.constant 0 : index
    %263 = vector.load %arg11[%c6_217, %c0_218, %c0_219] : memref<9x128x256xbf16, #tpu.memory_space<vmem>>, vector<1x128x256xbf16>
    %264 = vector.shape_cast %263 : vector<1x128x256xbf16> to vector<128x256xbf16>
    %cst_220 = arith.constant dense<0.000000e+00> : vector<21x256xf32>
    %265 = tpu.matmul %262, %264, %cst_220 {dimension_numbers = #tpu.dot_dimension_numbers<[1], [0], [0], [1], [0, 0, 1, 1], [], []>} : vector<21x128xbf16>, vector<128x256xbf16>, vector<21x256xf32> -> vector<21x256xf32>
    %266 = arith.addf %260, %265 : vector<21x256xf32>
    %c7_221 = arith.constant 7 : index
    %c0_222 = arith.constant 0 : index
    %267 = vector.load %arg17[%c7_221, %c0_222] : memref<32x128xf32, #tpu.memory_space<vmem>>, vector<21x128xf32>
    %268 = arith.truncf %267 : vector<21x128xf32> to vector<21x128xbf16>
    %c7_223 = arith.constant 7 : index
    %c0_224 = arith.constant 0 : index
    %c0_225 = arith.constant 0 : index
    %269 = vector.load %arg11[%c7_223, %c0_224, %c0_225] : memref<9x128x256xbf16, #tpu.memory_space<vmem>>, vector<1x128x256xbf16>
    %270 = vector.shape_cast %269 : vector<1x128x256xbf16> to vector<128x256xbf16>
    %cst_226 = arith.constant dense<0.000000e+00> : vector<21x256xf32>
    %271 = tpu.matmul %268, %270, %cst_226 {dimension_numbers = #tpu.dot_dimension_numbers<[1], [0], [0], [1], [0, 0, 1, 1], [], []>} : vector<21x128xbf16>, vector<128x256xbf16>, vector<21x256xf32> -> vector<21x256xf32>
    %272 = arith.addf %266, %271 : vector<21x256xf32>
    %c8_227 = arith.constant 8 : index
    %c0_228 = arith.constant 0 : index
    %273 = vector.load %arg17[%c8_227, %c0_228] : memref<32x128xf32, #tpu.memory_space<vmem>>, vector<21x128xf32>
    %274 = arith.truncf %273 : vector<21x128xf32> to vector<21x128xbf16>
    %c8_229 = arith.constant 8 : index
    %c0_230 = arith.constant 0 : index
    %c0_231 = arith.constant 0 : index
    %275 = vector.load %arg11[%c8_229, %c0_230, %c0_231] : memref<9x128x256xbf16, #tpu.memory_space<vmem>>, vector<1x128x256xbf16>
    %276 = vector.shape_cast %275 : vector<1x128x256xbf16> to vector<128x256xbf16>
    %cst_232 = arith.constant dense<0.000000e+00> : vector<21x256xf32>
    %277 = tpu.matmul %274, %276, %cst_232 {dimension_numbers = #tpu.dot_dimension_numbers<[1], [0], [0], [1], [0, 0, 1, 1], [], []>} : vector<21x128xbf16>, vector<128x256xbf16>, vector<21x256xf32> -> vector<21x256xf32>
    %278 = arith.addf %272, %277 : vector<21x256xf32>
    %c0_233 = arith.constant 0 : index
    %c0_234 = arith.constant 0 : index
    %279 = vector.load %arg12[%c0_233, %c0_234] : memref<1x256xf32, #tpu.memory_space<vmem>>, vector<1x256xf32>
    %280 = vector.broadcast %279 : vector<1x256xf32> to vector<21x256xf32>
    %281 = arith.mulf %278, %280 : vector<21x256xf32>
    %c0_235 = arith.constant 0 : index
    %c0_236 = arith.constant 0 : index
    %282 = vector.load %arg13[%c0_235, %c0_236] : memref<1x256xf32, #tpu.memory_space<vmem>>, vector<1x256xf32>
    %283 = vector.broadcast %282 : vector<1x256xf32> to vector<21x256xf32>
    %284 = arith.addf %281, %283 : vector<21x256xf32>
    %cst_237 = arith.constant 0.000000e+00 : f32
    %285 = vector.broadcast %cst_237 : f32 to vector<21x256xf32>
    %286 = arith.maximumf %284, %285 : vector<21x256xf32>
    %cst_238 = arith.constant 0.000000e+00 : f32
    %287 = vector.broadcast %cst_238 : f32 to vector<1x256xf32>
    %288 = vector.extract_strided_slice %286 {offsets = [0, 0], sizes = [2, 256], strides = [1, 1]} : vector<21x256xf32> to vector<2x256xf32>
    %cst_239 = arith.constant dense<0xFF800000> : vector<256xf32>
    %289 = vector.multi_reduction <maximumf>, %288, %cst_239 [0] : vector<2x256xf32> to vector<256xf32>
    %290 = vector.shape_cast %289 : vector<256xf32> to vector<1x256xf32>
    %291 = arith.addf %287, %290 : vector<1x256xf32>
    %292 = vector.extract_strided_slice %286 {offsets = [2, 0], sizes = [4, 256], strides = [1, 1]} : vector<21x256xf32> to vector<4x256xf32>
    %cst_240 = arith.constant dense<0xFF800000> : vector<256xf32>
    %293 = vector.multi_reduction <maximumf>, %292, %cst_240 [0] : vector<4x256xf32> to vector<256xf32>
    %294 = vector.shape_cast %293 : vector<256xf32> to vector<1x256xf32>
    %295 = arith.addf %291, %294 : vector<1x256xf32>
    %296 = vector.extract_strided_slice %286 {offsets = [6, 0], sizes = [4, 256], strides = [1, 1]} : vector<21x256xf32> to vector<4x256xf32>
    %cst_241 = arith.constant dense<0xFF800000> : vector<256xf32>
    %297 = vector.multi_reduction <maximumf>, %296, %cst_241 [0] : vector<4x256xf32> to vector<256xf32>
    %298 = vector.shape_cast %297 : vector<256xf32> to vector<1x256xf32>
    %299 = arith.addf %295, %298 : vector<1x256xf32>
    %300 = vector.extract_strided_slice %286 {offsets = [10, 0], sizes = [4, 256], strides = [1, 1]} : vector<21x256xf32> to vector<4x256xf32>
    %cst_242 = arith.constant dense<0xFF800000> : vector<256xf32>
    %301 = vector.multi_reduction <maximumf>, %300, %cst_242 [0] : vector<4x256xf32> to vector<256xf32>
    %302 = vector.shape_cast %301 : vector<256xf32> to vector<1x256xf32>
    %303 = arith.addf %299, %302 : vector<1x256xf32>
    %304 = vector.extract_strided_slice %286 {offsets = [14, 0], sizes = [4, 256], strides = [1, 1]} : vector<21x256xf32> to vector<4x256xf32>
    %cst_243 = arith.constant dense<0xFF800000> : vector<256xf32>
    %305 = vector.multi_reduction <maximumf>, %304, %cst_243 [0] : vector<4x256xf32> to vector<256xf32>
    %306 = vector.shape_cast %305 : vector<256xf32> to vector<1x256xf32>
    %307 = arith.addf %303, %306 : vector<1x256xf32>
    %308 = vector.extract_strided_slice %286 {offsets = [18, 0], sizes = [3, 256], strides = [1, 1]} : vector<21x256xf32> to vector<3x256xf32>
    %cst_244 = arith.constant dense<0xFF800000> : vector<256xf32>
    %309 = vector.multi_reduction <maximumf>, %308, %cst_244 [0] : vector<3x256xf32> to vector<256xf32>
    %310 = vector.shape_cast %309 : vector<256xf32> to vector<1x256xf32>
    %311 = arith.addf %307, %310 : vector<1x256xf32>
    %cst_245 = arith.constant 0.166666672 : f32
    %312 = vector.broadcast %cst_245 : f32 to vector<1x256xf32>
    %313 = arith.mulf %311, %312 : vector<1x256xf32>
    %c0_246 = arith.constant 0 : index
    %c0_247 = arith.constant 0 : index
    %c0_248 = arith.constant 0 : index
    %314 = vector.load %arg14[%c0_246, %c0_247, %c0_248] : memref<1x1x256xf32, #tpu.memory_space<vmem>>, vector<1x1x256xf32>
    %315 = vector.shape_cast %314 : vector<1x1x256xf32> to vector<1x256xf32>
    %316 = vector.shape_cast %313 : vector<1x256xf32> to vector<1x1x256xf32>
    tpu.vector_store %arg14[%c0_246, %c0_247, %c0_248], %316 {strides = array<i32>} : memref<1x1x256xf32, #tpu.memory_space<vmem>>, vector<1x1x256xf32>,
    return
  }
  func.func @transform_0(%arg0: i32) -> (i32, i32, i32) {
    %c0_i32 = arith.constant 0 : i32
    %c0_i32_0 = arith.constant 0 : i32
    %c0_i32_1 = arith.constant 0 : i32
    return %arg0, %c0_i32, %c0_i32_0 : i32, i32, i32
  }
  func.func @transform_1(%arg0: i32) -> (i32, i32) {
    %c0_i32 = arith.constant 0 : i32
    %c0_i32_0 = arith.constant 0 : i32
    %c0_i32_1 = arith.constant 0 : i32
    return %c0_i32, %c0_i32_0 : i32, i32
  }
  func.func @transform_2(%arg0: i32) -> (i32, i32) {
    %c0_i32 = arith.constant 0 : i32
    %c0_i32_0 = arith.constant 0 : i32
    %c0_i32_1 = arith.constant 0 : i32
    return %c0_i32, %c0_i32_0 : i32, i32
  }
  func.func @transform_3(%arg0: i32) -> (i32, i32) {
    %c0_i32 = arith.constant 0 : i32
    %c0_i32_0 = arith.constant 0 : i32
    %c0_i32_1 = arith.constant 0 : i32
    return %c0_i32, %c0_i32_0 : i32, i32
  }
  func.func @transform_4(%arg0: i32) -> (i32, i32, i32) {
    %c0_i32 = arith.constant 0 : i32
    %c0_i32_0 = arith.constant 0 : i32
    %c0_i32_1 = arith.constant 0 : i32
    %c0_i32_2 = arith.constant 0 : i32
    return %c0_i32, %c0_i32_0, %c0_i32_1 : i32, i32, i32
  }
  func.func @transform_5(%arg0: i32) -> (i32, i32) {
    %c0_i32 = arith.constant 0 : i32
    %c0_i32_0 = arith.constant 0 : i32
    %c0_i32_1 = arith.constant 0 : i32
    return %c0_i32, %c0_i32_0 : i32, i32
  }
  func.func @transform_6(%arg0: i32) -> (i32, i32) {
    %c0_i32 = arith.constant 0 : i32
    %c0_i32_0 = arith.constant 0 : i32
    %c0_i32_1 = arith.constant 0 : i32
    return %c0_i32, %c0_i32_0 : i32, i32
  }
  func.func @transform_7(%arg0: i32) -> (i32, i32, i32) {
    %c0_i32 = arith.constant 0 : i32
    %c0_i32_0 = arith.constant 0 : i32
    %c0_i32_1 = arith.constant 0 : i32
    %c0_i32_2 = arith.constant 0 : i32
    return %c0_i32, %c0_i32_0, %c0_i32_1 : i32, i32, i32
  }
  func.func @transform_8(%arg0: i32) -> (i32, i32) {
    %c0_i32 = arith.constant 0 : i32
    %c0_i32_0 = arith.constant 0 : i32
    %c0_i32_1 = arith.constant 0 : i32
    return %c0_i32, %c0_i32_0 : i32, i32
  }
  func.func @transform_9(%arg0: i32) -> (i32, i32) {
    %c0_i32 = arith.constant 0 : i32
    %c0_i32_0 = arith.constant 0 : i32
    %c0_i32_1 = arith.constant 0 : i32
    return %c0_i32, %c0_i32_0 : i32, i32
  }
  func.func @transform_10(%arg0: i32) -> (i32, i32, i32) {
    %c0_i32 = arith.constant 0 : i32
    %c0_i32_0 = arith.constant 0 : i32
    %c0_i32_1 = arith.constant 0 : i32
    %c0_i32_2 = arith.constant 0 : i32
    return %c0_i32, %c0_i32_0, %c0_i32_1 : i32, i32, i32
  }
  func.func @transform_11(%arg0: i32) -> (i32, i32) {
    %c0_i32 = arith.constant 0 : i32
    %c0_i32_0 = arith.constant 0 : i32
    %c0_i32_1 = arith.constant 0 : i32
    return %c0_i32, %c0_i32_0 : i32, i32
  }
  func.func @transform_12(%arg0: i32) -> (i32, i32) {
    %c0_i32 = arith.constant 0 : i32
    %c0_i32_0 = arith.constant 0 : i32
    %c0_i32_1 = arith.constant 0 : i32
    return %c0_i32, %c0_i32_0 : i32, i32
  }
  func.func @transform_13(%arg0: i32) -> (i32, i32, i32) {
    %c0_i32 = arith.constant 0 : i32
    %c0_i32_0 = arith.constant 0 : i32
    %c0_i32_1 = arith.constant 0 : i32
    return %arg0, %c0_i32, %c0_i32_0 : i32, i32, i32
  }
}

</mosaic_0001>

<bundles_post_ra>
// kernel: epoch_encoder_forward.3
= control target key start
LH: loop header
LB: loop body
LE: loop exit
PB: predicated region body
PF: predicated region fallthrough
CT: control target
= control target key end

     0   :  { %s4534_s25 = smov 0   ;;  %s5391_s0 = inlined_call_operand.vmem [shape: bf16[2,13,400], index: 0, kind: input, shape index: {}]   ;;  %s5392_s1 = inlined_call_operand.vmem [shape: bf16[400,64], index: 1, kind: input, shape index: {}]   ;;  %s5393_s2 = inlined_call_operand.vmem [shape: f32[1,64], index: 2, kind: input, shape index: {}]   ;;  %s5394_s3 = inlined_call_operand.vmem [shape: f32[1,64], index: 3, kind: input, shape index: {}]   ;;  %s5395_s4 = inlined_call_operand.vmem [shape: bf16[7,64,128], index: 4, kind: input, shape index: {}]   ;;  %s5396_s5 = inlined_call_operand.vmem [shape: f32[1,128], index: 5, kind: input, shape index: {}]   ;;  %s5397_s6 = inlined_call_operand.vmem [shape: f32[1,128], index: 6, kind: input, shape index: {}]   ;;  %s5398_s7 = inlined_call_operand.vmem [shape: bf16[7,128,128], index: 7, kind: input, shape index: {}]   ;;  %s5399_s8 = inlined_call_operand.vmem [shape: f32[1,128], index: 8, kind: input, shape index: {}]   ;;  %s5400_s9 = inlined_call_operand.vmem [shape: f32[1,128], index: 9, kind: input, shape index: {}]   ;;  %s5401_s10 = inlined_call_operand.vmem [shape: bf16[7,128,256], index: 10, kind: input, shape index: {}]   ;;  %s5402_s11 = inlined_call_operand.vmem [shape: f32[1,256], index: 11, kind: input, shape index: {}]   ;;  %s5403_s12 = inlined_call_operand.vmem [shape: f32[1,256], index: 12, kind: input, shape index: {}]   ;;  %s5404_s13 = inlined_call_operand.vmem [shape: f32[2,1,256], index: 13, kind: output, shape index: {}]  }
   0x1 LB: > { %s3254_s26 = sadd.s32 4294967295, %s4458_s25   ;;  %p3258_p0 = scmp.ge.s32.totalorder %s4458_s25, 1  ;;  %s4458_s25 = sphi %s4534_s25, %s23_s25  }
   0x2   : > { %p387_p1 = scmp.lt.s32.totalorder %s4458_s25, 3 }
   0x4   : > { %p388_p2 = pnand %p3258_p0, %p387_p1 }
   0x5   : > { %v4169_v0 = vld [vmem:[%s5392_s1 + $0x40] sm:$0xff] (!%p388_p2)   ;;  %v4171_v2 = vld [vmem:[%s5392_s1 + $0x48] sm:$0xff] (!%p388_p2)   ;;  %p430_p3 = scmp.lt.s32.totalorder (!%p388_p2), %s3254_s26, 1  ;;  %v4173_v4 = vld [vmem:[%s5392_s1 + $0x50] sm:$0xff] (!%p388_p2)   ;;  %vm663_vm0 = vcmask (!%p388_p2), 130048   ;;  %v4460_v20 = vmov (!%p388_p2), 0  }
   0x6   : > { %391 = sbr.rel (%p388_p2) target bundleno = 1463 (0x5b7), region = 72  ;;  %v4170_v1 = vld [vmem:[%s5392_s1] sm:$0xff] (!%p388_p2)   ;;  %3744 = vmatprep.subr.bf16.mxu1 (!%p388_p2), %v4169_v0  ;;  %v4172_v3 = vld [vmem:[%s5392_s1 + $0x8] sm:$0xff] (!%p388_p2)   ;;  %v4174_v5 = vld [vmem:[%s5392_s1 + $0x10] sm:$0xff] (!%p388_p2)   ;;  %v4461_v30 = vmov (!%p388_p2), 0.0   ;;  %vm769_vm1 = vcmask (!%p388_p2), 523264  }
   0x7   : > { %3745 = vmatpush3.bf16.msra.mxu1 (!%p388_p2), %v4170_v1  ;;  %v4175_v6 = vld [vmem:[%s5392_s1 + $0x58] sm:$0xff] (!%p388_p2)   ;;  %v4177_v8 = vld [vmem:[%s5392_s1 + $0x60] sm:$0xff] (!%p388_p2)   ;;  %v4179_v10 = vld [vmem:[%s5392_s1 + $0x68] sm:$0xff] (!%p388_p2)   ;;  %3876 = vmatprep.subr.bf16.mxu0 (!%p388_p2), %v4461_v30  ;;  %1366 = vst [vmem:[#allocation3] sm:$0xff] (!%p388_p2), %v4461_v30  ;;  %vm4462_vm2 = vmmov (!%p388_p2), 0   ;;  %vm772_vm3 = vcmask (!%p388_p2), 519168  }
   0x8   : > { %3746 = vmatprep.subr.bf16.mxu1 (!%p388_p2), %v4171_v2  ;;  %v4176_v7 = vld [vmem:[%s5392_s1 + $0x18] sm:$0xff] (!%p388_p2)   ;;  %v4178_v9 = vld [vmem:[%s5392_s1 + $0x20] sm:$0xff] (!%p388_p2)   ;;  %v4180_v12 = vld [vmem:[%s5392_s1 + $0x28] sm:$0xff] (!%p388_p2)   ;;  %1367 = vst [vmem:[#allocation3 + $0x8] sm:$0xff] (!%p388_p2), %v4461_v30  ;;  %3884 = vmatprep.mubr.msk.bf16.mxu0 (!%p388_p2), %vm4462_vm2, %v4461_v30  ;;  %vm782_vm4 = vcmask (!%p388_p2), 523268   ;;  %vm780_vm5 = vcmask (!%p388_p2), 516096  }
   0x9   : > { %v4181_v13 = vld [vmem:[%s5392_s1 + $0x70] sm:$0xff] (!%p388_p2)   ;;  %v4183_v15 = vld [vmem:[%s5392_s1 + $0x78] sm:$0xff] (!%p388_p2)   ;;  %v4188_v18 = vld [vmem:[%s5392_s1 + $0x80] sm:$0xff] (!%p388_p2)   ;;  %2139 = vst [vmem:[#allocation4] sm:$0xff] (!%p388_p2), %v4461_v30  ;;  %vm3161_vm6 = vcmask (!%p388_p2), 1041408  }
   0xa   : > { %v4182_v14 = vld [vmem:[%s5392_s1 + $0x30] sm:$0xff] (!%p388_p2)   ;;  %v4184_v16 = vld [vmem:[%s5392_s1 + $0x38] sm:$0xff] (!%p388_p2)   ;;  %v4189_v21 = vld [vmem:[%s5392_s1 + $0x88] sm:$0xff] (!%p388_p2)   ;;  %2140 = vst [vmem:[#allocation4 + $0x8] sm:$0xff] (!%p388_p2), %v4461_v30 }
   0xb   : > { %3747 = vmatpush3.bf16.msra.mxu1 (!%p388_p2), %v4172_v3  ;;  %v4190_v22 = vld [vmem:[%s5392_s1 + $0x90] sm:$0xff] (!%p388_p2)   ;;  %v4191_v23 = vld [vmem:[%s5392_s1 + $0x98] sm:$0xff] (!%p388_p2)   ;;  %v4192_v24 = vld [vmem:[%s5392_s1 + $0xa0] sm:$0xff] (!%p388_p2)   ;;  %770 = vst.msk [vmem:[#allocation2] sm:$0xff] (!%p388_p2), %vm769_vm1, %v4461_v30 }
   0xc   : > { %3748 = vmatprep.subr.bf16.mxu1 (!%p388_p2), %v4173_v4  ;;  %v4193_v25 = vld [vmem:[%s5392_s1 + $0xa8] sm:$0xff] (!%p388_p2)   ;;  %v4194_v26 = vld [vmem:[%s5392_s1 + $0xb0] sm:$0xff] (!%p388_p2)   ;;  %v4195_v27 = vld [vmem:[%s5392_s1 + $0xb8] sm:$0xff] (!%p388_p2)   ;;  %771 = vst.msk [vmem:[#allocation2 + $0x8] sm:$0xff] (!%p388_p2), %vm769_vm1, %v4461_v30 }
   0xd   : > { %s5406_s26 = smov (!%p430_p3, %s3254_s26), 1  ;;  %v4196_v28 = vld [vmem:[%s5392_s1 + $0xc0] sm:$0xff]   ;;  %v4201_v32 = vld [vmem:[%s5395_s4 + $0x8] sm:$0xff]   ;;  %v4202_v33 = vld [vmem:[%s5395_s4 + $0x10] sm:$0xff]  }
   0xe   : > { %s3743_s28 = sshll.u32 %s5406_s26, 5  ;;  %v4200_v31 = vld [vmem:[%s5395_s4] sm:$0xff]   ;;  %v4203_v34 = vld [vmem:[%s5395_s4 + $0x18] sm:$0xff]   ;;  %v4206_v39 = vld [vmem:[%s5395_s4 + $0x48] sm:$0xff]   ;;  %s3261_s23 = sshll.u32 %s5406_s26, 1 }
   0xf   : > { %3749 = vmatpush3.bf16.msra.mxu1 %v4174_v5  ;;  %s4575_s16 = scalar_lea.vmem %s5391_s0, %s3743_s28  ;;  %3877 = vmatpush3.bf16.msra.mxu0 %v4200_v31  ;;  %v4204_v37 = vld [vmem:[%s5395_s4 + $0x40] sm:$0xff]   ;;  %v4207_v40 = vld [vmem:[%s5395_s4 + $0x28] sm:$0xff]   ;;  %v4208_v41 = vld [vmem:[%s5395_s4 + $0x50] sm:$0xff]   ;;  %s438_s28 = scalar_lea.vmem %s5404_s13, %s3261_s23 }
  0x10   : > { %3750 = vmatprep.subr.bf16.mxu1 %v4175_v6  ;;  %v4187_v11 = vld [vmem:[%s4575_s16 + $0x4] ss:$16 sps:$4 sm:$0x7f]   ;;  %v4185_v17 = vld [vmem:[%s4575_s16] ss:$16 sps:$4 sm:$0x7f]   ;;  %3878 = vmatprep.subr.bf16.mxu0 %v4461_v30 }
  0x11   : > { %699 = vmatprep.mubr.bf16.mxu1 %v4187_v11  ;;  %v4197_v19 = vld [vmem:[%s4575_s16 + $0xc] ss:$16 sps:$4 sm:$0x7f]   ;;  %v4199_v29 = vld [vmem:[%s4575_s16 + $0x8] ss:$16 sps:$4 sm:$0x7f]  }
  0x12   : > { %v799_v35 = vld [vmem:[#allocation2] sm:$0x7]  ;;  %v4209_v42 = vld [vmem:[%s5395_s4 + $0x30] sm:$0xff]   ;;  %v4210_v43 = vld [vmem:[%s5395_s4 + $0x58] sm:$0xff]  }
  0x13   : > { %3751 = vmatpush3.bf16.msra.mxu1 %v4176_v7  ;;  %3879 = vmatpush3.bf16.msra.mxu0 %v4201_v32  ;;  %v800_v36 = vpack.c.bf16 %v799_v35, %v799_v35  ;;  %v4205_v38 = vld [vmem:[%s5395_s4 + $0x20] sm:$0xff]   ;;  %v4211_v44 = vld [vmem:[%s5395_s4 + $0x38] sm:$0xff]   ;;  %v4217_v35 = vld [vmem:[%s5395_s4 + $0x88] sm:$0xff]  }
  0x14   : > { %3752 = vmatprep.subr.bf16.mxu1 %v4177_v8  ;;  %3880 = vmatprep.subr.bf16.mxu0 %v4461_v30  ;;  %v3292_v52 = vld [vmem:[%s5393_s2] ss:$0 sm:$0xff]  ;;  %v4215_v31 = vld [vmem:[%s5395_s4 + $0x78] sm:$0xff]  }
  0x15   : > { %v3293_v55 = vld [vmem:[%s5394_s3] ss:$0 sm:$0xff] }
  0x17   : > { %3753 = vmatpush3.bf16.msra.mxu1 %v4178_v9  ;;  %3881 = vmatpush3.bf16.msra.mxu0 %v4202_v33  ;;  %v4216_v33 = vld [vmem:[%s5395_s4 + $0x80] sm:$0xff]  }
  0x18   : > { %3754 = vmatprep.subr.bf16.mxu1 %v4179_v10  ;;  %3882 = vmatprep.subr.bf16.mxu0 %v4461_v30 }
  0x1b   : > { %3755 = vmatpush3.bf16.msra.mxu1 %v4180_v12  ;;  %3883 = vmatpush3.bf16.msra.mxu0 %v4203_v34 }
  0x1c   : > { %3756 = vmatprep.subr.bf16.mxu1 %v4181_v13  ;;  %3888 = vmatprep.subr.bf16.mxu0 %v4461_v30 }
  0x1e   : > { %3885 = vmatmul.mubr.msk.bf16.vlgmr.msra.gmra.mrb[0].mxu0 %vm769_vm1, %v800_v36  ;;  %v4218_v36 = vld [vmem:[%s5395_s4 + $0x90] sm:$0xff]  }
  0x1f   : > { %3757 = vmatpush3.bf16.msra.mxu1 %v4182_v14  ;;  %3889 = vmatpush3.bf16.msra.mxu0 %v4204_v37  ;;  %v4219_v37 = vld [vmem:[%s5395_s4 + $0x98] sm:$0xff]  }
  0x20   : > { %3758 = vmatprep.subr.bf16.mxu1 %v4183_v15  ;;  %3890 = vmatprep.subr.bf16.mxu0 %v4461_v30 }
  0x21   : > { %3896 = vmatprep.mubr.msk.bf16.mxu0 %vm4462_vm2, %v4461_v30 }
  0x23   : > { %3759 = vmatpush3.bf16.msra.mxu1 %v4184_v16  ;;  %3891 = vmatpush3.bf16.msra.mxu0 %v4206_v39  ;;  %v4220_v39 = vld [vmem:[%s5395_s4 + $0xa0] sm:$0xff]  }
  0x24   : > { %708 = vmatprep.subr.bf16.mxu1 %v4460_v20  ;;  %3892 = vmatprep.subr.bf16.mxu0 %v4461_v30 }
  0x26   : > { %700 = vmatmul.mubr.bf16.vlgmr.msra.gmra.mrb[0].mxu1 %v4185_v17 }
  0x27   : > { %709 = vmatpush1.bf16.msra.mxu1 %v4188_v18  ;;  %3291 = vmatprep.mubr.msk.bf16.mxu1 %vm663_vm0, %v4197_v19 }
  0x28   : > { %710 = vmatprep.subr.bf16.mxu1 %v4460_v20  ;;  %3893 = vmatpush3.bf16.msra.mxu0 %v4208_v41  ;;  %v4221_v41 = vld [vmem:[%s5395_s4 + $0xa8] sm:$0xff]  }
  0x29   : > { %3894 = vmatprep.subr.bf16.mxu0 %v4461_v30 }
  0x2b   : > { %711 = vmatpush1.bf16.msra.mxu1 %v4189_v21 }
  0x2c   : > { %712 = vmatprep.subr.bf16.mxu1 %v4460_v20  ;;  %3895 = vmatpush3.bf16.msra.mxu0 %v4210_v43  ;;  %v4223_v43 = vld [vmem:[%s5395_s4 + $0xb8] sm:$0xff]  }
  0x2d   : > { %3900 = vmatprep.subr.bf16.mxu0 %v4461_v30 }
  0x2f   : > { %713 = vmatpush1.bf16.msra.mxu1 %v4190_v22 }
  0x30   : > { %714 = vmatprep.subr.bf16.mxu1 %v4460_v20 }
  0x33   : > { %715 = vmatpush1.bf16.msra.mxu1 %v4191_v23 }
  0x34   : > { %716 = vmatprep.subr.bf16.mxu1 %v4460_v20 }
  0x37   : > { %717 = vmatpush1.bf16.msra.mxu1 %v4192_v24 }
  0x38   : > { %718 = vmatprep.subr.bf16.mxu1 %v4460_v20 }
  0x3b   : > { %719 = vmatpush1.bf16.msra.mxu1 %v4193_v25  ;;  %v4212_v25 = vld [vmem:[%s5395_s4 + $0x60] sm:$0xff]  }
  0x3c   : > { %720 = vmatprep.subr.bf16.mxu1 %v4460_v20 }
  0x3f   : > { %721 = vmatpush1.bf16.msra.mxu1 %v4194_v26 }
  0x40   : > { %722 = vmatprep.subr.bf16.mxu1 %v4460_v20 }
  0x43   : > { %723 = vmatpush1.bf16.msra.mxu1 %v4195_v27 }
  0x44   : > { %724 = vmatprep.subr.bf16.mxu1 %v4460_v20 }
  0x47   : > { %725 = vmatpush1.bf16.msra.mxu1 %v4196_v28  ;;  %v4213_v28 = vld [vmem:[%s5395_s4 + $0x68] sm:$0xff]  }
  0x48   : > { %3864 = vmatprep.subr.bf16.mxu1 %v4461_v30 }
  0x4a   : > { %741 = vmatmul.mubr.bf16.vlgmr.msra.gmra.mrb[4].mxu1 %v4199_v29  ;;  %v4214_v29 = vld [vmem:[%s5395_s4 + $0x70] sm:$0xff]  }
  0x4b   : > { %3872 = vmatprep.mubr.msk.bf16.mxu1 %vm4462_vm2, %v4461_v30  ;;  %3865 = vmatpush3.bf16.msra.mxu1 %v4205_v38 }
  0x4c   : > { %3866 = vmatprep.subr.bf16.mxu1 %v4461_v30 }
  0x4f   : > { %3867 = vmatpush3.bf16.msra.mxu1 %v4207_v40 }
  0x50   : > { %3868 = vmatprep.subr.bf16.mxu1 %v4461_v30 }
  0x53   : > { %3869 = vmatpush3.bf16.msra.mxu1 %v4209_v42  ;;  %v4222_v42 = vld [vmem:[%s5395_s4 + $0xb0] sm:$0xff]  }
  0x54   : > { %3870 = vmatprep.subr.bf16.mxu1 %v4461_v30 }
  0x57   : > { %3871 = vmatpush3.bf16.msra.mxu1 %v4211_v44 }
  0x58   : > { %3948 = vmatprep.subr.bf16.mxu1 %v4461_v30 }
  0xf9   : > { %v3760_v45 = vpop.f32.mrb[0].mxu1 }
  0xfa   : > { %v3761_v46 = vpop.f32.mrb[1].mxu1 }
  0xfb   : > { %v3762_v47 = vadd.f32 %v3761_v46, %v3760_v45  ;;  %v3763_v48 = vpop.f32.mrb[2].mxu1  ;;  %v4224_v45 = vld [vmem:[%s5395_s4 + $0xc0] sm:$0xff]  }
  0xfc   : > { %v3764_v49 = vpop.f32.mrb[3].mxu1 }
  0xfd   : > { %v3765_v50 = vadd.f32 %v3764_v49, %v3763_v48  ;;  %v4226_v48 = vld [vmem:[%s5395_s4 + $0xd0] sm:$0xff]   ;;  %v4227_v49 = vld [vmem:[%s5395_s4 + $0xd8] sm:$0xff]  }
 0x11d   : > { %v742_v51 = vpop.f32.mrb[4].mxu1 }
 0x11e   : > { %v743_v53 = vadd.f32 %v3762_v47, %v742_v51  ;;  %v744_v54 = vpop.f32.mrb[5].mxu1  ;;  %v4225_v47 = vld [vmem:[%s5395_s4 + $0xc8] sm:$0xff]  }
 0x11f   : > { %v745_v56 = vpop.f32.mrb[6].mxu1  ;;  %v4230_v54 = vld [vmem:[%s5398_s7 + $0x50] sm:$0xff]  }
 0x120   : > { %v756_v57 = vmul.f32 %v3292_v52, %v743_v53  ;;  %v746_v58 = vadd.f32 %v3765_v50, %v745_v56  ;;  %v747_v59 = vpop.f32.mrb[7].mxu1  ;;  %v1270_v50 = vld [vmem:[#allocation2 + $0x6] sm:$0x7] }
 0x121   : > { %v1271_v51 = vpack.c.bf16 %v1270_v50, %v1270_v50  ;;  %v4229_v53 = vld [vmem:[%s5398_s7 + $0x48] sm:$0xff]   ;;  %v4232_v56 = vld [vmem:[%s5398_s7 + $0x60] sm:$0xff]   ;;  %v4235_v59 = vld [vmem:[%s5398_s7 + $0x78] sm:$0xff]  }
 0x122   : > { %v765_v60 = vadd.f32 %v3293_v55, %v756_v57  ;;  %v757_v61 = vmul.f32 %v3292_v52, %v746_v58  ;;  %v4228_v52 = vld [vmem:[%s5398_s7 + $0x40] sm:$0xff]   ;;  %v4233_v57 = vld [vmem:[%s5398_s7 + $0x68] sm:$0xff]   ;;  %v4234_v58 = vld [vmem:[%s5398_s7 + $0x70] sm:$0xff]  }
 0x124   : > { %v767_v62 = vmax.f32 %v765_v60, 0.0  ;;  %v766_v63 = vadd.f32 %v3293_v55, %v757_v61  ;;  %v4231_v55 = vld [vmem:[%s5398_s7 + $0x58] sm:$0xff]  }
 0x126   : > { %v773_v0 = vsel %vm772_vm3, %v767_v62, -inf  ;;  %v783_v1 = vsel %vm782_vm4, %v767_v62, -inf  ;;  %v768_v2 = vmax.f32 %v766_v63, 0.0 }
 0x127   : > { %v774_v3 = vrot.slane %v773_v0, 4  ;;  %v784_v4 = vrot.slane %v783_v1, 4 }
 0x128   : > { %v791_v5 = vsel %vm772_vm3, %v768_v2, -inf }
 0x129   : > { %v775_v6 = vmax.f32 %v773_v0, %v774_v3  ;;  %v785_v7 = vmax.f32 %v783_v1, %v784_v4  ;;  %v792_v8 = vrot.slane %v791_v5, 4  ;;  %v3377_v1 = vld [vmem:[%s5396_s5] ss:$0 sm:$0xff] }
 0x12a   : > { %v3378_v4 = vld [vmem:[%s5397_s6] ss:$0 sm:$0xff] }
 0x12b   : > { %v776_v9 = vrot.slane %v775_v6, 2  ;;  %v786_v10 = vrot.slane %v785_v7, 2  ;;  %v793_v11 = vmax.f32 %v791_v5, %v792_v8 }
 0x12d   : > { %v777_v12 = vmax.f32 %v775_v6, %v776_v9  ;;  %v787_v13 = vmax.f32 %v785_v7, %v786_v10  ;;  %v794_v14 = vrot.slane %v793_v11, 2 }
 0x12f   : > { %v778_v15 = vrot.slane %v777_v12, 1  ;;  %v788_v16 = vrot.slane %v787_v13, 1  ;;  %v795_v17 = vmax.f32 %v793_v11, %v794_v14  ;;  %v4236_v11 = vld [vmem:[%s5398_s7] sm:$0xff]   ;;  %v4238_v14 = vld [vmem:[%s5398_s7 + $0x10] sm:$0xff]  }
 0x131   : > { %v779_v18 = vmax.f32 %v777_v12, %v778_v15  ;;  %v789_v19 = vmax.f32 %v787_v13, %v788_v16  ;;  %v796_v21 = vrot.slane %v795_v17, 1  ;;  %v4237_v13 = vld [vmem:[%s5398_s7 + $0x8] sm:$0xff]   ;;  %v4239_v15 = vld [vmem:[%s5398_s7 + $0x18] sm:$0xff]   ;;  %v4240_v16 = vld [vmem:[%s5398_s7 + $0x20] sm:$0xff]  }
 0x133   : > { %781 = vst.msk [vmem:[#allocation2 + $0x3] sm:$0x1] %vm780_vm5, %v779_v18  ;;  %790 = vst.msk [vmem:[#allocation2 + $0x4] sm:$0x1] %vm780_vm5, %v789_v19  ;;  %v797_v22 = vmax.f32 %v795_v17, %v796_v21  ;;  %v4241_v17 = vld [vmem:[%s5398_s7 + $0x28] sm:$0xff]   ;;  %v4242_v18 = vld [vmem:[%s5398_s7 + $0x30] sm:$0xff]  }
 0x134   : > { %v4243_v19 = vld [vmem:[%s5398_s7 + $0x38] sm:$0xff]   ;;  %v1369_v21 = vld [vmem:[#allocation3] sm:$0x7] }
 0x135   : > { %798 = vst.msk [vmem:[#allocation2 + $0x5] sm:$0x1] %vm780_vm5, %v797_v22  ;;  %v1370_v22 = vpack.c.bf16 %v1369_v21, %v1369_v21  ;;  %v4301_v21 = vld [vmem:[%s5401_s10 + $0xd4] ss:$8 sps:$4 sm:$0xff]  }
 0x13a   : > { %v809_v23 = vld [vmem:[#allocation2 + $0x1] sm:$0x7] }
 0x13b   : > { %v954_v24 = vld [vmem:[#allocation2 + $0x2] sm:$0x7]  ;;  %v810_v26 = vpack.c.bf16 %v809_v23, %v809_v23 }
 0x13c   : > { %v955_v27 = vpack.c.bf16 %v954_v24, %v954_v24  ;;  %v1033_v32 = vld [vmem:[#allocation2 + $0x3] sm:$0x7]  ;;  %v4245_v24 = vld [vmem:[%s5398_s7 + $0x88] sm:$0xff]  }
 0x13d   : > { %3873 = vmatmul.mubr.msk.bf16.vlgmr.msra.gmra.mrb[8].mxu1 %vm769_vm1, %v810_v26  ;;  %v1034_v34 = vpack.c.bf16 %v1033_v32, %v1033_v32  ;;  %v1112_v38 = vld [vmem:[#allocation2 + $0x4] sm:$0x7]  ;;  %v4247_v26 = vld [vmem:[%s5398_s7 + $0x98] sm:$0xff]  }
 0x13e   : > { %3897 = vmatmul.mubr.msk.bf16.vlgmr.msra.gmra.mrb[0].mxu0 %vm769_vm1, %v955_v27  ;;  %3964 = vmatprep.mubr.msk.bf16.mxu1 %vm4462_vm2, %v4461_v30  ;;  %v1113_v40 = vpack.c.bf16 %v1112_v38, %v1112_v38  ;;  %v1191_v44 = vld [vmem:[#allocation2 + $0x5] sm:$0x7]  ;;  %v4289_v38 = vld [vmem:[%s5401_s10 + $0x94] ss:$8 sps:$4 sm:$0xff]  }
 0x13f   : > { %3901 = vmatpush3.bf16.msra.mxu0 %v4212_v25  ;;  %3908 = vmatprep.mubr.msk.bf16.mxu0 %vm4462_vm2, %v4461_v30  ;;  %v1192_v46 = vpack.c.bf16 %v1191_v44, %v1191_v44  ;;  %v4244_v23 = vld [vmem:[%s5398_s7 + $0x80] sm:$0xff]   ;;  %v4246_v25 = vld [vmem:[%s5398_s7 + $0x90] sm:$0xff]   ;;  %v4255_v44 = vld [vmem:[%s5398_s7 + $0xd8] sm:$0xff]  }
 0x140   : > { %3902 = vmatprep.subr.bf16.mxu0 %v4461_v30  ;;  %3949 = vmatpush3.bf16.msra.mxu1 %v4228_v52  ;;  %v4248_v27 = vld [vmem:[%s5398_s7 + $0xa0] sm:$0xff]  }
 0x141   : > { %3950 = vmatprep.subr.bf16.mxu1 %v4461_v30 }
 0x143   : > { %3903 = vmatpush3.bf16.msra.mxu0 %v4213_v28  ;;  %v4249_v28 = vld [vmem:[%s5398_s7 + $0xa8] sm:$0xff]  }
 0x144   : > { %3904 = vmatprep.subr.bf16.mxu0 %v4461_v30  ;;  %3951 = vmatpush3.bf16.msra.mxu1 %v4229_v53  ;;  %v4261_v53 = vld [vmem:[%s5398_s7 + $0x108] sm:$0xff]  }
 0x145   : > { %3952 = vmatprep.subr.bf16.mxu1 %v4461_v30 }
 0x147   : > { %3905 = vmatpush3.bf16.msra.mxu0 %v4214_v29  ;;  %v4250_v29 = vld [vmem:[%s5398_s7 + $0xb0] sm:$0xff]  }
 0x148   : > { %3906 = vmatprep.subr.bf16.mxu0 %v4461_v30  ;;  %3953 = vmatpush3.bf16.msra.mxu1 %v4230_v54  ;;  %v4262_v54 = vld [vmem:[%s5398_s7 + $0x110] sm:$0xff]  }
 0x149   : > { %3954 = vmatprep.subr.bf16.mxu1 %v4461_v30 }
 0x14b   : > { %3907 = vmatpush3.bf16.msra.mxu0 %v4215_v31  ;;  %v4251_v31 = vld [vmem:[%s5398_s7 + $0xb8] sm:$0xff]  }
 0x14c   : > { %3912 = vmatprep.subr.bf16.mxu0 %v4461_v30  ;;  %3955 = vmatpush3.bf16.msra.mxu1 %v4231_v55  ;;  %v4263_v55 = vld [vmem:[%s5398_s7 + $0x118] sm:$0xff]  }
 0x14d   : > { %3956 = vmatprep.subr.bf16.mxu1 %v4461_v30 }
 0x14e   : > { %3909 = vmatmul.mubr.msk.bf16.vlgmr.msra.gmra.mrb[0].mxu0 %vm769_vm1, %v1034_v34 }
 0x14f   : > { %3913 = vmatpush3.bf16.msra.mxu0 %v4216_v33  ;;  %3920 = vmatprep.mubr.msk.bf16.mxu0 %vm4462_vm2, %v4461_v30  ;;  %v4252_v33 = vld [vmem:[%s5398_s7 + $0xc0] sm:$0xff]  }
 0x150   : > { %3914 = vmatprep.subr.bf16.mxu0 %v4461_v30  ;;  %3957 = vmatpush3.bf16.msra.mxu1 %v4232_v56  ;;  %v4264_v56 = vld [vmem:[%s5398_s7 + $0x120] sm:$0xff]  }
 0x151   : > { %3958 = vmatprep.subr.bf16.mxu1 %v4461_v30 }
 0x153   : > { %3915 = vmatpush3.bf16.msra.mxu0 %v4217_v35  ;;  %v4284_v35 = vld [vmem:[%s5401_s10 + $0x80] ss:$8 sps:$4 sm:$0xff]  }
 0x154   : > { %3916 = vmatprep.subr.bf16.mxu0 %v4461_v30  ;;  %3959 = vmatpush3.bf16.msra.mxu1 %v4233_v57  ;;  %v4265_v57 = vld [vmem:[%s5398_s7 + $0x128] sm:$0xff]  }
 0x155   : > { %3960 = vmatprep.subr.bf16.mxu1 %v4461_v30 }
 0x157   : > { %3917 = vmatpush3.bf16.msra.mxu0 %v4218_v36  ;;  %v4286_v36 = vld [vmem:[%s5401_s10 + $0x84] ss:$8 sps:$4 sm:$0xff]  }
 0x158   : > { %3918 = vmatprep.subr.bf16.mxu0 %v4461_v30  ;;  %3961 = vmatpush3.bf16.msra.mxu1 %v4234_v58  ;;  %v4266_v58 = vld [vmem:[%s5398_s7 + $0x130] sm:$0xff]  }
 0x159   : > { %3962 = vmatprep.subr.bf16.mxu1 %v4461_v30 }
 0x15b   : > { %3919 = vmatpush3.bf16.msra.mxu0 %v4219_v37  ;;  %v4253_v37 = vld [vmem:[%s5398_s7 + $0xc8] sm:$0xff]  }
 0x15c   : > { %3924 = vmatprep.subr.bf16.mxu0 %v4461_v30  ;;  %3963 = vmatpush3.bf16.msra.mxu1 %v4235_v59  ;;  %v4267_v59 = vld [vmem:[%s5398_s7 + $0x138] sm:$0xff]  }
 0x15d   : > { %3968 = vmatprep.subr.bf16.mxu1 %v4461_v30 }
 0x15e   : > { %3921 = vmatmul.mubr.msk.bf16.vlgmr.msra.gmra.mrb[0].mxu0 %vm769_vm1, %v1113_v40  ;;  %v4292_v40 = vld [vmem:[%s5401_s10 + $0xa4] ss:$8 sps:$4 sm:$0xff]  }
 0x15f   : > { %3925 = vmatpush3.bf16.msra.mxu0 %v4220_v39  ;;  %3932 = vmatprep.mubr.msk.bf16.mxu0 %vm4462_vm2, %v4461_v30  ;;  %v4287_v39 = vld [vmem:[%s5401_s10 + $0x90] ss:$8 sps:$4 sm:$0xff]  }
 0x160   : > { %3926 = vmatprep.subr.bf16.mxu0 %v4461_v30 }
 0x163   : > { %3927 = vmatpush3.bf16.msra.mxu0 %v4221_v41  ;;  %v4254_v41 = vld [vmem:[%s5398_s7 + $0xd0] sm:$0xff]  }
 0x164   : > { %3928 = vmatprep.subr.bf16.mxu0 %v4461_v30 }
 0x167   : > { %3929 = vmatpush3.bf16.msra.mxu0 %v4222_v42  ;;  %v4290_v42 = vld [vmem:[%s5401_s10 + $0xa0] ss:$8 sps:$4 sm:$0xff]  }
 0x168   : > { %3930 = vmatprep.subr.bf16.mxu0 %v4461_v30 }
 0x16b   : > { %3931 = vmatpush3.bf16.msra.mxu0 %v4223_v43  ;;  %v4295_v43 = vld [vmem:[%s5401_s10 + $0xb4] ss:$8 sps:$4 sm:$0xff]  }
 0x16c   : > { %3936 = vmatprep.subr.bf16.mxu0 %v4461_v30 }
 0x16e   : > { %3933 = vmatmul.mubr.msk.bf16.vlgmr.msra.gmra.mrb[0].mxu0 %vm769_vm1, %v1192_v46  ;;  %v4256_v46 = vld [vmem:[%s5398_s7 + $0xe0] sm:$0xff]  }
 0x16f   : > { %3937 = vmatpush3.bf16.msra.mxu0 %v4224_v45  ;;  %3944 = vmatprep.mubr.msk.bf16.mxu0 %vm4462_vm2, %v4461_v30  ;;  %v4293_v45 = vld [vmem:[%s5401_s10 + $0xb0] ss:$8 sps:$4 sm:$0xff]  }
 0x170   : > { %3938 = vmatprep.subr.bf16.mxu0 %v4461_v30 }
 0x173   : > { %3939 = vmatpush3.bf16.msra.mxu0 %v4225_v47  ;;  %v4257_v47 = vld [vmem:[%s5398_s7 + $0xe8] sm:$0xff]  }
 0x174   : > { %3940 = vmatprep.subr.bf16.mxu0 %v4461_v30 }
 0x177   : > { %3941 = vmatpush3.bf16.msra.mxu0 %v4226_v48  ;;  %v4258_v48 = vld [vmem:[%s5398_s7 + $0xf0] sm:$0xff]  }
 0x178   : > { %3942 = vmatprep.subr.bf16.mxu0 %v4461_v30 }
 0x17b   : > { %3943 = vmatpush3.bf16.msra.mxu0 %v4227_v49  ;;  %v4259_v49 = vld [vmem:[%s5398_s7 + $0xf8] sm:$0xff]  }
 0x17c   : > { %2259 = vmatprep.subr.bf16.mxu0 %v4286_v36 }
 0x17e   : > { %3945 = vmatmul.mubr.msk.bf16.vlgmr.msra.gmra.mrb[0].mxu0 %vm769_vm1, %v1271_v51  ;;  %v4260_v51 = vld [vmem:[%s5398_s7 + $0x100] sm:$0xff]  }
 0x17f   : > { %2291 = vmatprep.mubr.bf16.mxu0 %v4460_v20  ;;  %2260 = vmatpush1.bf16.msra.mxu0 %v4284_v35 }
 0x180   : > { %2261 = vmatprep.subr.bf16.mxu0 %v4289_v38 }
 0x183   : > { %2262 = vmatpush1.bf16.msra.mxu0 %v4287_v39 }
 0x184   : > { %2263 = vmatprep.subr.bf16.mxu0 %v4292_v40  ;;  %v4313_v40 = vld [vmem:[%s5401_s10 + $0x14] ss:$8 sps:$4 sm:$0xff]  }
 0x187   : > { %2264 = vmatpush1.bf16.msra.mxu0 %v4290_v42  ;;  %v4316_v42 = vld [vmem:[%s5401_s10 + $0x24] ss:$8 sps:$4 sm:$0xff]  }
 0x188   : > { %2265 = vmatprep.subr.bf16.mxu0 %v4295_v43  ;;  %v4314_v43 = vld [vmem:[%s5401_s10 + $0x20] ss:$8 sps:$4 sm:$0xff]  }
 0x18b   : > { %2266 = vmatpush1.bf16.msra.mxu0 %v4293_v45  ;;  %v4317_v45 = vld [vmem:[%s5401_s10 + $0x30] ss:$8 sps:$4 sm:$0xff]  }
 0x210   : > { %v881_v60 = vpop.f32.mrb[8].mxu1 }
 0x211   : > { %v3874_v61 = vpop.f32.mrb[9].mxu1 }
 0x212   : > { %v884_v62 = vpop.f32.mrb[10].mxu1  ;;  %v4268_v61 = vld [vmem:[%s5398_s7 + $0x140] sm:$0xff]  }
 0x213   : > { %v3875_v63 = vpop.f32.mrb[11].mxu1 }
 0x214   : > { %v4269_v63 = vld [vmem:[%s5398_s7 + $0x148] sm:$0xff]  }
 0x251   : > { %v1342_v0 = vpop.f32.mrb[0].mxu0 }
 0x252   : > { %v4088_v2 = vadd.f32 %v1342_v0, %v881_v60  ;;  %v3946_v3 = vpop.f32.mrb[1].mxu0  ;;  %v4270_v0 = vld [vmem:[%s5398_s7 + $0x150] sm:$0xff]  }
 0x253   : > { %v1345_v5 = vpop.f32.mrb[2].mxu0  ;;  %v4273_v3 = vld [vmem:[%s5398_s7 + $0x168] sm:$0xff]  }
 0x254   : > { %v1356_v6 = vmul.f32 %v4088_v2, %v3377_v1  ;;  %v3947_v7 = vpop.f32.mrb[3].mxu0  ;;  %v4271_v1 = vld [vmem:[%s5398_s7 + $0x158] sm:$0xff]   ;;  %v4272_v2 = vld [vmem:[%s5398_s7 + $0x160] sm:$0xff]  }
 0x255   : > { %v4275_v5 = vld [vmem:[%s5398_s7 + $0x178] sm:$0xff]   ;;  %v4276_v7 = vld [vmem:[%s5398_s7 + $0x180] sm:$0xff]  }
 0x256   : > { %v1364_v8 = vadd.f32 %v3378_v4, %v1356_v6  ;;  %v4274_v4 = vld [vmem:[%s5398_s7 + $0x170] sm:$0xff]  }
 0x258   : > { %v1365_v9 = vmax.f32 %v1364_v8, 0.0 }
 0x25a   : > { %1368 = vst [vmem:[#allocation3 + $0x3] sm:$0x7] %v1365_v9  ;;  %v4277_v9 = vld [vmem:[%s5398_s7 + $0x188] sm:$0xff]  }
 0x261   : > { %v1387_v10 = vld [vmem:[#allocation3 + $0x1] sm:$0x7]  ;;  %v1798_v60 = vld [vmem:[#allocation3 + $0x4] sm:$0x7] }
 0x262   : > { %v1388_v12 = vpack.c.bf16 %v1387_v10, %v1387_v10  ;;  %v1582_v32 = vld [vmem:[#allocation3 + $0x2] sm:$0x7]  ;;  %v1799_v62 = vpack.c.bf16 %v1798_v60, %v1798_v60  ;;  %v1906_v6 = vld [vmem:[#allocation3 + $0x5] sm:$0x7]  ;;  %v4340_v60 = vld [vmem:[%s5401_s10 + $0x124] ss:$8 sps:$4 sm:$0xff]  }
 0x263   : > { %v1583_v34 = vpack.c.bf16 %v1582_v32, %v1582_v32  ;;  %v1690_v50 = vld [vmem:[#allocation3 + $0x3] sm:$0x7]  ;;  %v1907_v8 = vpack.c.bf16 %v1906_v6, %v1906_v6 }
 0x264   : > { %3965 = vmatmul.mubr.bf16.vlgmr.msra.gmra.mrb[12].mxu1 %v1388_v12  ;;  %v1691_v52 = vpack.c.bf16 %v1690_v50, %v1690_v50  ;;  %v4278_v10 = vld [vmem:[%s5398_s7 + $0x190] sm:$0xff]   ;;  %v4280_v12 = vld [vmem:[%s5398_s7 + $0x1a0] sm:$0xff]  }
 0x265   : > { %3969 = vmatpush3.bf16.msra.mxu1 %v4236_v11  ;;  %3984 = vmatprep.mubr.msk.bf16.mxu1 %vm4462_vm2, %v4461_v30  ;;  %v4279_v11 = vld [vmem:[%s5398_s7 + $0x198] sm:$0xff]   ;;  %v4328_v50 = vld [vmem:[%s5401_s10 + $0x64] ss:$8 sps:$4 sm:$0xff]  }
 0x266   : > { %3970 = vmatprep.subr.bf16.mxu1 %v4461_v30  ;;  %v4355_v6 = vld [vmem:[%s5401_s10 + $0x174] ss:$8 sps:$4 sm:$0xff]  }
 0x269   : > { %3971 = vmatpush3.bf16.msra.mxu1 %v4237_v13  ;;  %v4281_v13 = vld [vmem:[%s5398_s7 + $0x1a8] sm:$0xff]  }
 0x26a   : > { %3972 = vmatprep.subr.bf16.mxu1 %v4461_v30 }
 0x26d   : > { %3973 = vmatpush3.bf16.msra.mxu1 %v4238_v14  ;;  %v4282_v14 = vld [vmem:[%s5398_s7 + $0x1b0] sm:$0xff]  }
 0x26e   : > { %3974 = vmatprep.subr.bf16.mxu1 %v4461_v30 }
 0x271   : > { %3975 = vmatpush3.bf16.msra.mxu1 %v4239_v15  ;;  %v4283_v15 = vld [vmem:[%s5398_s7 + $0x1b8] sm:$0xff]  }
 0x272   : > { %3976 = vmatprep.subr.bf16.mxu1 %v4461_v30 }
 0x275   : > { %3977 = vmatpush3.bf16.msra.mxu1 %v4240_v16  ;;  %v2014_v16 = vld [vmem:[#allocation3 + $0x6] sm:$0x7] }
 0x276   : > { %3978 = vmatprep.subr.bf16.mxu1 %v4461_v30 }
 0x279   : > { %3979 = vmatpush3.bf16.msra.mxu1 %v4241_v17  ;;  %v2015_v17 = vpack.c.bf16 %v2014_v16, %v2014_v16  ;;  %v4367_v16 = vld [vmem:[%s5401_s10 + $0x1b4] ss:$8 sps:$4 sm:$0xff]  }
 0x27a   : > { %3980 = vmatprep.subr.bf16.mxu1 %v4461_v30 }
 0x27d   : > { %3981 = vmatpush3.bf16.msra.mxu1 %v4242_v18  ;;  %v4298_v18 = vld [vmem:[%s5401_s10 + $0xc4] ss:$8 sps:$4 sm:$0xff]  }
 0x27e   : > { %3982 = vmatprep.subr.bf16.mxu1 %v4461_v30  ;;  %2267 = vmatprep.subr.bf16.mxu0 %v4298_v18  ;;  %v4370_v18 = vld [vmem:[%s5401_s10 + $0x1c4] ss:$8 sps:$4 sm:$0xff]  }
 0x281   : > { %3983 = vmatpush3.bf16.msra.mxu1 %v4243_v19  ;;  %v4296_v19 = vld [vmem:[%s5401_s10 + $0xc0] ss:$8 sps:$4 sm:$0xff]  }
 0x282   : > { %3988 = vmatprep.subr.bf16.mxu1 %v4461_v30  ;;  %2268 = vmatpush1.bf16.msra.mxu0 %v4296_v19  ;;  %v4368_v19 = vld [vmem:[%s5401_s10 + $0x1c0] ss:$8 sps:$4 sm:$0xff]  }
 0x283   : > { %2269 = vmatprep.subr.bf16.mxu0 %v4301_v21  ;;  %v4373_v21 = vld [vmem:[%s5401_s10 + $0x1d4] ss:$8 sps:$4 sm:$0xff]  }
 0x284   : > { %3985 = vmatmul.mubr.bf16.vlgmr.msra.gmra.mrb[12].mxu1 %v1370_v22  ;;  %v4304_v22 = vld [vmem:[%s5401_s10 + $0xe4] ss:$8 sps:$4 sm:$0xff]  }
 0x285   : > { %3989 = vmatpush3.bf16.msra.mxu1 %v4244_v23  ;;  %4004 = vmatprep.mubr.msk.bf16.mxu1 %vm4462_vm2, %v4461_v30  ;;  %v4302_v23 = vld [vmem:[%s5401_s10 + $0xe0] ss:$8 sps:$4 sm:$0xff]  }
 0x286   : > { %3990 = vmatprep.subr.bf16.mxu1 %v4461_v30 }
 0x289   : > { %3991 = vmatpush3.bf16.msra.mxu1 %v4245_v24  ;;  %v4307_v24 = vld [vmem:[%s5401_s10 + $0xf4] ss:$8 sps:$4 sm:$0xff]  }
 0x28a   : > { %3992 = vmatprep.subr.bf16.mxu1 %v4461_v30 }
 0x28d   : > { %3993 = vmatpush3.bf16.msra.mxu1 %v4246_v25  ;;  %v4305_v25 = vld [vmem:[%s5401_s10 + $0xf0] ss:$8 sps:$4 sm:$0xff]  }
 0x28e   : > { %3994 = vmatprep.subr.bf16.mxu1 %v4461_v30 }
 0x291   : > { %3995 = vmatpush3.bf16.msra.mxu1 %v4247_v26  ;;  %v4310_v26 = vld [vmem:[%s5401_s10 + $0x4] ss:$8 sps:$4 sm:$0xff]  }
 0x292   : > { %3996 = vmatprep.subr.bf16.mxu1 %v4461_v30 }
 0x295   : > { %3997 = vmatpush3.bf16.msra.mxu1 %v4248_v27  ;;  %v3531_v27 = vld [vmem:[%s5399_s8] ss:$0 sm:$0xff] }
 0x296   : > { %3998 = vmatprep.subr.bf16.mxu1 %v4461_v30 }
 0x299   : > { %3999 = vmatpush3.bf16.msra.mxu1 %v4249_v28 }
 0x29a   : > { %4000 = vmatprep.subr.bf16.mxu1 %v4461_v30 }
 0x29d   : > { %4001 = vmatpush3.bf16.msra.mxu1 %v4250_v29  ;;  %v3532_v29 = vld [vmem:[%s5400_s9] ss:$0 sm:$0xff] }
 0x29e   : > { %4002 = vmatprep.subr.bf16.mxu1 %v4461_v30 }
 0x2a1   : > { %4003 = vmatpush3.bf16.msra.mxu1 %v4251_v31 }
 0x2a2   : > { %4008 = vmatprep.subr.bf16.mxu1 %v4461_v30 }
 0x2a4   : > { %4005 = vmatmul.mubr.bf16.vlgmr.msra.gmra.mrb[12].mxu1 %v1583_v34 }
 0x2a5   : > { %4009 = vmatpush3.bf16.msra.mxu1 %v4252_v33  ;;  %4024 = vmatprep.mubr.msk.bf16.mxu1 %vm4462_vm2, %v4461_v30 }
 0x2a6   : > { %4010 = vmatprep.subr.bf16.mxu1 %v4461_v30 }
 0x2a9   : > { %4011 = vmatpush3.bf16.msra.mxu1 %v4253_v37  ;;  %v4308_v37 = vld [vmem:[%s5401_s10] ss:$8 sps:$4 sm:$0xff]  }
 0x2aa   : > { %4012 = vmatprep.subr.bf16.mxu1 %v4461_v30 }
 0x2ad   : > { %4013 = vmatpush3.bf16.msra.mxu1 %v4254_v41  ;;  %v4311_v41 = vld [vmem:[%s5401_s10 + $0x10] ss:$8 sps:$4 sm:$0xff]  }
 0x2ae   : > { %4014 = vmatprep.subr.bf16.mxu1 %v4461_v30 }
 0x2b1   : > { %4015 = vmatpush3.bf16.msra.mxu1 %v4255_v44  ;;  %v4319_v44 = vld [vmem:[%s5401_s10 + $0x34] ss:$8 sps:$4 sm:$0xff]  }
 0x2b2   : > { %4016 = vmatprep.subr.bf16.mxu1 %v4461_v30 }
 0x2b5   : > { %4017 = vmatpush3.bf16.msra.mxu1 %v4256_v46  ;;  %v4322_v46 = vld [vmem:[%s5401_s10 + $0x44] ss:$8 sps:$4 sm:$0xff]  }
 0x2b6   : > { %4018 = vmatprep.subr.bf16.mxu1 %v4461_v30 }
 0x2b9   : > { %4019 = vmatpush3.bf16.msra.mxu1 %v4257_v47  ;;  %v4320_v47 = vld [vmem:[%s5401_s10 + $0x40] ss:$8 sps:$4 sm:$0xff]  }
 0x2ba   : > { %4020 = vmatprep.subr.bf16.mxu1 %v4461_v30 }
 0x2bd   : > { %4021 = vmatpush3.bf16.msra.mxu1 %v4258_v48  ;;  %v4325_v48 = vld [vmem:[%s5401_s10 + $0x54] ss:$8 sps:$4 sm:$0xff]  }
 0x2be   : > { %4022 = vmatprep.subr.bf16.mxu1 %v4461_v30 }
 0x2c1   : > { %4023 = vmatpush3.bf16.msra.mxu1 %v4259_v49  ;;  %v4323_v49 = vld [vmem:[%s5401_s10 + $0x50] ss:$8 sps:$4 sm:$0xff]  }
 0x2c2   : > { %4028 = vmatprep.subr.bf16.mxu1 %v4461_v30 }
 0x2c4   : > { %4025 = vmatmul.mubr.bf16.vlgmr.msra.gmra.mrb[12].mxu1 %v1691_v52  ;;  %v4331_v52 = vld [vmem:[%s5401_s10 + $0x74] ss:$8 sps:$4 sm:$0xff]  }
 0x2c5   : > { %4029 = vmatpush3.bf16.msra.mxu1 %v4260_v51  ;;  %4044 = vmatprep.mubr.msk.bf16.mxu1 %vm4462_vm2, %v4461_v30  ;;  %v4326_v51 = vld [vmem:[%s5401_s10 + $0x60] ss:$8 sps:$4 sm:$0xff]  }
 0x2c6   : > { %4030 = vmatprep.subr.bf16.mxu1 %v4461_v30 }
 0x2c9   : > { %4031 = vmatpush3.bf16.msra.mxu1 %v4261_v53  ;;  %v4329_v53 = vld [vmem:[%s5401_s10 + $0x70] ss:$8 sps:$4 sm:$0xff]  }
 0x2ca   : > { %4032 = vmatprep.subr.bf16.mxu1 %v4461_v30 }
 0x2cd   : > { %4033 = vmatpush3.bf16.msra.mxu1 %v4262_v54  ;;  %v2142_v54 = vld [vmem:[#allocation4] sm:$0x7] }
 0x2ce   : > { %4034 = vmatprep.subr.bf16.mxu1 %v4461_v30 }
 0x2d1   : > { %4035 = vmatpush3.bf16.msra.mxu1 %v4263_v55  ;;  %v4334_v55 = vld [vmem:[%s5401_s10 + $0x104] ss:$8 sps:$4 sm:$0xff]  }
 0x2d2   : > { %4036 = vmatprep.subr.bf16.mxu1 %v4461_v30 }
 0x2d5   : > { %4037 = vmatpush3.bf16.msra.mxu1 %v4264_v56  ;;  %v2143_v56 = vpack.c.bf16 %v2142_v54, %v2142_v54  ;;  %v4413_v54 = vld [vmem:[%s5401_s10 + $0x2b0] ss:$8 sps:$4 sm:$0xff]  }
 0x2d6   : > { %4038 = vmatprep.subr.bf16.mxu1 %v4461_v30 }
 0x2d9   : > { %4039 = vmatpush3.bf16.msra.mxu1 %v4265_v57  ;;  %v4332_v57 = vld [vmem:[%s5401_s10 + $0x100] ss:$8 sps:$4 sm:$0xff]  }
 0x2da   : > { %4040 = vmatprep.subr.bf16.mxu1 %v4461_v30 }
 0x2dd   : > { %4041 = vmatpush3.bf16.msra.mxu1 %v4266_v58  ;;  %v4337_v58 = vld [vmem:[%s5401_s10 + $0x114] ss:$8 sps:$4 sm:$0xff]  }
 0x2de   : > { %4042 = vmatprep.subr.bf16.mxu1 %v4461_v30 }
 0x2e1   : > { %4043 = vmatpush3.bf16.msra.mxu1 %v4267_v59  ;;  %v4335_v59 = vld [vmem:[%s5401_s10 + $0x110] ss:$8 sps:$4 sm:$0xff]  }
 0x2e2   : > { %4048 = vmatprep.subr.bf16.mxu1 %v4461_v30 }
 0x2e4   : > { %4045 = vmatmul.mubr.bf16.vlgmr.msra.gmra.mrb[12].mxu1 %v1799_v62  ;;  %v4343_v62 = vld [vmem:[%s5401_s10 + $0x134] ss:$8 sps:$4 sm:$0xff]  }
 0x2e5   : > { %4049 = vmatpush3.bf16.msra.mxu1 %v4268_v61  ;;  %4064 = vmatprep.mubr.msk.bf16.mxu1 %vm4462_vm2, %v4461_v30  ;;  %v4338_v61 = vld [vmem:[%s5401_s10 + $0x120] ss:$8 sps:$4 sm:$0xff]  }
 0x2e6   : > { %4050 = vmatprep.subr.bf16.mxu1 %v4461_v30 }
 0x2e9   : > { %4051 = vmatpush3.bf16.msra.mxu1 %v4269_v63  ;;  %v4341_v63 = vld [vmem:[%s5401_s10 + $0x130] ss:$8 sps:$4 sm:$0xff]  }
 0x2ea   : > { %4052 = vmatprep.subr.bf16.mxu1 %v4461_v30 }
 0x2ed   : > { %4053 = vmatpush3.bf16.msra.mxu1 %v4270_v0  ;;  %v4346_v0 = vld [vmem:[%s5401_s10 + $0x144] ss:$8 sps:$4 sm:$0xff]  }
 0x2ee   : > { %4054 = vmatprep.subr.bf16.mxu1 %v4461_v30 }
 0x2f1   : > { %4055 = vmatpush3.bf16.msra.mxu1 %v4271_v1  ;;  %v4344_v1 = vld [vmem:[%s5401_s10 + $0x140] ss:$8 sps:$4 sm:$0xff]  }
 0x2f2   : > { %4056 = vmatprep.subr.bf16.mxu1 %v4461_v30 }
 0x2f5   : > { %4057 = vmatpush3.bf16.msra.mxu1 %v4272_v2  ;;  %v4349_v2 = vld [vmem:[%s5401_s10 + $0x154] ss:$8 sps:$4 sm:$0xff]  }
 0x2f6   : > { %4058 = vmatprep.subr.bf16.mxu1 %v4461_v30 }
 0x2f9   : > { %4059 = vmatpush3.bf16.msra.mxu1 %v4273_v3  ;;  %v4347_v3 = vld [vmem:[%s5401_s10 + $0x150] ss:$8 sps:$4 sm:$0xff]  }
 0x2fa   : > { %4060 = vmatprep.subr.bf16.mxu1 %v4461_v30 }
 0x2fd   : > { %4061 = vmatpush3.bf16.msra.mxu1 %v4274_v4  ;;  %v4352_v4 = vld [vmem:[%s5401_s10 + $0x164] ss:$8 sps:$4 sm:$0xff]  }
 0x2fe   : > { %4062 = vmatprep.subr.bf16.mxu1 %v4461_v30 }
 0x301   : > { %4063 = vmatpush3.bf16.msra.mxu1 %v4275_v5  ;;  %v4350_v5 = vld [vmem:[%s5401_s10 + $0x160] ss:$8 sps:$4 sm:$0xff]  }
 0x302   : > { %4068 = vmatprep.subr.bf16.mxu1 %v4461_v30 }
 0x304   : > { %4065 = vmatmul.mubr.bf16.vlgmr.msra.gmra.mrb[12].mxu1 %v1907_v8  ;;  %v4358_v8 = vld [vmem:[%s5401_s10 + $0x184] ss:$8 sps:$4 sm:$0xff]  }
 0x305   : > { %4069 = vmatpush3.bf16.msra.mxu1 %v4276_v7  ;;  %4084 = vmatprep.mubr.msk.bf16.mxu1 %vm4462_vm2, %v4461_v30  ;;  %v4353_v7 = vld [vmem:[%s5401_s10 + $0x170] ss:$8 sps:$4 sm:$0xff]  }
 0x306   : > { %4070 = vmatprep.subr.bf16.mxu1 %v4461_v30 }
 0x309   : > { %4071 = vmatpush3.bf16.msra.mxu1 %v4277_v9 }
 0x30a   : > { %4072 = vmatprep.subr.bf16.mxu1 %v4461_v30 }
 0x30d   : > { %4073 = vmatpush3.bf16.msra.mxu1 %v4278_v10  ;;  %v4356_v10 = vld [vmem:[%s5401_s10 + $0x180] ss:$8 sps:$4 sm:$0xff]  }
 0x30e   : > { %4074 = vmatprep.subr.bf16.mxu1 %v4461_v30 }
 0x311   : > { %4075 = vmatpush3.bf16.msra.mxu1 %v4279_v11 }
 0x312   : > { %4076 = vmatprep.subr.bf16.mxu1 %v4461_v30 }
 0x315   : > { %4077 = vmatpush3.bf16.msra.mxu1 %v4280_v12  ;;  %v4361_v12 = vld [vmem:[%s5401_s10 + $0x194] ss:$8 sps:$4 sm:$0xff]  }
 0x316   : > { %4078 = vmatprep.subr.bf16.mxu1 %v4461_v30 }
 0x319   : > { %4079 = vmatpush3.bf16.msra.mxu1 %v4281_v13  ;;  %v4359_v13 = vld [vmem:[%s5401_s10 + $0x190] ss:$8 sps:$4 sm:$0xff]  }
 0x31a   : > { %4080 = vmatprep.subr.bf16.mxu1 %v4461_v30 }
 0x31d   : > { %4081 = vmatpush3.bf16.msra.mxu1 %v4282_v14  ;;  %v4364_v14 = vld [vmem:[%s5401_s10 + $0x1a4] ss:$8 sps:$4 sm:$0xff]  }
 0x31e   : > { %4082 = vmatprep.subr.bf16.mxu1 %v4461_v30  ;;  %v4299_v30 = vld [vmem:[%s5401_s10 + $0xd0] ss:$8 sps:$4 sm:$0xff]  }
 0x31f   : > { %2270 = vmatpush1.bf16.msra.mxu0 %v4299_v30  ;;  %v4371_v30 = vld [vmem:[%s5401_s10 + $0x1d0] ss:$8 sps:$4 sm:$0xff]  }
 0x320   : > { %2271 = vmatprep.subr.bf16.mxu0 %v4304_v22  ;;  %v4376_v22 = vld [vmem:[%s5401_s10 + $0x1e4] ss:$8 sps:$4 sm:$0xff]  }
 0x321   : > { %4083 = vmatpush3.bf16.msra.mxu1 %v4283_v15  ;;  %v4362_v15 = vld [vmem:[%s5401_s10 + $0x1a0] ss:$8 sps:$4 sm:$0xff]  }
 0x323   : > { %2272 = vmatpush1.bf16.msra.mxu0 %v4302_v23  ;;  %v4374_v23 = vld [vmem:[%s5401_s10 + $0x1e0] ss:$8 sps:$4 sm:$0xff]  }
 0x324   : > { %4085 = vmatmul.mubr.bf16.vlgmr.msra.gmra.mrb[12].mxu1 %v2015_v17  ;;  %2273 = vmatprep.subr.bf16.mxu0 %v4307_v24  ;;  %v4365_v17 = vld [vmem:[%s5401_s10 + $0x1b0] ss:$8 sps:$4 sm:$0xff]   ;;  %v4379_v24 = vld [vmem:[%s5401_s10 + $0x1f4] ss:$8 sps:$4 sm:$0xff]  }
 0x327   : > { %2274 = vmatpush1.bf16.msra.mxu0 %v4305_v25  ;;  %v4377_v25 = vld [vmem:[%s5401_s10 + $0x1f0] ss:$8 sps:$4 sm:$0xff]  }
 0x328   : > { %2380 = vmatprep.subr.bf16.mxu0 %v4310_v26  ;;  %v4382_v26 = vld [vmem:[%s5401_s10 + $0x204] ss:$8 sps:$4 sm:$0xff]  }
 0x3f7   : > { %v2115_v28 = vpop.f32.mrb[12].mxu1 }
 0x3f8   : > { %v2129_v31 = vmul.f32 %v3531_v27, %v2115_v28  ;;  %v4086_v32 = vpop.f32.mrb[13].mxu1  ;;  %v4380_v28 = vld [vmem:[%s5401_s10 + $0x200] ss:$8 sps:$4 sm:$0xff]  }
 0x3f9   : > { %v2118_v33 = vpop.f32.mrb[14].mxu1  ;;  %v4383_v32 = vld [vmem:[%s5401_s10 + $0x210] ss:$8 sps:$4 sm:$0xff]  }
 0x3fa   : > { %v2137_v34 = vadd.f32 %v3532_v29, %v2129_v31  ;;  %v4087_v35 = vpop.f32.mrb[15].mxu1  ;;  %v4385_v31 = vld [vmem:[%s5401_s10 + $0x214] ss:$8 sps:$4 sm:$0xff]   ;;  %v4388_v33 = vld [vmem:[%s5401_s10 + $0x224] ss:$8 sps:$4 sm:$0xff]  }
 0x3fb   : > { %v4391_v35 = vld [vmem:[%s5401_s10 + $0x234] ss:$8 sps:$4 sm:$0xff]  }
 0x3fc   : > { %v2138_v36 = vmax.f32 %v2137_v34, 0.0  ;;  %v4386_v34 = vld [vmem:[%s5401_s10 + $0x220] ss:$8 sps:$4 sm:$0xff]  }
 0x3fe   : > { %2141 = vst [vmem:[#allocation4 + $0x3] sm:$0x7] %v2138_v36  ;;  %v4389_v36 = vld [vmem:[%s5401_s10 + $0x230] ss:$8 sps:$4 sm:$0xff]  }
 0x405   : > { %v2160_v38 = vld [vmem:[#allocation4 + $0x1] sm:$0x7] }
 0x406   : > { %v2161_v39 = vpack.c.bf16 %v2160_v38, %v2160_v38  ;;  %v2421_v9 = vld [vmem:[#allocation4 + $0x2] sm:$0x7] }
 0x407   : > { %v2422_v11 = vpack.c.bf16 %v2421_v9, %v2421_v9  ;;  %v2563_v27 = vld [vmem:[#allocation4 + $0x3] sm:$0x7] }
 0x408   : > { %2292 = vmatmul.mubr.bf16.vlgmr.msra.gmra.mrb[4].mxu0 %v2161_v39  ;;  %v2564_v29 = vpack.c.bf16 %v2563_v27, %v2563_v27  ;;  %v4392_v38 = vld [vmem:[%s5401_s10 + $0x240] ss:$8 sps:$4 sm:$0xff]   ;;  %v4397_v39 = vld [vmem:[%s5401_s10 + $0x254] ss:$8 sps:$4 sm:$0xff]  }
 0x409   : > { %2381 = vmatpush1.bf16.msra.mxu0 %v4308_v37  ;;  %2412 = vmatprep.mubr.bf16.mxu0 %v4460_v20  ;;  %v4394_v37 = vld [vmem:[%s5401_s10 + $0x244] ss:$8 sps:$4 sm:$0xff]   ;;  %v4440_v9 = vld [vmem:[%s5401_s10 + $0x340] ss:$8 sps:$4 sm:$0xff]  }
 0x40a   : > { %2382 = vmatprep.subr.bf16.mxu0 %v4313_v40  ;;  %v4395_v40 = vld [vmem:[%s5401_s10 + $0x250] ss:$8 sps:$4 sm:$0xff]  }
 0x40d   : > { %2383 = vmatpush1.bf16.msra.mxu0 %v4311_v41  ;;  %v4400_v41 = vld [vmem:[%s5401_s10 + $0x264] ss:$8 sps:$4 sm:$0xff]  }
 0x40e   : > { %2384 = vmatprep.subr.bf16.mxu0 %v4316_v42  ;;  %v4398_v42 = vld [vmem:[%s5401_s10 + $0x260] ss:$8 sps:$4 sm:$0xff]  }
 0x411   : > { %2385 = vmatpush1.bf16.msra.mxu0 %v4314_v43  ;;  %v4403_v43 = vld [vmem:[%s5401_s10 + $0x274] ss:$8 sps:$4 sm:$0xff]  }
 0x412   : > { %2386 = vmatprep.subr.bf16.mxu0 %v4319_v44  ;;  %v4401_v44 = vld [vmem:[%s5401_s10 + $0x270] ss:$8 sps:$4 sm:$0xff]  }
 0x415   : > { %2387 = vmatpush1.bf16.msra.mxu0 %v4317_v45  ;;  %v4406_v45 = vld [vmem:[%s5401_s10 + $0x284] ss:$8 sps:$4 sm:$0xff]  }
 0x416   : > { %2388 = vmatprep.subr.bf16.mxu0 %v4322_v46  ;;  %v2705_v46 = vld [vmem:[#allocation4 + $0x4] sm:$0x7] }
 0x419   : > { %2389 = vmatpush1.bf16.msra.mxu0 %v4320_v47  ;;  %v4404_v47 = vld [vmem:[%s5401_s10 + $0x280] ss:$8 sps:$4 sm:$0xff]  }
 0x41a   : > { %2390 = vmatprep.subr.bf16.mxu0 %v4325_v48  ;;  %v2706_v48 = vpack.c.bf16 %v2705_v46, %v2705_v46 }
 0x41d   : > { %2391 = vmatpush1.bf16.msra.mxu0 %v4323_v49  ;;  %v4409_v49 = vld [vmem:[%s5401_s10 + $0x294] ss:$8 sps:$4 sm:$0xff]  }
 0x41e   : > { %2392 = vmatprep.subr.bf16.mxu0 %v4328_v50  ;;  %v4407_v50 = vld [vmem:[%s5401_s10 + $0x290] ss:$8 sps:$4 sm:$0xff]  }
 0x421   : > { %2393 = vmatpush1.bf16.msra.mxu0 %v4326_v51  ;;  %v4412_v51 = vld [vmem:[%s5401_s10 + $0x2a4] ss:$8 sps:$4 sm:$0xff]  }
 0x422   : > { %2394 = vmatprep.subr.bf16.mxu0 %v4331_v52  ;;  %v4410_v52 = vld [vmem:[%s5401_s10 + $0x2a0] ss:$8 sps:$4 sm:$0xff]  }
 0x425   : > { %2395 = vmatpush1.bf16.msra.mxu0 %v4329_v53  ;;  %v4415_v53 = vld [vmem:[%s5401_s10 + $0x2b4] ss:$8 sps:$4 sm:$0xff]  }
 0x426   : > { %2520 = vmatprep.subr.bf16.mxu0 %v4334_v55  ;;  %v4418_v55 = vld [vmem:[%s5401_s10 + $0x2c4] ss:$8 sps:$4 sm:$0xff]  }
 0x428   : > { %2413 = vmatmul.mubr.bf16.vlgmr.msra.gmra.mrb[4].mxu0 %v2143_v56  ;;  %v4416_v56 = vld [vmem:[%s5401_s10 + $0x2c0] ss:$8 sps:$4 sm:$0xff]  }
 0x429   : > { %2521 = vmatpush1.bf16.msra.mxu0 %v4332_v57  ;;  %2552 = vmatprep.mubr.bf16.mxu0 %v4460_v20  ;;  %v4421_v57 = vld [vmem:[%s5401_s10 + $0x2d4] ss:$8 sps:$4 sm:$0xff]  }
 0x42a   : > { %2522 = vmatprep.subr.bf16.mxu0 %v4337_v58  ;;  %v4419_v58 = vld [vmem:[%s5401_s10 + $0x2d0] ss:$8 sps:$4 sm:$0xff]  }
 0x42d   : > { %2523 = vmatpush1.bf16.msra.mxu0 %v4335_v59  ;;  %v4424_v59 = vld [vmem:[%s5401_s10 + $0x2e4] ss:$8 sps:$4 sm:$0xff]  }
 0x42e   : > { %2524 = vmatprep.subr.bf16.mxu0 %v4340_v60  ;;  %v4422_v60 = vld [vmem:[%s5401_s10 + $0x2e0] ss:$8 sps:$4 sm:$0xff]  }
 0x431   : > { %2525 = vmatpush1.bf16.msra.mxu0 %v4338_v61  ;;  %v4427_v61 = vld [vmem:[%s5401_s10 + $0x2f4] ss:$8 sps:$4 sm:$0xff]  }
 0x432   : > { %2526 = vmatprep.subr.bf16.mxu0 %v4343_v62  ;;  %v4425_v62 = vld [vmem:[%s5401_s10 + $0x2f0] ss:$8 sps:$4 sm:$0xff]  }
 0x435   : > { %2527 = vmatpush1.bf16.msra.mxu0 %v4341_v63  ;;  %v4430_v63 = vld [vmem:[%s5401_s10 + $0x304] ss:$8 sps:$4 sm:$0xff]  }
 0x436   : > { %2528 = vmatprep.subr.bf16.mxu0 %v4346_v0  ;;  %v2847_v0 = vld [vmem:[#allocation4 + $0x5] sm:$0x7] }
 0x439   : > { %2529 = vmatpush1.bf16.msra.mxu0 %v4344_v1  ;;  %v4428_v1 = vld [vmem:[%s5401_s10 + $0x300] ss:$8 sps:$4 sm:$0xff]  }
 0x43a   : > { %2530 = vmatprep.subr.bf16.mxu0 %v4349_v2  ;;  %v2848_v2 = vpack.c.bf16 %v2847_v0, %v2847_v0 }
 0x43d   : > { %2531 = vmatpush1.bf16.msra.mxu0 %v4347_v3  ;;  %v4433_v3 = vld [vmem:[%s5401_s10 + $0x314] ss:$8 sps:$4 sm:$0xff]  }
 0x43e   : > { %2532 = vmatprep.subr.bf16.mxu0 %v4352_v4  ;;  %v4431_v4 = vld [vmem:[%s5401_s10 + $0x310] ss:$8 sps:$4 sm:$0xff]  }
 0x441   : > { %2533 = vmatpush1.bf16.msra.mxu0 %v4350_v5  ;;  %v4436_v5 = vld [vmem:[%s5401_s10 + $0x324] ss:$8 sps:$4 sm:$0xff]  }
 0x442   : > { %2534 = vmatprep.subr.bf16.mxu0 %v4355_v6  ;;  %v4434_v6 = vld [vmem:[%s5401_s10 + $0x320] ss:$8 sps:$4 sm:$0xff]  }
 0x445   : > { %2535 = vmatpush1.bf16.msra.mxu0 %v4353_v7  ;;  %v4439_v7 = vld [vmem:[%s5401_s10 + $0x334] ss:$8 sps:$4 sm:$0xff]  }
 0x446   : > { %2662 = vmatprep.subr.bf16.mxu0 %v4358_v8  ;;  %v4442_v8 = vld [vmem:[%s5401_s10 + $0x344] ss:$8 sps:$4 sm:$0xff]  }
 0x448   : > { %2553 = vmatmul.mubr.bf16.vlgmr.msra.gmra.mrb[4].mxu0 %v2422_v11  ;;  %v4443_v11 = vld [vmem:[%s5401_s10 + $0x350] ss:$8 sps:$4 sm:$0xff]  }
 0x449   : > { %2663 = vmatpush1.bf16.msra.mxu0 %v4356_v10  ;;  %2694 = vmatprep.mubr.bf16.mxu0 %v4460_v20  ;;  %v4445_v10 = vld [vmem:[%s5401_s10 + $0x354] ss:$8 sps:$4 sm:$0xff]  }
 0x44a   : > { %2664 = vmatprep.subr.bf16.mxu0 %v4361_v12  ;;  %v4448_v12 = vld [vmem:[%s5401_s10 + $0x364] ss:$8 sps:$4 sm:$0xff]  }
 0x44d   : > { %2665 = vmatpush1.bf16.msra.mxu0 %v4359_v13  ;;  %v4446_v13 = vld [vmem:[%s5401_s10 + $0x360] ss:$8 sps:$4 sm:$0xff]  }
 0x44e   : > { %2666 = vmatprep.subr.bf16.mxu0 %v4364_v14  ;;  %v4451_v14 = vld [vmem:[%s5401_s10 + $0x374] ss:$8 sps:$4 sm:$0xff]  }
 0x451   : > { %2667 = vmatpush1.bf16.msra.mxu0 %v4362_v15  ;;  %v4449_v15 = vld [vmem:[%s5401_s10 + $0x370] ss:$8 sps:$4 sm:$0xff]  }
 0x452   : > { %2668 = vmatprep.subr.bf16.mxu0 %v4367_v16  ;;  %v2989_v16 = vld [vmem:[#allocation4 + $0x6] sm:$0x7] }
 0x455   : > { %2669 = vmatpush1.bf16.msra.mxu0 %v4365_v17  ;;  %v2990_v17 = vpack.c.bf16 %v2989_v16, %v2989_v16 }
 0x456   : > { %2670 = vmatprep.subr.bf16.mxu0 %v4370_v18  ;;  %v3133_v18 = vlaneseq }
 0x458   : > { %vm3198_vm7 = vcmp.lt.s32.totalorder %v3133_v18, 256 }
 0x459   : > { %2671 = vmatpush1.bf16.msra.mxu0 %v4368_v19  ;;  %v3134_v19 = vshrl.u32 %v3133_v18, 7 }
 0x45a   : > { %2672 = vmatprep.subr.bf16.mxu0 %v4373_v21 }
 0x45b   : > { %v3135_v21 = vsub.s32 0, %v3134_v19 }
 0x45d   : > { %2673 = vmatpush1.bf16.msra.mxu0 %v4371_v30  ;;  %v3131_v30 = vld [vmem:[%s5402_s11] sm:$0x3] }
 0x45e   : > { %2674 = vmatprep.subr.bf16.mxu0 %v4376_v22  ;;  %v3139_v22 = vsub.s32 1, %v3134_v19 }
 0x461   : > { %2675 = vmatpush1.bf16.msra.mxu0 %v4374_v23  ;;  %v3145_v23 = vld [vmem:[%s5403_s12] sm:$0x3] }
 0x462   : > { %2676 = vmatprep.subr.bf16.mxu0 %v4379_v24  ;;  %v3136_v24 = vrot.slane %v3131_v30, %v3135_v21 }
 0x465   : > { %2677 = vmatpush1.bf16.msra.mxu0 %v4377_v25  ;;  %v3140_v25 = vrot.slane %v3131_v30, %v3139_v22 }
 0x466   : > { %2804 = vmatprep.subr.bf16.mxu0 %v4382_v26  ;;  %v3150_v26 = vrot.slane %v3145_v23, %v3135_v21 }
 0x468   : > { %2695 = vmatmul.mubr.bf16.vlgmr.msra.gmra.mrb[4].mxu0 %v2564_v29 }
 0x469   : > { %2805 = vmatpush1.bf16.msra.mxu0 %v4380_v28  ;;  %2836 = vmatprep.mubr.bf16.mxu0 %v4460_v20  ;;  %v3154_v28 = vrot.slane %v3145_v23, %v3139_v22 }
 0x46a   : > { %2806 = vmatprep.subr.bf16.mxu0 %v4385_v31 }
 0x46d   : > { %2807 = vmatpush1.bf16.msra.mxu0 %v4383_v32 }
 0x46e   : > { %2808 = vmatprep.subr.bf16.mxu0 %v4388_v33 }
 0x471   : > { %2809 = vmatpush1.bf16.msra.mxu0 %v4386_v34 }
 0x472   : > { %2810 = vmatprep.subr.bf16.mxu0 %v4391_v35 }
 0x475   : > { %2811 = vmatpush1.bf16.msra.mxu0 %v4389_v36 }
 0x476   : > { %2812 = vmatprep.subr.bf16.mxu0 %v4394_v37 }
 0x479   : > { %2813 = vmatpush1.bf16.msra.mxu0 %v4392_v38 }
 0x47a   : > { %2814 = vmatprep.subr.bf16.mxu0 %v4397_v39 }
 0x47d   : > { %2815 = vmatpush1.bf16.msra.mxu0 %v4395_v40 }
 0x47e   : > { %2816 = vmatprep.subr.bf16.mxu0 %v4400_v41 }
 0x481   : > { %2817 = vmatpush1.bf16.msra.mxu0 %v4398_v42 }
 0x482   : > { %2818 = vmatprep.subr.bf16.mxu0 %v4403_v43 }
 0x485   : > { %2819 = vmatpush1.bf16.msra.mxu0 %v4401_v44  ;;  %v4463_v44 = vmov 1966171168  }
 0x486   : > { %2946 = vmatprep.subr.bf16.mxu0 %v4406_v45  ;;  %v3182_v45 = vunpack.c.l.s4 %v4463_v44 }
 0x488   : > { %2837 = vmatmul.mubr.bf16.vlgmr.msra.gmra.mrb[4].mxu0 %v2706_v48 }
 0x489   : > { %2947 = vmatpush1.bf16.msra.mxu0 %v4404_v47  ;;  %2978 = vmatprep.mubr.bf16.mxu0 %v4460_v20 }
 0x48a   : > { %2948 = vmatprep.subr.bf16.mxu0 %v4409_v49 }
 0x48d   : > { %2949 = vmatpush1.bf16.msra.mxu0 %v4407_v50  ;;  %v3183_v50 = vunpack.c.0.s8 %v3182_v45 }
 0x48e   : > { %2950 = vmatprep.subr.bf16.mxu0 %v4412_v51 }
 0x491   : > { %2951 = vmatpush1.bf16.msra.mxu0 %v4410_v52 }
 0x492   : > { %2952 = vmatprep.subr.bf16.mxu0 %v4415_v53 }
 0x495   : > { %2953 = vmatpush1.bf16.msra.mxu0 %v4413_v54 }
 0x496   : > { %2954 = vmatprep.subr.bf16.mxu0 %v4418_v55  ;;  %v3186_v55 = vsub.s32 %v3183_v50, %v3134_v19 }
 0x499   : > { %2955 = vmatpush1.bf16.msra.mxu0 %v4416_v56 }
 0x49a   : > { %2956 = vmatprep.subr.bf16.mxu0 %v4421_v57 }
 0x49d   : > { %2957 = vmatpush1.bf16.msra.mxu0 %v4419_v58 }
 0x49e   : > { %2958 = vmatprep.subr.bf16.mxu0 %v4424_v59 }
 0x4a1   : > { %2959 = vmatpush1.bf16.msra.mxu0 %v4422_v60 }
 0x4a2   : > { %2960 = vmatprep.subr.bf16.mxu0 %v4427_v61 }
 0x4a5   : > { %2961 = vmatpush1.bf16.msra.mxu0 %v4425_v62 }
 0x4a6   : > { %3088 = vmatprep.subr.bf16.mxu0 %v4430_v63 }
 0x4a8   : > { %2979 = vmatmul.mubr.bf16.vlgmr.msra.gmra.mrb[4].mxu0 %v2848_v2 }
 0x4a9   : > { %3089 = vmatpush1.bf16.msra.mxu0 %v4428_v1  ;;  %3120 = vmatprep.mubr.bf16.mxu0 %v4460_v20  ;;  %v4437_v20 = vld [vmem:[%s5401_s10 + $0x330] ss:$8 sps:$4 sm:$0xff]  }
 0x4aa   : > { %3090 = vmatprep.subr.bf16.mxu0 %v4433_v3 }
 0x4ad   : > { %3091 = vmatpush1.bf16.msra.mxu0 %v4431_v4 }
 0x4ae   : > { %3092 = vmatprep.subr.bf16.mxu0 %v4436_v5 }
 0x4b1   : > { %3093 = vmatpush1.bf16.msra.mxu0 %v4434_v6 }
 0x4b2   : > { %3094 = vmatprep.subr.bf16.mxu0 %v4439_v7 }
 0x4b5   : > { %3095 = vmatpush1.bf16.msra.mxu0 %v4437_v20 }
 0x4b6   : > { %3096 = vmatprep.subr.bf16.mxu0 %v4442_v8 }
 0x4b9   : > { %3097 = vmatpush1.bf16.msra.mxu0 %v4440_v9 }
 0x4ba   : > { %3098 = vmatprep.subr.bf16.mxu0 %v4445_v10 }
 0x4bd   : > { %3099 = vmatpush1.bf16.msra.mxu0 %v4443_v11 }
 0x4be   : > { %3100 = vmatprep.subr.bf16.mxu0 %v4448_v12 }
 0x4c1   : > { %3101 = vmatpush1.bf16.msra.mxu0 %v4446_v13 }
 0x4c2   : > { %3102 = vmatprep.subr.bf16.mxu0 %v4451_v14 }
 0x4c5   : > { %3103 = vmatpush1.bf16.msra.mxu0 %v4449_v15 }
 0x4c8   : > { %3121 = vmatmul.mubr.bf16.vlgmr.msra.gmra.mrb[4].mxu0 %v2990_v17 }
 0x59b   : > { %v3122_v27 = vpop.f32.mrb[4].mxu0 }
 0x59c   : > { %v3143_v29 = vmul.f32 %v3136_v24, %v3122_v27  ;;  %v3124_v31 = vpop.f32.mrb[5].mxu0 }
 0x59d   : > { %v3144_v32 = vmul.f32 %v3140_v25, %v3124_v31  ;;  %v3126_v33 = vpop.f32.mrb[6].mxu0 }
 0x59e   : > { %v3157_v34 = vadd.f32 %v3150_v26, %v3143_v29  ;;  %v3127_v35 = vpop.f32.mrb[7].mxu0 }
 0x59f   : > { %v3158_v36 = vadd.f32 %v3154_v28, %v3144_v32 }
 0x5a0   : > { %v3159_v37 = vmax.f32 %v3157_v34, 0.0 }
 0x5a1   : > { %v3160_v38 = vmax.f32 %v3158_v36, 0.0 }
 0x5a2   : > { %v3162_v39 = vsel %vm3161_vm6, %v3159_v37, -inf }
 0x5a3   : > { %v3163_v40 = vrot.slane %v3162_v39, 4  ;;  %v3169_v41 = vsel %vm3161_vm6, %v3160_v38, -inf }
 0x5a4   : > { %v3170_v42 = vrot.slane %v3169_v41, 4 }
 0x5a5   : > { %v3164_v43 = vmax.f32 %v3162_v39, %v3163_v40 }
 0x5a6   : > { %v3171_v46 = vmax.f32 %v3169_v41, %v3170_v42 }
 0x5a7   : > { %v3165_v47 = vrot.slane %v3164_v43, 2 }
 0x5a8   : > { %v3172_v48 = vrot.slane %v3171_v46, 2 }
 0x5a9   : > { %v3166_v49 = vmax.f32 %v3164_v43, %v3165_v47 }
 0x5aa   : > { %v3173_v51 = vmax.f32 %v3171_v46, %v3172_v48 }
 0x5ab   : > { %v3167_v52 = vrot.slane %v3166_v49, 1 }
 0x5ac   : > { %v3174_v53 = vrot.slane %v3173_v51, 1 }
 0x5ad   : > { %v3168_v54 = vmax.f32 %v3166_v49, %v3167_v52 }
 0x5ae   : > { %v3175_v56 = vmax.f32 %v3173_v51, %v3174_v53 }
 0x5b0   : > { %v3180_v57 = vcombine.low %v3168_v54, %v3175_v56 }
 0x5b2   : > { %v3187_v58 = vrot.slane %v3180_v57, %v3186_v55 }
 0x5b4   : > { %v3194_v59 = vrot.slane %v3187_v58, %v3186_v55 }
 0x5b6   : > { %3200 = vst.msk [vmem:[%s438_s28] sm:$0x3] %vm3198_vm7, %v3194_v59 }
 0x5b7 PF: > { %s23_s25 = sadd.s32 1, %s4458_s25  }
 0x5b8   : > { %p20_p4 = scmp.ge.s32.totalorder %s23_s25, 4  }
 0x5ba   :  { %22 = sbr.rel (!%p20_p4) target bundleno = 1 (0x1), region = 120 }

// kernel: epoch_encoder_forward.2
= control target key start
LH: loop header
LB: loop body
LE: loop exit
PB: predicated region body
PF: predicated region fallthrough
CT: control target
= control target key end

     0   :  { %s6321_s25 = smov 0   ;;  %s7426_s0 = inlined_call_operand.vmem [shape: bf16[2,167,49], index: 0, kind: input, shape index: {}]   ;;  %s7427_s1 = inlined_call_operand.vmem [shape: bf16[49,64], index: 1, kind: input, shape index: {}]   ;;  %s7428_s2 = inlined_call_operand.vmem [shape: f32[1,64], index: 2, kind: input, shape index: {}]   ;;  %s7429_s3 = inlined_call_operand.vmem [shape: f32[1,64], index: 3, kind: input, shape index: {}]   ;;  %s7430_s4 = inlined_call_operand.vmem [shape: bf16[9,64,128], index: 4, kind: input, shape index: {}]   ;;  %s7431_s5 = inlined_call_operand.vmem [shape: f32[1,128], index: 5, kind: input, shape index: {}]   ;;  %s7432_s6 = inlined_call_operand.vmem [shape: f32[1,128], index: 6, kind: input, shape index: {}]   ;;  %s7433_s7 = inlined_call_operand.vmem [shape: bf16[9,128,128], index: 7, kind: input, shape index: {}]   ;;  %s7434_s8 = inlined_call_operand.vmem [shape: f32[1,128], index: 8, kind: input, shape index: {}]   ;;  %s7435_s9 = inlined_call_operand.vmem [shape: f32[1,128], index: 9, kind: input, shape index: {}]   ;;  %s7436_s10 = inlined_call_operand.vmem [shape: bf16[9,128,256], index: 10, kind: input, shape index: {}]   ;;  %s7437_s11 = inlined_call_operand.vmem [shape: f32[1,256], index: 11, kind: input, shape index: {}]   ;;  %s7438_s12 = inlined_call_operand.vmem [shape: f32[1,256], index: 12, kind: input, shape index: {}]   ;;  %s7439_s13 = inlined_call_operand.vmem [shape: f32[2,1,256], index: 13, kind: output, shape index: {}]  }
   0x1 LB: > { %s4631_s26 = sadd.s32 4294967295, %s6245_s25   ;;  %p4635_p0 = scmp.ge.s32.totalorder %s6245_s25, 1  ;;  %s6245_s25 = sphi %s6321_s25, %s23_s25  }
   0x2   : > { %p387_p1 = scmp.lt.s32.totalorder %s6245_s25, 3 }
   0x4   : > { %p388_p2 = pnand %p4635_p0, %p387_p1 }
   0x5   : > { %v5900_v0 = vld [vmem:[%s7427_s1] sm:$0xff] (!%p388_p2)   ;;  %v6247_v1 = vmov (!%p388_p2), 0.0   ;;  %vm576_vm0 = vcmask (!%p388_p2), 1040384   ;;  %v5901_v2 = vld [vmem:[%s7427_s1 + $0x8] sm:$0xff] (!%p388_p2)   ;;  %v5902_v3 = vld [vmem:[%s7427_s1 + $0x10] sm:$0xff] (!%p388_p2)   ;;  %v6248_v5 = vmov (!%p388_p2), 0  }
   0x6   : > { %391 = sbr.rel (%p388_p2) target bundleno = 1673 (0x689), region = 72  ;;  %5421 = vmatprep.subr.bf16.mxu0 (!%p388_p2), %v6247_v1  ;;  %1866 = vst [vmem:[#allocation3] sm:$0xff] (!%p388_p2), %v6247_v1  ;;  %1867 = vst [vmem:[#allocation3 + $0x8] sm:$0xff] (!%p388_p2), %v6247_v1  ;;  %v5903_v4 = vld [vmem:[%s7427_s1 + $0x18] ss:$0 sps:$4 sm:$0x11] (!%p388_p2)  }
   0x7   : > { %1868 = vst [vmem:[#allocation3 + $0x10] sm:$0xff] (!%p388_p2), %v6247_v1  ;;  %1869 = vst [vmem:[#allocation3 + $0x18] sm:$0xff] (!%p388_p2), %v6247_v1  ;;  %5422 = vmatpush3.bf16.msra.mxu0 (!%p388_p2), %v5900_v0  ;;  %v578_v6 = vsel (!%p388_p2), %vm576_vm0, 65535, %v6248_v5  ;;  %p430_p3 = scmp.lt.s32.totalorder (!%p388_p2), %s4631_s26, 1  ;;  %vm6249_vm1 = vmmov (!%p388_p2), 0   ;;  %vm542_vm2 = vcmask (!%p388_p2), 400384  }
   0x8   : > { %2978 = vst [vmem:[#allocation4] sm:$0xff] (!%p388_p2), %v6247_v1  ;;  %2979 = vst [vmem:[#allocation4 + $0x8] sm:$0xff] (!%p388_p2), %v6247_v1  ;;  %5423 = vmatprep.subr.bf16.mxu0 (!%p388_p2), %v6247_v1  ;;  %5429 = vmatprep.mubr.msk.bf16.mxu0 (!%p388_p2), %vm6249_vm1, %v6247_v1  ;;  %v580_v7 = vand.u32 (!%p388_p2), %v5903_v4, %v578_v6  ;;  %vm779_vm3 = vcmask (!%p388_p2), 523264   ;;  %v5915_v19 = vld [vmem:[%s7430_s4 + $0x20] sm:$0xff] (!%p388_p2)   ;;  %v5916_v20 = vld [vmem:[%s7430_s4 + $0x28] sm:$0xff] (!%p388_p2)   ;;  %vm784_vm4 = vcmask (!%p388_p2), 519168  }
   0x9   : > { %2980 = vst [vmem:[#allocation4 + $0x10] sm:$0xff] (!%p388_p2), %v6247_v1  ;;  %2981 = vst [vmem:[#allocation4 + $0x18] sm:$0xff] (!%p388_p2), %v6247_v1  ;;  %5473 = vmatprep.subr.bf16.mxu1 (!%p388_p2), %v5915_v19  ;;  %v5917_v21 = vld [vmem:[%s7430_s4 + $0x30] sm:$0xff] (!%p388_p2)   ;;  %v5918_v22 = vld [vmem:[%s7430_s4 + $0x38] sm:$0xff] (!%p388_p2)   ;;  %vm794_vm5 = vcmask (!%p388_p2), 523268   ;;  %vm792_vm6 = vcmask (!%p388_p2), 516096  }
   0xa   : > { %780 = vst.msk [vmem:[#allocation2] sm:$0xff] (!%p388_p2), %vm779_vm3, %v6247_v1  ;;  %781 = vst.msk [vmem:[#allocation2 + $0x8] sm:$0xff] (!%p388_p2), %vm779_vm3, %v6247_v1  ;;  %5474 = vmatpush3.bf16.msra.mxu1 (!%p388_p2), %v5915_v19  ;;  %v6429_v23 = vld [vmem:[%s7430_s4] sm:$0xff] (!%p388_p2)   ;;  %vm4445_vm7 = vcmask (!%p388_p2), 1041408   ;;  %vm4462_vm8 = vcmask (!%p388_p2), 1045506   ;;  %vm4479_vm9 = vcmask (!%p388_p2), 1047558  }
   0xb   : > { %5424 = vmatpush3.bf16.msra.mxu0 (!%p388_p2), %v5901_v2  ;;  %782 = vst.msk [vmem:[#allocation2 + $0x10] sm:$0xff] (!%p388_p2), %vm779_vm3, %v6247_v1  ;;  %783 = vst.msk [vmem:[#allocation2 + $0x18] sm:$0xff] (!%p388_p2), %vm779_vm3, %v6247_v1  ;;  %5475 = vmatprep.subr.bf16.mxu1 (!%p388_p2), %v5916_v20  ;;  %v6435_v24 = vld [vmem:[%s7428_s2] ss:$0 sm:$0xff] (!%p388_p2)  ;;  %vm4536_vm10 = vcmask (!%p388_p2), 1044482  }
   0xc   : > { %5425 = vmatprep.subr.bf16.mxu0 (!%p388_p2), %v6247_v1  ;;  %v6440_v26 = vld [vmem:[%s7429_s3] ss:$0 sm:$0xff] (!%p388_p2) }
   0xd   : > { %s7441_s26 = smov (!%p430_p3, %s4631_s26), 1 }
   0xe   : > { %s5887_s18 = smul.u32 84, %s7441_s26  ;;  %5476 = vmatpush3.bf16.msra.mxu1 %v5916_v20  ;;  %s4637_s17 = sshll.u32 %s7441_s26, 1 }
   0xf   : > { %5426 = vmatpush3.bf16.msra.mxu0 %v5902_v3  ;;  %5477 = vmatprep.subr.bf16.mxu1 %v5917_v21  ;;  %s438_s20 = scalar_lea.vmem %s7439_s13, %s4637_s17 }
  0x10   : > { %s6361_s21 = scalar_lea.vmem %s7426_s0, %s5887_s18  ;;  %5427 = vmatprep.subr.bf16.mxu0 %v6247_v1 }
  0x11   : > { %v5904_v8 = vld [vmem:[%s6361_s21] sm:$0xff]   ;;  %v5905_v9 = vld [vmem:[%s6361_s21 + $0x8] sm:$0xff]   ;;  %v5906_v10 = vld [vmem:[%s6361_s21 + $0x10] sm:$0xff]  }
  0x12   : > { %v5907_v11 = vld [vmem:[%s6361_s21 + $0x18] sm:$0xff]   ;;  %v5908_v12 = vld [vmem:[%s6361_s21 + $0x20] sm:$0xff]   ;;  %v5909_v13 = vld [vmem:[%s6361_s21 + $0x28] sm:$0xff]   ;;  %5478 = vmatpush3.bf16.msra.mxu1 %v5917_v21 }
  0x13   : > { %5428 = vmatpush3.bf16.msra.mxu0 %v580_v7  ;;  %v5910_v14 = vld [vmem:[%s6361_s21 + $0x30] sm:$0xff]   ;;  %v5911_v15 = vld [vmem:[%s6361_s21 + $0x38] sm:$0xff]   ;;  %v5912_v16 = vld [vmem:[%s6361_s21 + $0x40] sm:$0xff]   ;;  %5479 = vmatprep.subr.bf16.mxu1 %v5918_v22 }
  0x14   : > { %v5913_v17 = vld [vmem:[%s6361_s21 + $0x48] sm:$0xff]   ;;  %v5914_v18 = vld [vmem:[%s6361_s21 + $0x50] ss:$0 sps:$4 sm:$0xff]  }
  0x16   : > { %5430 = vmatmul.mubr.msk.bf16.vlgmr.msra.gmra.mrb[0].mxu0 %vm542_vm2, %v5904_v8  ;;  %5480 = vmatpush3.bf16.msra.mxu1 %v5918_v22 }
  0x17   : > { %5433 = vmatprep.mubr.msk.bf16.mxu0 %vm6249_vm1, %v6247_v1  ;;  %5485 = vmatprep.subr.bf16.mxu1 %v6429_v23 }
  0x1e   : > { %5434 = vmatmul.mubr.msk.bf16.gmra.mrb[4].mxu0 %vm542_vm2, %v5905_v9 }
  0x1f   : > { %5437 = vmatprep.mubr.msk.bf16.mxu0 %vm6249_vm1, %v6247_v1 }
  0x26   : > { %5438 = vmatmul.mubr.msk.bf16.gmra.mrb[8].mxu0 %vm542_vm2, %v5906_v10 }
  0x27   : > { %5441 = vmatprep.mubr.msk.bf16.mxu0 %vm6249_vm1, %v6247_v1 }
  0x2e   : > { %5442 = vmatmul.mubr.msk.bf16.gmra.mrb[12].mxu0 %vm542_vm2, %v5907_v11 }
  0x2f   : > { %5445 = vmatprep.mubr.msk.bf16.mxu0 %vm6249_vm1, %v6247_v1 }
  0x36   : > { %5446 = vmatmul.mubr.msk.bf16.gmra.mrb[16].mxu0 %vm542_vm2, %v5908_v12 }
  0x37   : > { %5449 = vmatprep.mubr.msk.bf16.mxu0 %vm6249_vm1, %v6247_v1 }
  0x3e   : > { %5450 = vmatmul.mubr.msk.bf16.gmra.mrb[20].mxu0 %vm542_vm2, %v5909_v13 }
  0x3f   : > { %5453 = vmatprep.mubr.msk.bf16.mxu0 %vm6249_vm1, %v6247_v1 }
  0x46   : > { %5454 = vmatmul.mubr.msk.bf16.gmra.mrb[24].mxu0 %vm542_vm2, %v5910_v14 }
  0x47   : > { %5457 = vmatprep.mubr.msk.bf16.mxu0 %vm6249_vm1, %v6247_v1 }
  0x4e   : > { %5458 = vmatmul.mubr.msk.bf16.gmra.mrb[28].mxu0 %vm542_vm2, %v5911_v15 }
  0x4f   : > { %5461 = vmatprep.mubr.msk.bf16.mxu0 %vm6249_vm1, %v6247_v1 }
  0x56   : > { %5462 = vmatmul.mubr.msk.bf16.gmra.mrb[32].mxu0 %vm542_vm2, %v5912_v16 }
  0x57   : > { %5465 = vmatprep.mubr.msk.bf16.mxu0 %vm6249_vm1, %v6247_v1 }
  0x5e   : > { %5466 = vmatmul.mubr.msk.bf16.gmra.mrb[36].mxu0 %vm542_vm2, %v5913_v17 }
  0x5f   : > { %5469 = vmatprep.mubr.msk.bf16.mxu0 %vm6249_vm1, %v6247_v1 }
  0x66   : > { %5470 = vmatmul.mubr.msk.bf16.gmra.mrb[40].mxu0 %vm542_vm2, %v5914_v18 }
  0xe9   : > { %v616_v25 = vpop.f32.mrb[0].mxu0 }
  0xea   : > { %v709_v27 = vmul.f32 %v6435_v24, %v616_v25  ;;  %v5431_v28 = vpop.f32.mrb[1].mxu0 }
  0xeb   : > { %v619_v29 = vpop.f32.mrb[2].mxu0 }
  0xec   : > { %v737_v30 = vadd.f32 %v6440_v26, %v709_v27  ;;  %v710_v31 = vmul.f32 %v6435_v24, %v619_v29  ;;  %v5432_v32 = vpop.f32.mrb[3].mxu0 }
  0xee   : > { %v758_v33 = vmax.f32 %v737_v30, 0.0  ;;  %v738_v34 = vadd.f32 %v6440_v26, %v710_v31 }
  0xf0   : > { %v785_v35 = vsel %vm784_vm4, %v758_v33, -inf  ;;  %v759_v36 = vmax.f32 %v738_v34, 0.0  ;;  %v795_v39 = vsel %vm794_vm5, %v758_v33, -inf }
  0xf1   : > { %v786_v37 = vrot.slane %v785_v35, 4  ;;  %v624_v38 = vpop.f32.mrb[4].mxu0 }
  0xf2   : > { %v796_v40 = vsel %vm784_vm4, %v759_v36, -inf  ;;  %v711_v41 = vmul.f32 %v6435_v24, %v624_v38  ;;  %v5435_v42 = vpop.f32.mrb[5].mxu0  ;;  %v805_v55 = vsel %vm794_vm5, %v759_v36, -inf }
  0xf3   : > { %v787_v43 = vmax.f32 %v785_v35, %v786_v37  ;;  %v797_v44 = vmax.f32 %v795_v39, %v796_v40  ;;  %v627_v45 = vpop.f32.mrb[6].mxu0 }
  0xf4   : > { %v739_v46 = vadd.f32 %v6440_v26, %v711_v41  ;;  %v712_v47 = vmul.f32 %v6435_v24, %v627_v45  ;;  %v5436_v48 = vpop.f32.mrb[7].mxu0 }
  0xf5   : > { %v788_v49 = vrot.slane %v787_v43, 2  ;;  %v798_v50 = vrot.slane %v797_v44, 4 }
  0xf6   : > { %v760_v51 = vmax.f32 %v739_v46, 0.0  ;;  %v740_v52 = vadd.f32 %v6440_v26, %v712_v47 }
  0xf7   : > { %v789_v53 = vmax.f32 %v787_v43, %v788_v49  ;;  %v799_v54 = vmax.f32 %v797_v44, %v798_v50 }
  0xf8   : > { %v806_v56 = vsel %vm784_vm4, %v760_v51, -inf  ;;  %v761_v57 = vmax.f32 %v740_v52, 0.0  ;;  %v815_v62 = vsel %vm794_vm5, %v760_v51, -inf }
  0xf9   : > { %v790_v58 = vrot.slane %v789_v53, 1  ;;  %v800_v59 = vrot.slane %v799_v54, 2  ;;  %v807_v60 = vmax.f32 %v805_v55, %v806_v56  ;;  %v632_v61 = vpop.f32.mrb[8].mxu0 }
  0xfa   : > { %v816_v63 = vsel %vm784_vm4, %v761_v57, -inf  ;;  %v713_v0 = vmul.f32 %v6435_v24, %v632_v61  ;;  %v5439_v1 = vpop.f32.mrb[9].mxu0  ;;  %v825_v19 = vsel %vm794_vm5, %v761_v57, -inf }
  0xfb   : > { %v791_v2 = vmax.f32 %v789_v53, %v790_v58  ;;  %v801_v3 = vmax.f32 %v799_v54, %v800_v59  ;;  %v808_v4 = vrot.slane %v807_v60, 4  ;;  %v817_v6 = vmax.f32 %v815_v62, %v816_v63  ;;  %v635_v7 = vpop.f32.mrb[10].mxu0 }
  0xfc   : > { %v741_v8 = vadd.f32 %v6440_v26, %v713_v0  ;;  %v714_v9 = vmul.f32 %v6435_v24, %v635_v7  ;;  %v5440_v10 = vpop.f32.mrb[11].mxu0 }
  0xfd   : > { %793 = vst.msk [vmem:[#allocation2 + $0x4] sm:$0x1] %vm792_vm6, %v791_v2  ;;  %v802_v11 = vrot.slane %v801_v3, 1  ;;  %v809_v12 = vmax.f32 %v807_v60, %v808_v4  ;;  %v818_v13 = vrot.slane %v817_v6, 4 }
  0xfe   : > { %v762_v14 = vmax.f32 %v741_v8, 0.0  ;;  %v742_v15 = vadd.f32 %v6440_v26, %v714_v9 }
  0xff   : > { %v803_v16 = vmax.f32 %v801_v3, %v802_v11  ;;  %v810_v17 = vrot.slane %v809_v12, 2  ;;  %v819_v18 = vmax.f32 %v817_v6, %v818_v13 }
 0x100   : > { %v826_v20 = vsel %vm784_vm4, %v762_v14, -inf  ;;  %v763_v21 = vmax.f32 %v742_v15, 0.0  ;;  %v835_v29 = vsel %vm794_vm5, %v762_v14, -inf }
 0x101   : > { %804 = vst.msk [vmem:[#allocation2 + $0x5] sm:$0x1] %vm792_vm6, %v803_v16  ;;  %v811_v22 = vmax.f32 %v809_v12, %v810_v17  ;;  %v820_v25 = vrot.slane %v819_v18, 2  ;;  %v827_v27 = vmax.f32 %v825_v19, %v826_v20  ;;  %v640_v28 = vpop.f32.mrb[12].mxu0 }
 0x102   : > { %v836_v30 = vsel %vm784_vm4, %v763_v21, -inf  ;;  %v715_v31 = vmul.f32 %v6435_v24, %v640_v28  ;;  %v5443_v32 = vpop.f32.mrb[13].mxu0  ;;  %v845_v50 = vsel %vm794_vm5, %v763_v21, -inf }
 0x103   : > { %v812_v33 = vrot.slane %v811_v22, 1  ;;  %v821_v34 = vmax.f32 %v819_v18, %v820_v25  ;;  %v828_v35 = vrot.slane %v827_v27, 4  ;;  %v837_v36 = vmax.f32 %v835_v29, %v836_v30  ;;  %v643_v37 = vpop.f32.mrb[14].mxu0 }
 0x104   : > { %v743_v38 = vadd.f32 %v6440_v26, %v715_v31  ;;  %v716_v39 = vmul.f32 %v6435_v24, %v643_v37  ;;  %v5444_v40 = vpop.f32.mrb[15].mxu0 }
 0x105   : > { %v813_v41 = vmax.f32 %v811_v22, %v812_v33  ;;  %v822_v42 = vrot.slane %v821_v34, 1  ;;  %v829_v43 = vmax.f32 %v827_v27, %v828_v35  ;;  %v838_v44 = vrot.slane %v837_v36, 4 }
 0x106   : > { %v764_v45 = vmax.f32 %v743_v38, 0.0  ;;  %v744_v46 = vadd.f32 %v6440_v26, %v716_v39 }
 0x107   : > { %814 = vst.msk [vmem:[#allocation2 + $0x6] sm:$0x1] %vm792_vm6, %v813_v41  ;;  %v823_v47 = vmax.f32 %v821_v34, %v822_v42  ;;  %v830_v48 = vrot.slane %v829_v43, 2  ;;  %v839_v49 = vmax.f32 %v837_v36, %v838_v44 }
 0x108   : > { %v846_v51 = vsel %vm784_vm4, %v764_v45, -inf  ;;  %v765_v52 = vmax.f32 %v744_v46, 0.0  ;;  %v855_v57 = vsel %vm794_vm5, %v764_v45, -inf }
 0x109   : > { %824 = vst.msk [vmem:[#allocation2 + $0x7] sm:$0x1] %vm792_vm6, %v823_v47  ;;  %v831_v53 = vmax.f32 %v829_v43, %v830_v48  ;;  %v840_v54 = vrot.slane %v839_v49, 2  ;;  %v847_v55 = vmax.f32 %v845_v50, %v846_v51  ;;  %v648_v56 = vpop.f32.mrb[16].mxu0 }
 0x10a   : > { %v856_v58 = vsel %vm784_vm4, %v765_v52, -inf  ;;  %v717_v59 = vmul.f32 %v6435_v24, %v648_v56  ;;  %v5447_v60 = vpop.f32.mrb[17].mxu0  ;;  %v865_v15 = vsel %vm794_vm5, %v765_v52, -inf }
 0x10b   : > { %v832_v61 = vrot.slane %v831_v53, 1  ;;  %v841_v62 = vmax.f32 %v839_v49, %v840_v54  ;;  %v848_v63 = vrot.slane %v847_v55, 4  ;;  %v857_v0 = vmax.f32 %v855_v57, %v856_v58  ;;  %v651_v1 = vpop.f32.mrb[18].mxu0 }
 0x10c   : > { %v745_v2 = vadd.f32 %v6440_v26, %v717_v59  ;;  %v718_v3 = vmul.f32 %v6435_v24, %v651_v1  ;;  %v5448_v4 = vpop.f32.mrb[19].mxu0 }
 0x10d   : > { %v833_v6 = vmax.f32 %v831_v53, %v832_v61  ;;  %v842_v7 = vrot.slane %v841_v62, 1  ;;  %v849_v8 = vmax.f32 %v847_v55, %v848_v63  ;;  %v858_v9 = vrot.slane %v857_v0, 4 }
 0x10e   : > { %v766_v10 = vmax.f32 %v745_v2, 0.0  ;;  %v746_v11 = vadd.f32 %v6440_v26, %v718_v3 }
 0x10f   : > { %834 = vst.msk [vmem:[#allocation2 + $0x8] sm:$0x1] %vm792_vm6, %v833_v6  ;;  %v843_v12 = vmax.f32 %v841_v62, %v842_v7  ;;  %v850_v13 = vrot.slane %v849_v8, 2  ;;  %v859_v14 = vmax.f32 %v857_v0, %v858_v9 }
 0x110   : > { %v866_v16 = vsel %vm784_vm4, %v766_v10, -inf  ;;  %v767_v17 = vmax.f32 %v746_v11, 0.0  ;;  %v875_v22 = vsel %vm794_vm5, %v766_v10, -inf }
 0x111   : > { %844 = vst.msk [vmem:[#allocation2 + $0x9] sm:$0x1] %vm792_vm6, %v843_v12  ;;  %v851_v18 = vmax.f32 %v849_v8, %v850_v13  ;;  %v860_v19 = vrot.slane %v859_v14, 2  ;;  %v867_v20 = vmax.f32 %v865_v15, %v866_v16  ;;  %v656_v21 = vpop.f32.mrb[20].mxu0 }
 0x112   : > { %v876_v25 = vsel %vm784_vm4, %v767_v17, -inf  ;;  %v719_v27 = vmul.f32 %v6435_v24, %v656_v21  ;;  %v5451_v28 = vpop.f32.mrb[21].mxu0  ;;  %v885_v46 = vsel %vm794_vm5, %v767_v17, -inf }
 0x113   : > { %v852_v29 = vrot.slane %v851_v18, 1  ;;  %v861_v30 = vmax.f32 %v859_v14, %v860_v19  ;;  %v868_v31 = vrot.slane %v867_v20, 4  ;;  %v877_v32 = vmax.f32 %v875_v22, %v876_v25  ;;  %v659_v33 = vpop.f32.mrb[22].mxu0 }
 0x114   : > { %v747_v34 = vadd.f32 %v6440_v26, %v719_v27  ;;  %v720_v35 = vmul.f32 %v6435_v24, %v659_v33  ;;  %v5452_v36 = vpop.f32.mrb[23].mxu0 }
 0x115   : > { %v853_v37 = vmax.f32 %v851_v18, %v852_v29  ;;  %v862_v38 = vrot.slane %v861_v30, 1  ;;  %v869_v39 = vmax.f32 %v867_v20, %v868_v31  ;;  %v878_v40 = vrot.slane %v877_v32, 4 }
 0x116   : > { %v768_v41 = vmax.f32 %v747_v34, 0.0  ;;  %v748_v42 = vadd.f32 %v6440_v26, %v720_v35 }
 0x117   : > { %854 = vst.msk [vmem:[#allocation2 + $0xa] sm:$0x1] %vm792_vm6, %v853_v37  ;;  %v863_v43 = vmax.f32 %v861_v30, %v862_v38  ;;  %v870_v44 = vrot.slane %v869_v39, 2  ;;  %v879_v45 = vmax.f32 %v877_v32, %v878_v40 }
 0x118   : > { %v886_v47 = vsel %vm784_vm4, %v768_v41, -inf  ;;  %v769_v48 = vmax.f32 %v748_v42, 0.0  ;;  %v895_v53 = vsel %vm794_vm5, %v768_v41, -inf }
 0x119   : > { %864 = vst.msk [vmem:[#allocation2 + $0xb] sm:$0x1] %vm792_vm6, %v863_v43  ;;  %v871_v49 = vmax.f32 %v869_v39, %v870_v44  ;;  %v880_v50 = vrot.slane %v879_v45, 2  ;;  %v887_v51 = vmax.f32 %v885_v46, %v886_v47  ;;  %v664_v52 = vpop.f32.mrb[24].mxu0 }
 0x11a   : > { %v896_v54 = vsel %vm784_vm4, %v769_v48, -inf  ;;  %v721_v55 = vmul.f32 %v6435_v24, %v664_v52  ;;  %v5455_v56 = vpop.f32.mrb[25].mxu0  ;;  %v905_v11 = vsel %vm794_vm5, %v769_v48, -inf }
 0x11b   : > { %v872_v57 = vrot.slane %v871_v49, 1  ;;  %v881_v58 = vmax.f32 %v879_v45, %v880_v50  ;;  %v888_v59 = vrot.slane %v887_v51, 4  ;;  %v897_v60 = vmax.f32 %v895_v53, %v896_v54  ;;  %v667_v61 = vpop.f32.mrb[26].mxu0 }
 0x11c   : > { %v749_v62 = vadd.f32 %v6440_v26, %v721_v55  ;;  %v722_v63 = vmul.f32 %v6435_v24, %v667_v61  ;;  %v5456_v0 = vpop.f32.mrb[27].mxu0 }
 0x11d   : > { %v873_v1 = vmax.f32 %v871_v49, %v872_v57  ;;  %v882_v2 = vrot.slane %v881_v58, 1  ;;  %v889_v3 = vmax.f32 %v887_v51, %v888_v59  ;;  %v898_v4 = vrot.slane %v897_v60, 4 }
 0x11e   : > { %v770_v6 = vmax.f32 %v749_v62, 0.0  ;;  %v750_v7 = vadd.f32 %v6440_v26, %v722_v63 }
 0x11f   : > { %874 = vst.msk [vmem:[#allocation2 + $0xc] sm:$0x1] %vm792_vm6, %v873_v1  ;;  %v883_v8 = vmax.f32 %v881_v58, %v882_v2  ;;  %v890_v9 = vrot.slane %v889_v3, 2  ;;  %v899_v10 = vmax.f32 %v897_v60, %v898_v4 }
 0x120   : > { %v906_v12 = vsel %vm784_vm4, %v770_v6, -inf  ;;  %v771_v13 = vmax.f32 %v750_v7, 0.0  ;;  %v915_v18 = vsel %vm794_vm5, %v770_v6, -inf }
 0x121   : > { %884 = vst.msk [vmem:[#allocation2 + $0xd] sm:$0x1] %vm792_vm6, %v883_v8  ;;  %v891_v14 = vmax.f32 %v889_v3, %v890_v9  ;;  %v900_v15 = vrot.slane %v899_v10, 2  ;;  %v907_v16 = vmax.f32 %v905_v11, %v906_v12  ;;  %v672_v17 = vpop.f32.mrb[28].mxu0 }
 0x122   : > { %v916_v19 = vsel %vm784_vm4, %v771_v13, -inf  ;;  %v723_v20 = vmul.f32 %v6435_v24, %v672_v17  ;;  %v5459_v21 = vpop.f32.mrb[29].mxu0  ;;  %v925_v42 = vsel %vm794_vm5, %v771_v13, -inf }
 0x123   : > { %v892_v22 = vrot.slane %v891_v14, 1  ;;  %v901_v25 = vmax.f32 %v899_v10, %v900_v15  ;;  %v908_v27 = vrot.slane %v907_v16, 4  ;;  %v917_v28 = vmax.f32 %v915_v18, %v916_v19  ;;  %v675_v29 = vpop.f32.mrb[30].mxu0 }
 0x124   : > { %v751_v30 = vadd.f32 %v6440_v26, %v723_v20  ;;  %v724_v31 = vmul.f32 %v6435_v24, %v675_v29  ;;  %v5460_v32 = vpop.f32.mrb[31].mxu0 }
 0x125   : > { %v893_v33 = vmax.f32 %v891_v14, %v892_v22  ;;  %v902_v34 = vrot.slane %v901_v25, 1  ;;  %v909_v35 = vmax.f32 %v907_v16, %v908_v27  ;;  %v918_v36 = vrot.slane %v917_v28, 4 }
 0x126   : > { %v772_v37 = vmax.f32 %v751_v30, 0.0  ;;  %v752_v38 = vadd.f32 %v6440_v26, %v724_v31 }
 0x127   : > { %894 = vst.msk [vmem:[#allocation2 + $0xe] sm:$0x1] %vm792_vm6, %v893_v33  ;;  %v903_v39 = vmax.f32 %v901_v25, %v902_v34  ;;  %v910_v40 = vrot.slane %v909_v35, 2  ;;  %v919_v41 = vmax.f32 %v917_v28, %v918_v36 }
 0x128   : > { %v926_v43 = vsel %vm784_vm4, %v772_v37, -inf  ;;  %v773_v44 = vmax.f32 %v752_v38, 0.0  ;;  %v935_v49 = vsel %vm794_vm5, %v772_v37, -inf }
 0x129   : > { %904 = vst.msk [vmem:[#allocation2 + $0xf] sm:$0x1] %vm792_vm6, %v903_v39  ;;  %v911_v45 = vmax.f32 %v909_v35, %v910_v40  ;;  %v920_v46 = vrot.slane %v919_v41, 2  ;;  %v927_v47 = vmax.f32 %v925_v42, %v926_v43  ;;  %v680_v48 = vpop.f32.mrb[32].mxu0  ;;  %v1008_v35 = vld [vmem:[#allocation2 + $0x1] sm:$0xff] }
 0x12a   : > { %v936_v50 = vsel %vm784_vm4, %v773_v44, -inf  ;;  %v725_v51 = vmul.f32 %v6435_v24, %v680_v48  ;;  %v5463_v52 = vpop.f32.mrb[33].mxu0  ;;  %v945_v7 = vsel %vm794_vm5, %v773_v44, -inf }
 0x12b   : > { %v912_v53 = vrot.slane %v911_v45, 1  ;;  %v921_v54 = vmax.f32 %v919_v41, %v920_v46  ;;  %v928_v55 = vrot.slane %v927_v47, 4  ;;  %v937_v56 = vmax.f32 %v935_v49, %v936_v50  ;;  %v683_v57 = vpop.f32.mrb[34].mxu0 }
 0x12c   : > { %v753_v58 = vadd.f32 %v6440_v26, %v725_v51  ;;  %v726_v59 = vmul.f32 %v6435_v24, %v683_v57  ;;  %v5464_v60 = vpop.f32.mrb[35].mxu0 }
 0x12d   : > { %v913_v61 = vmax.f32 %v911_v45, %v912_v53  ;;  %v922_v62 = vrot.slane %v921_v54, 1  ;;  %v929_v63 = vmax.f32 %v927_v47, %v928_v55  ;;  %v938_v0 = vrot.slane %v937_v56, 4 }
 0x12e   : > { %v774_v1 = vmax.f32 %v753_v58, 0.0  ;;  %v754_v2 = vadd.f32 %v6440_v26, %v726_v59 }
 0x12f   : > { %914 = vst.msk [vmem:[#allocation2 + $0x10] sm:$0x1] %vm792_vm6, %v913_v61  ;;  %v923_v3 = vmax.f32 %v921_v54, %v922_v62  ;;  %v930_v4 = vrot.slane %v929_v63, 2  ;;  %v939_v6 = vmax.f32 %v937_v56, %v938_v0 }
 0x130   : > { %v946_v8 = vsel %vm784_vm4, %v774_v1, -inf  ;;  %v775_v9 = vmax.f32 %v754_v2, 0.0  ;;  %v955_v14 = vsel %vm794_vm5, %v774_v1, -inf }
 0x131   : > { %924 = vst.msk [vmem:[#allocation2 + $0x11] sm:$0x1] %vm792_vm6, %v923_v3  ;;  %v931_v10 = vmax.f32 %v929_v63, %v930_v4  ;;  %v940_v11 = vrot.slane %v939_v6, 2  ;;  %v947_v12 = vmax.f32 %v945_v7, %v946_v8  ;;  %v688_v13 = vpop.f32.mrb[36].mxu0 }
 0x132   : > { %v956_v15 = vsel %vm784_vm4, %v775_v9, -inf  ;;  %v727_v16 = vmul.f32 %v6435_v24, %v688_v13  ;;  %v5467_v17 = vpop.f32.mrb[37].mxu0  ;;  %v965_v41 = vsel %vm794_vm5, %v775_v9, -inf }
 0x133   : > { %v932_v18 = vrot.slane %v931_v10, 1  ;;  %v941_v19 = vmax.f32 %v939_v6, %v940_v11  ;;  %v948_v20 = vrot.slane %v947_v12, 4  ;;  %v957_v21 = vmax.f32 %v955_v14, %v956_v15  ;;  %v691_v22 = vpop.f32.mrb[38].mxu0  ;;  %v6545_v15 = vld [vmem:[#allocation2 + $0x8] sm:$0xff] }
 0x134   : > { %v755_v25 = vadd.f32 %v6440_v26, %v727_v16  ;;  %v728_v27 = vmul.f32 %v6435_v24, %v691_v22  ;;  %v5468_v28 = vpop.f32.mrb[39].mxu0 }
 0x135   : > { %v933_v29 = vmax.f32 %v931_v10, %v932_v18  ;;  %v942_v30 = vrot.slane %v941_v19, 1  ;;  %v949_v31 = vmax.f32 %v947_v12, %v948_v20  ;;  %v958_v32 = vrot.slane %v957_v21, 4  ;;  %v5920_v20 = vld [vmem:[%s7430_s4 + $0x8] sm:$0xff]  }
 0x136   : > { %v776_v33 = vmax.f32 %v755_v25, 0.0  ;;  %v756_v34 = vadd.f32 %v6440_v26, %v728_v27  ;;  %v1009_v36 = vld [vmem:[#allocation2 + $0x9] sm:$0xff]  ;;  %v5951_v25 = vld [vmem:[%s7433_s7 + $0x40] sm:$0xff]  }
 0x137   : > { %934 = vst.msk [vmem:[#allocation2 + $0x12] sm:$0x1] %vm792_vm6, %v933_v29  ;;  %v943_v37 = vmax.f32 %v941_v19, %v942_v30  ;;  %v950_v38 = vrot.slane %v949_v31, 2  ;;  %v959_v39 = vmax.f32 %v957_v21, %v958_v32  ;;  %v1011_v40 = vpack.c.bf16 %v1009_v36, %v1008_v35  ;;  %v995_v19 = vld [vmem:[#allocation2] sm:$0xff]  ;;  %v5952_v27 = vld [vmem:[%s7433_s7 + $0x48] sm:$0xff]   ;;  %v5921_v29 = vld [vmem:[%s7430_s4 + $0x10] sm:$0xff]   ;;  %5581 = vmatprep.subr.bf16.mxu0 %v5951_v25 }
 0x138   : > { %v966_v42 = vsel %vm784_vm4, %v776_v33, -inf  ;;  %v975_v43 = vsel %vm794_vm5, %v776_v33, -inf  ;;  %v777_v44 = vmax.f32 %v756_v34, 0.0  ;;  %v998_v21 = vpack.c.bf16 %v6545_v15, %v995_v19  ;;  %5582 = vmatpush3.bf16.msra.mxu0 %v5951_v25  ;;  %v5953_v30 = vld [vmem:[%s7433_s7 + $0x50] sm:$0xff]   ;;  %v5923_v32 = vld [vmem:[%s7430_s4 + $0x40] sm:$0xff]  }
 0x139   : > { %944 = vst.msk [vmem:[#allocation2 + $0x13] sm:$0x1] %vm792_vm6, %v943_v37  ;;  %v951_v45 = vmax.f32 %v949_v31, %v950_v38  ;;  %v960_v46 = vrot.slane %v959_v39, 2  ;;  %v967_v47 = vmax.f32 %v965_v41, %v966_v42  ;;  %v696_v48 = vpop.f32.mrb[40].mxu0  ;;  %5481 = vmatprep.mubr.msk.bf16.mxu1 %vm779_vm3, %v1011_v40  ;;  %5583 = vmatprep.subr.bf16.mxu0 %v5952_v27  ;;  %v5954_v31 = vld [vmem:[%s7433_s7 + $0x58] sm:$0xff]   ;;  %v1179_v34 = vld [vmem:[#allocation2 + $0xa] sm:$0xff] }
 0x13a   : > { %v976_v49 = vsel %vm784_vm4, %v777_v44, -inf  ;;  %v729_v50 = vmul.f32 %v6435_v24, %v696_v48  ;;  %v5471_v51 = vpop.f32.mrb[41].mxu0  ;;  %v985_v63 = vsel %vm794_vm5, %v777_v44, -inf  ;;  %v5955_v35 = vld [vmem:[%s7433_s7 + $0x60] sm:$0xff]   ;;  %v5924_v38 = vld [vmem:[%s7430_s4 + $0x48] sm:$0xff]   ;;  %v5925_v41 = vld [vmem:[%s7430_s4 + $0x50] sm:$0xff]  }
 0x13b   : > { %v952_v52 = vrot.slane %v951_v45, 1  ;;  %v961_v53 = vmax.f32 %v959_v39, %v960_v46  ;;  %v968_v54 = vrot.slane %v967_v47, 4  ;;  %v977_v55 = vmax.f32 %v975_v43, %v976_v49  ;;  %v699_v56 = vpop.f32.mrb[42].mxu0  ;;  %v1178_v37 = vld [vmem:[#allocation2 + $0x2] sm:$0xff]  ;;  %v5957_v42 = vld [vmem:[%s7433_s7 + $0x70] sm:$0xff]   ;;  %v5926_v43 = vld [vmem:[%s7430_s4 + $0x58] sm:$0xff]  }
 0x13c   : > { %v757_v57 = vadd.f32 %v6440_v26, %v729_v50  ;;  %v5472_v58 = vpop.f32.mrb[43].mxu0  ;;  %5584 = vmatpush3.bf16.msra.mxu0 %v5952_v27  ;;  %v1181_v39 = vpack.c.bf16 %v1179_v34, %v1178_v37  ;;  %v5956_v40 = vld [vmem:[%s7433_s7 + $0x68] sm:$0xff]   ;;  %v5927_v44 = vld [vmem:[%s7430_s4 + $0x60] sm:$0xff]   ;;  %v5929_v51 = vld [vmem:[%s7430_s4 + $0x70] sm:$0xff]  }
 0x13d   : > { %v953_v59 = vmax.f32 %v951_v45, %v952_v52  ;;  %v962_v60 = vrot.slane %v961_v53, 1  ;;  %v969_v61 = vmax.f32 %v967_v47, %v968_v54  ;;  %v978_v62 = vrot.slane %v977_v55, 4  ;;  %5585 = vmatprep.subr.bf16.mxu0 %v5953_v30  ;;  %v1273_v48 = vld [vmem:[#allocation2 + $0x3] sm:$0xff]  ;;  %v5930_v52 = vld [vmem:[%s7430_s4 + $0x78] sm:$0xff]   ;;  %v5945_v25 = vld [vmem:[%s7430_s4 + $0xf0] sm:$0xff]  }
 0x13e   : > { %v778_v0 = vmax.f32 %v757_v57, 0.0  ;;  %v1274_v46 = vld [vmem:[#allocation2 + $0xb] sm:$0xff]  ;;  %v5946_v27 = vld [vmem:[%s7430_s4 + $0xf8] sm:$0xff]   ;;  %v5959_v37 = vld [vmem:[%s7433_s7] sm:$0xff]  }
 0x13f   : > { %954 = vst.msk [vmem:[#allocation2 + $0x14] sm:$0x1] %vm792_vm6, %v953_v59  ;;  %v963_v1 = vmax.f32 %v961_v53, %v962_v60  ;;  %v970_v24 = vrot.slane %v969_v61, 2  ;;  %v979_v2 = vmax.f32 %v977_v55, %v978_v62  ;;  %v5928_v49 = vld [vmem:[%s7430_s4 + $0x68] sm:$0xff]   ;;  %v1276_v50 = vpack.c.bf16 %v1274_v46, %v1273_v48  ;;  %v5931_v53 = vld [vmem:[%s7430_s4 + $0x80] sm:$0xff]   ;;  %v5933_v60 = vld [vmem:[%s7430_s4 + $0x90] sm:$0xff]  }
 0x140   : > { %v986_v3 = vsel %vm784_vm4, %v778_v0, -inf  ;;  %5586 = vmatpush3.bf16.msra.mxu0 %v5953_v30  ;;  %v1369_v55 = vld [vmem:[#allocation2 + $0xc] sm:$0xff]  ;;  %v1368_v57 = vld [vmem:[#allocation2 + $0x4] sm:$0xff]  ;;  %v5950_v34 = vld [vmem:[%s7430_s4 + $0x118] sm:$0xff]  }
 0x141   : > { %964 = vst.msk [vmem:[#allocation2 + $0x15] sm:$0x1] %vm792_vm6, %v963_v1  ;;  %v971_v4 = vmax.f32 %v969_v61, %v970_v24  ;;  %v980_v6 = vrot.slane %v979_v2, 2  ;;  %v987_v26 = vmax.f32 %v985_v63, %v986_v3  ;;  %5587 = vmatprep.subr.bf16.mxu0 %v5954_v31  ;;  %v5932_v58 = vld [vmem:[%s7430_s4 + $0x88] sm:$0xff]   ;;  %v1371_v59 = vpack.c.bf16 %v1369_v55, %v1368_v57  ;;  %v5934_v61 = vld [vmem:[%s7430_s4 + $0x98] sm:$0xff]   ;;  %v5935_v62 = vld [vmem:[%s7430_s4 + $0xa0] sm:$0xff]  }
 0x142   : > { %v1463_v24 = vld [vmem:[#allocation2 + $0x5] sm:$0xff] }
 0x143   : > { %v972_v7 = vrot.slane %v971_v4, 1  ;;  %v981_v8 = vmax.f32 %v979_v2, %v980_v6  ;;  %v988_v9 = vrot.slane %v987_v26, 4  ;;  %v5936_v2 = vld [vmem:[%s7430_s4 + $0xa8] sm:$0xff]   ;;  %v5938_v6 = vld [vmem:[%s7430_s4 + $0xb8] sm:$0xff]  }
 0x144   : > { %5588 = vmatpush3.bf16.msra.mxu0 %v5954_v31  ;;  %v5948_v31 = vld [vmem:[%s7430_s4 + $0x108] sm:$0xff]  }
 0x145   : > { %v973_v10 = vmax.f32 %v971_v4, %v972_v7  ;;  %v982_v11 = vrot.slane %v981_v8, 1  ;;  %v989_v12 = vmax.f32 %v987_v26, %v988_v9  ;;  %5589 = vmatprep.subr.bf16.mxu0 %v5955_v35  ;;  %v5937_v4 = vld [vmem:[%s7430_s4 + $0xb0] sm:$0xff]   ;;  %v5939_v26 = vld [vmem:[%s7430_s4 + $0xc0] sm:$0xff]  }
 0x146   : > { %v997_v33 = vld [vmem:[#allocation2 + $0x10] sm:$0x1f] }
 0x147   : > { %974 = vst.msk [vmem:[#allocation2 + $0x16] sm:$0x1] %vm792_vm6, %v973_v10  ;;  %v983_v13 = vmax.f32 %v981_v8, %v982_v11  ;;  %v990_v14 = vrot.slane %v989_v12, 2  ;;  %v999_v36 = vpack.c.bf16 %v997_v33, %v997_v33  ;;  %v1464_v0 = vld [vmem:[#allocation2 + $0xd] sm:$0xff] }
 0x148   : > { %v1010_v16 = vld [vmem:[#allocation2 + $0x11] sm:$0x1f]  ;;  %5590 = vmatpush3.bf16.msra.mxu0 %v5955_v35  ;;  %v1466_v3 = vpack.c.bf16 %v1464_v0, %v1463_v24  ;;  %v1558_v10 = vld [vmem:[#allocation2 + $0x6] sm:$0xff]  ;;  %v5962_v0 = vld [vmem:[%s7433_s7 + $0x18] sm:$0xff]  }
 0x149   : > { %984 = vst.msk [vmem:[#allocation2 + $0x17] sm:$0x1] %vm792_vm6, %v983_v13  ;;  %v991_v17 = vmax.f32 %v989_v12, %v990_v14  ;;  %v1012_v18 = vpack.c.bf16 %v1010_v16, %v1010_v16  ;;  %5591 = vmatprep.subr.bf16.mxu0 %v5956_v40  ;;  %v1559_v8 = vld [vmem:[#allocation2 + $0xe] sm:$0xff]  ;;  %v5942_v14 = vld [vmem:[%s7430_s4 + $0xd8] sm:$0xff]   ;;  %v5943_v16 = vld [vmem:[%s7430_s4 + $0xe0] sm:$0xff]  }
 0x14a   : > { %v5940_v11 = vld [vmem:[%s7430_s4 + $0xc8] sm:$0xff]   ;;  %v1561_v12 = vpack.c.bf16 %v1559_v8, %v1558_v10  ;;  %v5941_v13 = vld [vmem:[%s7430_s4 + $0xd0] sm:$0xff]  }
 0x14b   : > { %v992_v22 = vrot.slane %v991_v17, 1  ;;  %5482 = vmatmul.mubr.msk.bf16.vlgmr.msra.gmra.mrb[0].mxu1 %vm779_vm3, %v1012_v18  ;;  %v5949_v33 = vld [vmem:[%s7430_s4 + $0x110] sm:$0xff]   ;;  %v5964_v24 = vld [vmem:[%s7433_s7 + $0x28] sm:$0xff]  }
 0x14c   : > { %5486 = vmatpush3.bf16.msra.mxu1 %v6429_v23  ;;  %5493 = vmatprep.mubr.msk.bf16.mxu1 %vm779_vm3, %v998_v21  ;;  %v5922_v23 = vld [vmem:[%s7430_s4 + $0x18] sm:$0xff]   ;;  %v5944_v21 = vld [vmem:[%s7430_s4 + $0xe8] sm:$0xff]  }
 0x14d   : > { %v993_v28 = vmax.f32 %v991_v17, %v992_v22  ;;  %5487 = vmatprep.subr.bf16.mxu1 %v5920_v20  ;;  %5592 = vmatpush3.bf16.msra.mxu0 %v5956_v40  ;;  %v4785_v40 = vld [vmem:[%s7432_s6] ss:$0 sm:$0xff] }
 0x14e   : > { %5593 = vmatprep.subr.bf16.mxu0 %v5957_v42  ;;  %v1180_v45 = vld [vmem:[#allocation2 + $0x12] sm:$0x1f] }
 0x14f   : > { %994 = vst.msk [vmem:[#allocation2 + $0x18] sm:$0x1] %vm792_vm6, %v993_v28  ;;  %v1182_v47 = vpack.c.bf16 %v1180_v45, %v1180_v45  ;;  %v1654_v18 = vld [vmem:[#allocation2 + $0xf] sm:$0xff]  ;;  %v5947_v28 = vld [vmem:[%s7430_s4 + $0x100] sm:$0xff]  }
 0x150   : > { %5488 = vmatpush3.bf16.msra.mxu1 %v5920_v20  ;;  %v1275_v54 = vld [vmem:[#allocation2 + $0x13] sm:$0x1f]  ;;  %v1653_v20 = vld [vmem:[#allocation2 + $0x7] sm:$0xff] }
 0x151   : > { %5489 = vmatprep.subr.bf16.mxu1 %v5921_v29  ;;  %5594 = vmatpush3.bf16.msra.mxu0 %v5957_v42  ;;  %v1277_v56 = vpack.c.bf16 %v1275_v54, %v1275_v54  ;;  %v1656_v22 = vpack.c.bf16 %v1654_v18, %v1653_v20  ;;  %v1749_v30 = vld [vmem:[#allocation2 + $0x10] sm:$0xff]  ;;  %v5975_v18 = vld [vmem:[%s7433_s7 + $0xc0] sm:$0xff]  }
 0x154   : > { %5490 = vmatpush3.bf16.msra.mxu1 %v5921_v29 }
 0x155   : > { %5491 = vmatprep.subr.bf16.mxu1 %v5922_v23 }
 0x156   : > { %v1370_v63 = vld [vmem:[#allocation2 + $0x14] sm:$0x1f] }
 0x157   : > { %v1372_v1 = vpack.c.bf16 %v1370_v63, %v1370_v63  ;;  %v1465_v7 = vld [vmem:[#allocation2 + $0x15] sm:$0x1f] }
 0x158   : > { %5492 = vmatpush3.bf16.msra.mxu1 %v5922_v23  ;;  %v1467_v9 = vpack.c.bf16 %v1465_v7, %v1465_v7  ;;  %v1560_v17 = vld [vmem:[#allocation2 + $0x16] sm:$0x1f] }
 0x159   : > { %5497 = vmatprep.subr.bf16.mxu1 %v5923_v32  ;;  %v1562_v19 = vpack.c.bf16 %v1560_v17, %v1560_v17  ;;  %v1655_v29 = vld [vmem:[#allocation2 + $0x17] sm:$0x1f] }
 0x15a   : > { %v1657_v23 = vpack.c.bf16 %v1655_v29, %v1655_v29  ;;  %v1750_v35 = vld [vmem:[#allocation2 + $0x18] sm:$0x1f]  ;;  %v5961_v63 = vld [vmem:[%s7433_s7 + $0x10] sm:$0xff]  }
 0x15b   : > { %5494 = vmatmul.mubr.msk.bf16.vlgmr.msra.gmra.mrb[0].mxu1 %vm779_vm3, %v999_v36  ;;  %v5958_v36 = vld [vmem:[%s7433_s7 + $0x78] sm:$0xff]  }
 0x15c   : > { %5498 = vmatpush3.bf16.msra.mxu1 %v5923_v32  ;;  %5505 = vmatprep.mubr.msk.bf16.mxu1 %vm779_vm3, %v1181_v39  ;;  %v1751_v32 = vpack.c.bf16 %v1749_v30, %v6545_v15  ;;  %v1752_v15 = vpack.c.bf16 %v1750_v35, %v1750_v35  ;;  %v5974_v17 = vld [vmem:[%s7433_s7 + $0xb8] sm:$0xff]   ;;  %v5979_v30 = vld [vmem:[%s7433_s7 + $0xe0] sm:$0xff]  }
 0x15d   : > { %5499 = vmatprep.subr.bf16.mxu1 %v5924_v38  ;;  %5595 = vmatprep.subr.bf16.mxu0 %v5958_v36  ;;  %v5978_v29 = vld [vmem:[%s7433_s7 + $0xd8] sm:$0xff]  }
 0x15e   : > { %5596 = vmatpush3.bf16.msra.mxu0 %v5958_v36  ;;  %v5985_v36 = vld [vmem:[%s7433_s7 + $0x110] sm:$0xff]  }
 0x15f   : > { %5601 = vmatprep.subr.bf16.mxu0 %v5959_v37 }
 0x160   : > { %5500 = vmatpush3.bf16.msra.mxu1 %v5924_v38  ;;  %v4784_v38 = vld [vmem:[%s7431_s5] ss:$0 sm:$0xff] }
 0x161   : > { %5501 = vmatprep.subr.bf16.mxu1 %v5925_v41 }
 0x164   : > { %5502 = vmatpush3.bf16.msra.mxu1 %v5925_v41 }
 0x165   : > { %5503 = vmatprep.subr.bf16.mxu1 %v5926_v43 }
 0x168   : > { %5504 = vmatpush3.bf16.msra.mxu1 %v5926_v43 }
 0x169   : > { %5509 = vmatprep.subr.bf16.mxu1 %v5927_v44 }
 0x16b   : > { %5506 = vmatmul.mubr.msk.bf16.vlgmr.msra.gmra.mrb[0].mxu1 %vm779_vm3, %v1182_v47 }
 0x16c   : > { %5510 = vmatpush3.bf16.msra.mxu1 %v5927_v44  ;;  %5517 = vmatprep.mubr.msk.bf16.mxu1 %vm779_vm3, %v1276_v50 }
 0x16d   : > { %5511 = vmatprep.subr.bf16.mxu1 %v5928_v49 }
 0x170   : > { %5512 = vmatpush3.bf16.msra.mxu1 %v5928_v49 }
 0x171   : > { %5513 = vmatprep.subr.bf16.mxu1 %v5929_v51 }
 0x174   : > { %5514 = vmatpush3.bf16.msra.mxu1 %v5929_v51 }
 0x175   : > { %5515 = vmatprep.subr.bf16.mxu1 %v5930_v52 }
 0x178   : > { %5516 = vmatpush3.bf16.msra.mxu1 %v5930_v52 }
 0x179   : > { %5521 = vmatprep.subr.bf16.mxu1 %v5931_v53 }
 0x17b   : > { %5518 = vmatmul.mubr.msk.bf16.vlgmr.msra.gmra.mrb[0].mxu1 %vm779_vm3, %v1277_v56 }
 0x17c   : > { %5522 = vmatpush3.bf16.msra.mxu1 %v5931_v53  ;;  %5529 = vmatprep.mubr.msk.bf16.mxu1 %vm779_vm3, %v1371_v59 }
 0x17d   : > { %5523 = vmatprep.subr.bf16.mxu1 %v5932_v58 }
 0x180   : > { %5524 = vmatpush3.bf16.msra.mxu1 %v5932_v58 }
 0x181   : > { %5525 = vmatprep.subr.bf16.mxu1 %v5933_v60 }
 0x184   : > { %5526 = vmatpush3.bf16.msra.mxu1 %v5933_v60 }
 0x185   : > { %5527 = vmatprep.subr.bf16.mxu1 %v5934_v61 }
 0x188   : > { %5528 = vmatpush3.bf16.msra.mxu1 %v5934_v61  ;;  %v5960_v61 = vld [vmem:[%s7433_s7 + $0x8] sm:$0xff]  }
 0x189   : > { %5533 = vmatprep.subr.bf16.mxu1 %v5935_v62 }
 0x18b   : > { %5530 = vmatmul.mubr.msk.bf16.vlgmr.msra.gmra.mrb[0].mxu1 %vm779_vm3, %v1372_v1  ;;  %v5963_v1 = vld [vmem:[%s7433_s7 + $0x20] sm:$0xff]  }
 0x18c   : > { %5534 = vmatpush3.bf16.msra.mxu1 %v5935_v62  ;;  %5541 = vmatprep.mubr.msk.bf16.mxu1 %vm779_vm3, %v1466_v3  ;;  %v5966_v3 = vld [vmem:[%s7433_s7 + $0x38] sm:$0xff]  }
 0x18d   : > { %5535 = vmatprep.subr.bf16.mxu1 %v5936_v2 }
 0x190   : > { %5536 = vmatpush3.bf16.msra.mxu1 %v5936_v2  ;;  %v5965_v2 = vld [vmem:[%s7433_s7 + $0x30] sm:$0xff]  }
 0x191   : > { %5537 = vmatprep.subr.bf16.mxu1 %v5937_v4 }
 0x194   : > { %5538 = vmatpush3.bf16.msra.mxu1 %v5937_v4  ;;  %v5967_v4 = vld [vmem:[%s7433_s7 + $0x80] sm:$0xff]  }
 0x195   : > { %5539 = vmatprep.subr.bf16.mxu1 %v5938_v6 }
 0x198   : > { %5540 = vmatpush3.bf16.msra.mxu1 %v5938_v6 }
 0x199   : > { %5545 = vmatprep.subr.bf16.mxu1 %v5939_v26 }
 0x19b   : > { %5542 = vmatmul.mubr.msk.bf16.vlgmr.msra.gmra.mrb[0].mxu1 %vm779_vm3, %v1467_v9  ;;  %v5968_v9 = vld [vmem:[%s7433_s7 + $0x88] sm:$0xff]  }
 0x19c   : > { %5546 = vmatpush3.bf16.msra.mxu1 %v5939_v26  ;;  %5553 = vmatprep.mubr.msk.bf16.mxu1 %vm779_vm3, %v1561_v12  ;;  %v5970_v12 = vld [vmem:[%s7433_s7 + $0x98] sm:$0xff]  }
 0x19d   : > { %5547 = vmatprep.subr.bf16.mxu1 %v5940_v11 }
 0x1a0   : > { %5548 = vmatpush3.bf16.msra.mxu1 %v5940_v11  ;;  %v5969_v11 = vld [vmem:[%s7433_s7 + $0x90] sm:$0xff]  }
 0x1a1   : > { %5549 = vmatprep.subr.bf16.mxu1 %v5941_v13 }
 0x1a4   : > { %5550 = vmatpush3.bf16.msra.mxu1 %v5941_v13  ;;  %v5971_v13 = vld [vmem:[%s7433_s7 + $0xa0] sm:$0xff]  }
 0x1a5   : > { %5551 = vmatprep.subr.bf16.mxu1 %v5942_v14 }
 0x1a8   : > { %5552 = vmatpush3.bf16.msra.mxu1 %v5942_v14  ;;  %v5972_v14 = vld [vmem:[%s7433_s7 + $0xa8] sm:$0xff]  }
 0x1a9   : > { %5557 = vmatprep.subr.bf16.mxu1 %v5943_v16 }
 0x1ab   : > { %5554 = vmatmul.mubr.msk.bf16.vlgmr.msra.gmra.mrb[0].mxu1 %vm779_vm3, %v1562_v19 }
 0x1ac   : > { %5558 = vmatpush3.bf16.msra.mxu1 %v5943_v16  ;;  %5565 = vmatprep.mubr.msk.bf16.mxu1 %vm779_vm3, %v1656_v22  ;;  %v5973_v16 = vld [vmem:[%s7433_s7 + $0xb0] sm:$0xff]  }
 0x1ad   : > { %5559 = vmatprep.subr.bf16.mxu1 %v5944_v21 }
 0x1b0   : > { %5560 = vmatpush3.bf16.msra.mxu1 %v5944_v21 }
 0x1b1   : > { %5561 = vmatprep.subr.bf16.mxu1 %v5945_v25 }
 0x1b4   : > { %5562 = vmatpush3.bf16.msra.mxu1 %v5945_v25  ;;  %v5976_v25 = vld [vmem:[%s7433_s7 + $0xc8] sm:$0xff]  }
 0x1b5   : > { %5563 = vmatprep.subr.bf16.mxu1 %v5946_v27 }
 0x1b8   : > { %5564 = vmatpush3.bf16.msra.mxu1 %v5946_v27 }
 0x1b9   : > { %5569 = vmatprep.subr.bf16.mxu1 %v5947_v28 }
 0x1bb   : > { %5566 = vmatmul.mubr.msk.bf16.vlgmr.msra.gmra.mrb[0].mxu1 %vm779_vm3, %v1657_v23  ;;  %v5980_v23 = vld [vmem:[%s7433_s7 + $0xe8] sm:$0xff]  }
 0x1bc   : > { %5570 = vmatpush3.bf16.msra.mxu1 %v5947_v28  ;;  %5577 = vmatprep.mubr.msk.bf16.mxu1 %vm779_vm3, %v1751_v32  ;;  %v5977_v28 = vld [vmem:[%s7433_s7 + $0xd0] sm:$0xff]   ;;  %v5982_v32 = vld [vmem:[%s7433_s7 + $0xf8] sm:$0xff]  }
 0x1bd   : > { %5571 = vmatprep.subr.bf16.mxu1 %v5948_v31 }
 0x1c0   : > { %5572 = vmatpush3.bf16.msra.mxu1 %v5948_v31  ;;  %v5981_v31 = vld [vmem:[%s7433_s7 + $0xf0] sm:$0xff]  }
 0x1c1   : > { %5573 = vmatprep.subr.bf16.mxu1 %v5949_v33 }
 0x1c4   : > { %5574 = vmatpush3.bf16.msra.mxu1 %v5949_v33  ;;  %v5983_v33 = vld [vmem:[%s7433_s7 + $0x100] sm:$0xff]  }
 0x1c5   : > { %5575 = vmatprep.subr.bf16.mxu1 %v5950_v34 }
 0x1c8   : > { %5576 = vmatpush3.bf16.msra.mxu1 %v5950_v34 }
 0x1cb   : > { %5578 = vmatmul.mubr.msk.bf16.vlgmr.msra.gmra.mrb[0].mxu1 %vm779_vm3, %v1752_v15  ;;  %v5984_v15 = vld [vmem:[%s7433_s7 + $0x108] sm:$0xff]  }
 0x1cc   : > { %3271 = vmatprep.mubr.bf16.mxu1 %v6248_v5 }
 0x29e   : > { %v5579_v39 = vpop.f32.mrb[0].mxu1 }
 0x29f   : > { %v1852_v41 = vmul.f32 %v5579_v39, %v4784_v38  ;;  %v1826_v42 = vpop.f32.mrb[1].mxu1  ;;  %v5988_v39 = vld [vmem:[%s7433_s7 + $0x128] sm:$0xff]  }
 0x2a0   : > { %v1850_v43 = vmul.f32 %v4784_v38, %v1826_v42  ;;  %v5580_v44 = vpop.f32.mrb[2].mxu1  ;;  %v5991_v42 = vld [vmem:[%s7433_s7 + $0x140] sm:$0xff]  }
 0x2a1   : > { %v1862_v45 = vadd.f32 %v4785_v40, %v1852_v41  ;;  %v1829_v46 = vpop.f32.mrb[3].mxu1  ;;  %v5990_v41 = vld [vmem:[%s7433_s7 + $0x138] sm:$0xff]  }
 0x2a2   : > { %v1860_v47 = vadd.f32 %v4785_v40, %v1850_v43  ;;  %v1851_v48 = vmul.f32 %v4784_v38, %v1829_v46  ;;  %v5987_v38 = vld [vmem:[%s7433_s7 + $0x120] sm:$0xff]  }
 0x2a3   : > { %v1865_v49 = vmax.f32 %v1862_v45, 0.0 }
 0x2a4   : > { %v1863_v50 = vmax.f32 %v1860_v47, 0.0  ;;  %v1861_v51 = vadd.f32 %v4785_v40, %v1851_v48  ;;  %v5989_v40 = vld [vmem:[%s7433_s7 + $0x130] sm:$0xff]   ;;  %v5992_v47 = vld [vmem:[%s7433_s7 + $0x148] sm:$0xff]  }
 0x2a5   : > { %1872 = vst [vmem:[#allocation3 + $0x14] sm:$0x1f] %v1865_v49  ;;  %v6023_v49 = vld [vmem:[%s7436_s10] ss:$8 sps:$4 sm:$0xff]  }
 0x2a6   : > { %1870 = vst [vmem:[#allocation3 + $0x4] sm:$0xff] %v1863_v50  ;;  %v1864_v52 = vmax.f32 %v1861_v51, 0.0  ;;  %v6031_v51 = vld [vmem:[%s7436_s10 + $0x14] ss:$8 sps:$4 sm:$0xff]  }
 0x2a8   : > { %1871 = vst [vmem:[#allocation3 + $0xc] sm:$0xff] %v1864_v52  ;;  %v6696_v53 = vpack.c.bf16 %v1864_v52, %v1863_v50  ;;  %v6025_v50 = vld [vmem:[%s7436_s10 + $0x4] ss:$8 sps:$4 sm:$0xff]   ;;  %v5993_v52 = vld [vmem:[%s7433_s7 + $0x150] sm:$0xff]  }
 0x2a9   : > { %3239 = vmatprep.subr.bf16.mxu1 %v6025_v50  ;;  %v6052_v50 = vld [vmem:[%s7436_s10 + $0xc4] ss:$8 sps:$4 sm:$0xff]  }
 0x2aa   : > { %3240 = vmatpush1.bf16.msra.mxu1 %v6023_v49  ;;  %v6047_v49 = vld [vmem:[%s7436_s10 + $0x40] ss:$8 sps:$4 sm:$0xff]  }
 0x2ab   : > { %3241 = vmatprep.subr.bf16.mxu1 %v6031_v51  ;;  %v6050_v51 = vld [vmem:[%s7436_s10 + $0xc0] ss:$8 sps:$4 sm:$0xff]  }
 0x2ac   : > { %v2352_v43 = vld [vmem:[#allocation3 + $0x14] sm:$0x1f] }
 0x2ad   : > { %v1894_v54 = vld [vmem:[#allocation3 + $0x1] sm:$0xff]  ;;  %v2354_v46 = vpack.c.bf16 %v2352_v43, %v2352_v43  ;;  %v6032_v43 = vld [vmem:[%s7436_s10 + $0x90] ss:$8 sps:$4 sm:$0xff]  }
 0x2ae   : > { %v1873_v60 = vld [vmem:[#allocation3] sm:$0xff] }
 0x2af   : > { %v1895_v55 = vld [vmem:[#allocation3 + $0x9] sm:$0xff]  ;;  %v1896_v56 = vld [vmem:[#allocation3 + $0x11] sm:$0x1f] }
 0x2b0   : > { %v6698_v57 = vld [vmem:[#allocation3 + $0x8] sm:$0xff]  ;;  %v1897_v58 = vpack.c.bf16 %v1895_v55, %v1894_v54  ;;  %v1898_v59 = vpack.c.bf16 %v1896_v56, %v1896_v56  ;;  %v1875_v6 = vld [vmem:[#allocation3 + $0x10] sm:$0x1f]  ;;  %v5994_v55 = vld [vmem:[%s7433_s7 + $0x158] sm:$0xff]  }
 0x2b1   : > { %v1876_v62 = vpack.c.bf16 %v6698_v57, %v1873_v60  ;;  %v2109_v26 = vld [vmem:[#allocation3 + $0xa] sm:$0xff]  ;;  %v1877_v7 = vpack.c.bf16 %v1875_v6, %v1875_v6  ;;  %v2108_v8 = vld [vmem:[#allocation3 + $0x2] sm:$0xff]  ;;  %v2110_v19 = vld [vmem:[#allocation3 + $0x12] sm:$0x1f] }
 0x2b2   : > { %5597 = vmatprep.mubr.bf16.mxu0 %v1897_v58  ;;  %v2111_v10 = vpack.c.bf16 %v2109_v26, %v2108_v8  ;;  %v2230_v20 = vld [vmem:[#allocation3 + $0xb] sm:$0xff]  ;;  %v2112_v21 = vpack.c.bf16 %v2110_v19, %v2110_v19  ;;  %v2229_v22 = vld [vmem:[#allocation3 + $0x3] sm:$0xff]  ;;  %v2231_v34 = vld [vmem:[#allocation3 + $0x13] sm:$0x1f] }
 0x2b3   : > { %5598 = vmatmul.mubr.bf16.vlgmr.msra.gmra.mrb[44].mxu0 %v1898_v59  ;;  %v2232_v27 = vpack.c.bf16 %v2230_v20, %v2229_v22  ;;  %v2233_v35 = vpack.c.bf16 %v2231_v34, %v2231_v34  ;;  %v2471_v44 = vld [vmem:[#allocation3 + $0x5] sm:$0xff]  ;;  %v2472_v45 = vld [vmem:[#allocation3 + $0xd] sm:$0xff] }
 0x2b4   : > { %5602 = vmatpush3.bf16.msra.mxu0 %v5959_v37  ;;  %5617 = vmatprep.mubr.bf16.mxu0 %v1876_v62  ;;  %v5986_v37 = vld [vmem:[%s7433_s7 + $0x118] sm:$0xff]   ;;  %v2474_v48 = vpack.c.bf16 %v2472_v45, %v2471_v44  ;;  %v6037_v54 = vld [vmem:[%s7436_s10 + $0x24] ss:$8 sps:$4 sm:$0xff]   ;;  %v6035_v56 = vld [vmem:[%s7436_s10 + $0x20] ss:$8 sps:$4 sm:$0xff]  }
 0x2b5   : > { %5603 = vmatprep.subr.bf16.mxu0 %v5960_v61  ;;  %v6043_v58 = vld [vmem:[%s7436_s10 + $0x34] ss:$8 sps:$4 sm:$0xff]   ;;  %v5995_v59 = vld [vmem:[%s7433_s7 + $0x160] sm:$0xff]   ;;  %v6041_v60 = vld [vmem:[%s7436_s10 + $0x30] ss:$8 sps:$4 sm:$0xff]  }
 0x2b6   : > { %v5997_v62 = vld [vmem:[%s7433_s7 + $0x170] sm:$0xff]   ;;  %v6003_v8 = vld [vmem:[%s7433_s7 + $0x1a0] sm:$0xff]  }
 0x2b7   : > { %v6001_v26 = vld [vmem:[%s7433_s7 + $0x190] sm:$0xff]   ;;  %v6011_v22 = vld [vmem:[%s7433_s7 + $0x1e0] sm:$0xff]  }
 0x2b8   : > { %5604 = vmatpush3.bf16.msra.mxu0 %v5960_v61  ;;  %v5996_v61 = vld [vmem:[%s7433_s7 + $0x168] sm:$0xff]   ;;  %v6009_v20 = vld [vmem:[%s7433_s7 + $0x1d0] sm:$0xff]  }
 0x2b9   : > { %5605 = vmatprep.subr.bf16.mxu0 %v5961_v63  ;;  %v6017_v34 = vld [vmem:[%s7433_s7 + $0x210] sm:$0xff]   ;;  %v6040_v44 = vld [vmem:[%s7436_s10 + $0xa4] ss:$8 sps:$4 sm:$0xff]   ;;  %v6038_v45 = vld [vmem:[%s7436_s10 + $0xa0] ss:$8 sps:$4 sm:$0xff]  }
 0x2bc   : > { %5606 = vmatpush3.bf16.msra.mxu0 %v5961_v63  ;;  %v5998_v63 = vld [vmem:[%s7433_s7 + $0x178] sm:$0xff]  }
 0x2bd   : > { %5607 = vmatprep.subr.bf16.mxu0 %v5962_v0 }
 0x2c0   : > { %5608 = vmatpush3.bf16.msra.mxu0 %v5962_v0  ;;  %v5999_v0 = vld [vmem:[%s7433_s7 + $0x180] sm:$0xff]  }
 0x2c1   : > { %5609 = vmatprep.subr.bf16.mxu0 %v5963_v1 }
 0x2c4   : > { %5610 = vmatpush3.bf16.msra.mxu0 %v5963_v1  ;;  %v2473_v1 = vld [vmem:[#allocation3 + $0x15] sm:$0x1f] }
 0x2c5   : > { %5611 = vmatprep.subr.bf16.mxu0 %v5964_v24 }
 0x2c8   : > { %5612 = vmatpush3.bf16.msra.mxu0 %v5964_v24  ;;  %v2592_v24 = vld [vmem:[#allocation3 + $0x6] sm:$0xff] }
 0x2c9   : > { %5613 = vmatprep.subr.bf16.mxu0 %v5965_v2 }
 0x2cc   : > { %5614 = vmatpush3.bf16.msra.mxu0 %v5965_v2  ;;  %v2593_v2 = vld [vmem:[#allocation3 + $0xe] sm:$0xff] }
 0x2cd   : > { %5615 = vmatprep.subr.bf16.mxu0 %v5966_v3  ;;  %v2595_v6 = vpack.c.bf16 %v2593_v2, %v2592_v24  ;;  %v4986_v24 = vld [vmem:[%s7434_s8] ss:$0 sm:$0xff] }
 0x2d0   : > { %5616 = vmatpush3.bf16.msra.mxu0 %v5966_v3  ;;  %v2475_v3 = vpack.c.bf16 %v2473_v1, %v2473_v1  ;;  %v6073_v1 = vld [vmem:[%s7436_s10 + $0x104] ss:$8 sps:$4 sm:$0xff]  }
 0x2d1   : > { %5621 = vmatprep.subr.bf16.mxu0 %v5967_v4 }
 0x2d3   : > { %5618 = vmatmul.mubr.bf16.vlgmr.msra.gmra.mrb[44].mxu0 %v1877_v7  ;;  %v6002_v7 = vld [vmem:[%s7433_s7 + $0x198] sm:$0xff]  }
 0x2d4   : > { %5622 = vmatpush3.bf16.msra.mxu0 %v5967_v4  ;;  %5637 = vmatprep.mubr.bf16.mxu0 %v2111_v10  ;;  %v6000_v4 = vld [vmem:[%s7433_s7 + $0x188] sm:$0xff]   ;;  %v6005_v10 = vld [vmem:[%s7433_s7 + $0x1b0] sm:$0xff]  }
 0x2d5   : > { %5623 = vmatprep.subr.bf16.mxu0 %v5968_v9 }
 0x2d8   : > { %5624 = vmatpush3.bf16.msra.mxu0 %v5968_v9  ;;  %v6004_v9 = vld [vmem:[%s7433_s7 + $0x1a8] sm:$0xff]  }
 0x2d9   : > { %5625 = vmatprep.subr.bf16.mxu0 %v5969_v11 }
 0x2dc   : > { %5626 = vmatpush3.bf16.msra.mxu0 %v5969_v11  ;;  %v6006_v11 = vld [vmem:[%s7433_s7 + $0x1b8] sm:$0xff]  }
 0x2dd   : > { %5627 = vmatprep.subr.bf16.mxu0 %v5970_v12 }
 0x2e0   : > { %5628 = vmatpush3.bf16.msra.mxu0 %v5970_v12  ;;  %v6007_v12 = vld [vmem:[%s7433_s7 + $0x1c0] sm:$0xff]  }
 0x2e1   : > { %5629 = vmatprep.subr.bf16.mxu0 %v5971_v13 }
 0x2e4   : > { %5630 = vmatpush3.bf16.msra.mxu0 %v5971_v13  ;;  %v2594_v13 = vld [vmem:[#allocation3 + $0x16] sm:$0x1f] }
 0x2e5   : > { %5631 = vmatprep.subr.bf16.mxu0 %v5972_v14 }
 0x2e8   : > { %5632 = vmatpush3.bf16.msra.mxu0 %v5972_v14  ;;  %v2713_v14 = vld [vmem:[#allocation3 + $0x7] sm:$0xff] }
 0x2e9   : > { %5633 = vmatprep.subr.bf16.mxu0 %v5973_v16 }
 0x2ec   : > { %5634 = vmatpush3.bf16.msra.mxu0 %v5973_v16  ;;  %v2714_v16 = vld [vmem:[#allocation3 + $0xf] sm:$0xff] }
 0x2ed   : > { %5635 = vmatprep.subr.bf16.mxu0 %v5974_v17  ;;  %v2716_v19 = vpack.c.bf16 %v2714_v16, %v2713_v14 }
 0x2f0   : > { %5636 = vmatpush3.bf16.msra.mxu0 %v5974_v17  ;;  %v2596_v17 = vpack.c.bf16 %v2594_v13, %v2594_v13 }
 0x2f1   : > { %5641 = vmatprep.subr.bf16.mxu0 %v5975_v18 }
 0x2f3   : > { %5638 = vmatmul.mubr.bf16.vlgmr.msra.gmra.mrb[44].mxu0 %v2112_v21  ;;  %v6010_v21 = vld [vmem:[%s7433_s7 + $0x1d8] sm:$0xff]  }
 0x2f4   : > { %5642 = vmatpush3.bf16.msra.mxu0 %v5975_v18  ;;  %5657 = vmatprep.mubr.bf16.mxu0 %v2232_v27  ;;  %v6008_v18 = vld [vmem:[%s7433_s7 + $0x1c8] sm:$0xff]   ;;  %v6013_v27 = vld [vmem:[%s7433_s7 + $0x1f0] sm:$0xff]  }
 0x2f5   : > { %5643 = vmatprep.subr.bf16.mxu0 %v5976_v25 }
 0x2f8   : > { %5644 = vmatpush3.bf16.msra.mxu0 %v5976_v25  ;;  %v6012_v25 = vld [vmem:[%s7433_s7 + $0x1e8] sm:$0xff]  }
 0x2f9   : > { %5645 = vmatprep.subr.bf16.mxu0 %v5977_v28 }
 0x2fc   : > { %5646 = vmatpush3.bf16.msra.mxu0 %v5977_v28  ;;  %v6014_v28 = vld [vmem:[%s7433_s7 + $0x1f8] sm:$0xff]  }
 0x2fd   : > { %5647 = vmatprep.subr.bf16.mxu0 %v5978_v29 }
 0x300   : > { %5648 = vmatpush3.bf16.msra.mxu0 %v5978_v29  ;;  %v6015_v29 = vld [vmem:[%s7433_s7 + $0x200] sm:$0xff]  }
 0x301   : > { %5649 = vmatprep.subr.bf16.mxu0 %v5979_v30 }
 0x304   : > { %5650 = vmatpush3.bf16.msra.mxu0 %v5979_v30  ;;  %v2715_v30 = vld [vmem:[#allocation3 + $0x17] sm:$0x1f] }
 0x305   : > { %5651 = vmatprep.subr.bf16.mxu0 %v5980_v23 }
 0x308   : > { %5652 = vmatpush3.bf16.msra.mxu0 %v5980_v23  ;;  %v2835_v23 = vld [vmem:[#allocation3 + $0x10] sm:$0xff] }
 0x309   : > { %5653 = vmatprep.subr.bf16.mxu0 %v5981_v31 }
 0x30c   : > { %5654 = vmatpush3.bf16.msra.mxu0 %v5981_v31  ;;  %v2717_v31 = vpack.c.bf16 %v2715_v30, %v2715_v30  ;;  %v6079_v30 = vld [vmem:[%s7436_s10 + $0x124] ss:$8 sps:$4 sm:$0xff]  }
 0x30d   : > { %5655 = vmatprep.subr.bf16.mxu0 %v5982_v32 }
 0x310   : > { %5656 = vmatpush3.bf16.msra.mxu0 %v5982_v32  ;;  %v6016_v32 = vld [vmem:[%s7433_s7 + $0x208] sm:$0xff]  }
 0x311   : > { %5661 = vmatprep.subr.bf16.mxu0 %v5983_v33 }
 0x313   : > { %5658 = vmatmul.mubr.bf16.vlgmr.msra.gmra.mrb[44].mxu0 %v2233_v35  ;;  %v6018_v35 = vld [vmem:[%s7433_s7 + $0x218] sm:$0xff]  }
 0x314   : > { %5662 = vmatpush3.bf16.msra.mxu0 %v5983_v33  ;;  %5677 = vmatprep.mubr.bf16.mxu0 %v6696_v53  ;;  %v6029_v53 = vld [vmem:[%s7436_s10 + $0x10] ss:$8 sps:$4 sm:$0xff]   ;;  %v2837_v33 = vpack.c.bf16 %v2835_v23, %v6698_v57  ;;  %v6019_v57 = vld [vmem:[%s7433_s7 + $0x220] sm:$0xff]  }
 0x315   : > { %5663 = vmatprep.subr.bf16.mxu0 %v5984_v15  ;;  %3242 = vmatpush1.bf16.msra.mxu1 %v6029_v53  ;;  %v6053_v53 = vld [vmem:[%s7436_s10 + $0x50] ss:$8 sps:$4 sm:$0xff]  }
 0x316   : > { %3243 = vmatprep.subr.bf16.mxu1 %v6037_v54  ;;  %v6058_v54 = vld [vmem:[%s7436_s10 + $0xd4] ss:$8 sps:$4 sm:$0xff]  }
 0x318   : > { %5664 = vmatpush3.bf16.msra.mxu0 %v5984_v15  ;;  %v6020_v15 = vld [vmem:[%s7433_s7 + $0x228] sm:$0xff]  }
 0x319   : > { %5665 = vmatprep.subr.bf16.mxu0 %v5985_v36  ;;  %3244 = vmatpush1.bf16.msra.mxu1 %v6035_v56  ;;  %v6061_v56 = vld [vmem:[%s7436_s10 + $0x64] ss:$8 sps:$4 sm:$0xff]  }
 0x31a   : > { %3245 = vmatprep.subr.bf16.mxu1 %v6043_v58  ;;  %v6064_v58 = vld [vmem:[%s7436_s10 + $0xe4] ss:$8 sps:$4 sm:$0xff]  }
 0x31c   : > { %5666 = vmatpush3.bf16.msra.mxu0 %v5985_v36  ;;  %v6021_v36 = vld [vmem:[%s7433_s7 + $0x230] sm:$0xff]  }
 0x31d   : > { %5667 = vmatprep.subr.bf16.mxu0 %v5986_v37  ;;  %3246 = vmatpush1.bf16.msra.mxu1 %v6041_v60  ;;  %v6062_v60 = vld [vmem:[%s7436_s10 + $0xe0] ss:$8 sps:$4 sm:$0xff]  }
 0x320   : > { %5668 = vmatpush3.bf16.msra.mxu0 %v5986_v37  ;;  %v6022_v37 = vld [vmem:[%s7433_s7 + $0x238] sm:$0xff]  }
 0x321   : > { %5669 = vmatprep.subr.bf16.mxu0 %v5987_v38 }
 0x324   : > { %5670 = vmatpush3.bf16.msra.mxu0 %v5987_v38  ;;  %v6028_v38 = vld [vmem:[%s7436_s10 + $0x84] ss:$8 sps:$4 sm:$0xff]  }
 0x325   : > { %5671 = vmatprep.subr.bf16.mxu0 %v5988_v39 }
 0x328   : > { %5672 = vmatpush3.bf16.msra.mxu0 %v5988_v39  ;;  %v2836_v39 = vld [vmem:[#allocation3 + $0x18] sm:$0x1f] }
 0x329   : > { %5673 = vmatprep.subr.bf16.mxu0 %v5989_v40 }
 0x32c   : > { %5674 = vmatpush3.bf16.msra.mxu0 %v5989_v40  ;;  %v6026_v40 = vld [vmem:[%s7436_s10 + $0x80] ss:$8 sps:$4 sm:$0xff]  }
 0x32d   : > { %5675 = vmatprep.subr.bf16.mxu0 %v5990_v41 }
 0x330   : > { %5676 = vmatpush3.bf16.msra.mxu0 %v5990_v41  ;;  %v2838_v41 = vpack.c.bf16 %v2836_v39, %v2836_v39  ;;  %v6091_v39 = vld [vmem:[%s7436_s10 + $0x164] ss:$8 sps:$4 sm:$0xff]  }
 0x331   : > { %5681 = vmatprep.subr.bf16.mxu0 %v5991_v42 }
 0x333   : > { %5678 = vmatmul.mubr.bf16.vlgmr.msra.gmra.mrb[44].mxu0 %v2354_v46  ;;  %v6046_v46 = vld [vmem:[%s7436_s10 + $0xb4] ss:$8 sps:$4 sm:$0xff]  }
 0x334   : > { %5682 = vmatpush3.bf16.msra.mxu0 %v5991_v42  ;;  %5697 = vmatprep.mubr.bf16.mxu0 %v2474_v48  ;;  %v6034_v42 = vld [vmem:[%s7436_s10 + $0x94] ss:$8 sps:$4 sm:$0xff]   ;;  %v6049_v48 = vld [vmem:[%s7436_s10 + $0x44] ss:$8 sps:$4 sm:$0xff]  }
 0x335   : > { %5683 = vmatprep.subr.bf16.mxu0 %v5992_v47  ;;  %3247 = vmatprep.subr.bf16.mxu1 %v6049_v48  ;;  %v6100_v48 = vld [vmem:[%s7436_s10 + $0x194] ss:$8 sps:$4 sm:$0xff]  }
 0x336   : > { %3248 = vmatpush1.bf16.msra.mxu1 %v6047_v49  ;;  %v6098_v49 = vld [vmem:[%s7436_s10 + $0x190] ss:$8 sps:$4 sm:$0xff]  }
 0x338   : > { %5684 = vmatpush3.bf16.msra.mxu0 %v5992_v47  ;;  %v6044_v47 = vld [vmem:[%s7436_s10 + $0xb0] ss:$8 sps:$4 sm:$0xff]  }
 0x339   : > { %5685 = vmatprep.subr.bf16.mxu0 %v5993_v52 }
 0x33c   : > { %5686 = vmatpush3.bf16.msra.mxu0 %v5993_v52  ;;  %v6055_v52 = vld [vmem:[%s7436_s10 + $0x54] ss:$8 sps:$4 sm:$0xff]  }
 0x33d   : > { %5687 = vmatprep.subr.bf16.mxu0 %v5994_v55  ;;  %3249 = vmatprep.subr.bf16.mxu1 %v6055_v52  ;;  %v6101_v52 = vld [vmem:[%s7436_s10 + $0x1a0] ss:$8 sps:$4 sm:$0xff]  }
 0x33e   : > { %3250 = vmatpush1.bf16.msra.mxu1 %v6053_v53 }
 0x33f   : > { %3251 = vmatprep.subr.bf16.mxu1 %v6061_v56  ;;  %v6109_v56 = vld [vmem:[%s7436_s10 + $0x1c4] ss:$8 sps:$4 sm:$0xff]  }
 0x340   : > { %5688 = vmatpush3.bf16.msra.mxu0 %v5994_v55  ;;  %v6056_v55 = vld [vmem:[%s7436_s10 + $0xd0] ss:$8 sps:$4 sm:$0xff]  }
 0x341   : > { %5689 = vmatprep.subr.bf16.mxu0 %v5995_v59 }
 0x344   : > { %5690 = vmatpush3.bf16.msra.mxu0 %v5995_v59  ;;  %v6059_v59 = vld [vmem:[%s7436_s10 + $0x60] ss:$8 sps:$4 sm:$0xff]  }
 0x345   : > { %5691 = vmatprep.subr.bf16.mxu0 %v5996_v61  ;;  %3252 = vmatpush1.bf16.msra.mxu1 %v6059_v59  ;;  %v6112_v59 = vld [vmem:[%s7436_s10 + $0x1d4] ss:$8 sps:$4 sm:$0xff]  }
 0x348   : > { %5692 = vmatpush3.bf16.msra.mxu0 %v5996_v61  ;;  %v6067_v61 = vld [vmem:[%s7436_s10 + $0x74] ss:$8 sps:$4 sm:$0xff]  }
 0x349   : > { %5693 = vmatprep.subr.bf16.mxu0 %v5997_v62  ;;  %3253 = vmatprep.subr.bf16.mxu1 %v6067_v61  ;;  %v6115_v61 = vld [vmem:[%s7436_s10 + $0x1e4] ss:$8 sps:$4 sm:$0xff]  }
 0x34c   : > { %5694 = vmatpush3.bf16.msra.mxu0 %v5997_v62  ;;  %v6070_v62 = vld [vmem:[%s7436_s10 + $0xf4] ss:$8 sps:$4 sm:$0xff]  }
 0x34d   : > { %5695 = vmatprep.subr.bf16.mxu0 %v5998_v63 }
 0x350   : > { %5696 = vmatpush3.bf16.msra.mxu0 %v5998_v63  ;;  %v6065_v63 = vld [vmem:[%s7436_s10 + $0x70] ss:$8 sps:$4 sm:$0xff]  }
 0x351   : > { %5701 = vmatprep.subr.bf16.mxu0 %v5999_v0  ;;  %3254 = vmatpush1.bf16.msra.mxu1 %v6065_v63  ;;  %v6118_v63 = vld [vmem:[%s7436_s10 + $0x1f4] ss:$8 sps:$4 sm:$0xff]  }
 0x352   : > { %3392 = vmatprep.subr.bf16.mxu1 %v6073_v1  ;;  %v6121_v1 = vld [vmem:[%s7436_s10 + $0x204] ss:$8 sps:$4 sm:$0xff]  }
 0x353   : > { %5698 = vmatmul.mubr.bf16.vlgmr.msra.gmra.mrb[44].mxu0 %v2475_v3  ;;  %v4987_v3 = vld [vmem:[%s7435_s9] ss:$0 sm:$0xff] }
 0x354   : > { %5702 = vmatpush3.bf16.msra.mxu0 %v5999_v0  ;;  %5717 = vmatprep.mubr.bf16.mxu0 %v2595_v6  ;;  %v6068_v0 = vld [vmem:[%s7436_s10 + $0xf0] ss:$8 sps:$4 sm:$0xff]  }
 0x355   : > { %5703 = vmatprep.subr.bf16.mxu0 %v6000_v4 }
 0x358   : > { %5704 = vmatpush3.bf16.msra.mxu0 %v6000_v4 }
 0x359   : > { %5705 = vmatprep.subr.bf16.mxu0 %v6001_v26 }
 0x35c   : > { %5706 = vmatpush3.bf16.msra.mxu0 %v6001_v26 }
 0x35d   : > { %5707 = vmatprep.subr.bf16.mxu0 %v6002_v7 }
 0x360   : > { %5708 = vmatpush3.bf16.msra.mxu0 %v6002_v7 }
 0x361   : > { %5709 = vmatprep.subr.bf16.mxu0 %v6003_v8 }
 0x364   : > { %5710 = vmatpush3.bf16.msra.mxu0 %v6003_v8 }
 0x365   : > { %5711 = vmatprep.subr.bf16.mxu0 %v6004_v9 }
 0x368   : > { %5712 = vmatpush3.bf16.msra.mxu0 %v6004_v9 }
 0x369   : > { %5713 = vmatprep.subr.bf16.mxu0 %v6005_v10 }
 0x36c   : > { %5714 = vmatpush3.bf16.msra.mxu0 %v6005_v10 }
 0x36d   : > { %5715 = vmatprep.subr.bf16.mxu0 %v6006_v11 }
 0x370   : > { %5716 = vmatpush3.bf16.msra.mxu0 %v6006_v11 }
 0x371   : > { %5721 = vmatprep.subr.bf16.mxu0 %v6007_v12 }
 0x373   : > { %5718 = vmatmul.mubr.bf16.vlgmr.msra.gmra.mrb[44].mxu0 %v2596_v17 }
 0x374   : > { %5722 = vmatpush3.bf16.msra.mxu0 %v6007_v12  ;;  %5737 = vmatprep.mubr.bf16.mxu0 %v2716_v19 }
 0x375   : > { %5723 = vmatprep.subr.bf16.mxu0 %v6008_v18 }
 0x378   : > { %5724 = vmatpush3.bf16.msra.mxu0 %v6008_v18  ;;  %v6071_v18 = vld [vmem:[%s7436_s10 + $0x100] ss:$8 sps:$4 sm:$0xff]  }
 0x379   : > { %5725 = vmatprep.subr.bf16.mxu0 %v6009_v20 }
 0x37c   : > { %5726 = vmatpush3.bf16.msra.mxu0 %v6009_v20 }
 0x37d   : > { %5727 = vmatprep.subr.bf16.mxu0 %v6010_v21 }
 0x380   : > { %5728 = vmatpush3.bf16.msra.mxu0 %v6010_v21 }
 0x381   : > { %5729 = vmatprep.subr.bf16.mxu0 %v6011_v22 }
 0x384   : > { %5730 = vmatpush3.bf16.msra.mxu0 %v6011_v22 }
 0x385   : > { %5731 = vmatprep.subr.bf16.mxu0 %v6012_v25 }
 0x388   : > { %5732 = vmatpush3.bf16.msra.mxu0 %v6012_v25 }
 0x389   : > { %5733 = vmatprep.subr.bf16.mxu0 %v6013_v27 }
 0x38c   : > { %5734 = vmatpush3.bf16.msra.mxu0 %v6013_v27 }
 0x38d   : > { %5735 = vmatprep.subr.bf16.mxu0 %v6014_v28 }
 0x390   : > { %5736 = vmatpush3.bf16.msra.mxu0 %v6014_v28  ;;  %v6076_v28 = vld [vmem:[%s7436_s10 + $0x114] ss:$8 sps:$4 sm:$0xff]  }
 0x391   : > { %5741 = vmatprep.subr.bf16.mxu0 %v6015_v29 }
 0x393   : > { %5738 = vmatmul.mubr.bf16.vlgmr.msra.gmra.mrb[44].mxu0 %v2717_v31 }
 0x394   : > { %5742 = vmatpush3.bf16.msra.mxu0 %v6015_v29  ;;  %5757 = vmatprep.mubr.bf16.mxu0 %v2837_v33  ;;  %v6074_v29 = vld [vmem:[%s7436_s10 + $0x110] ss:$8 sps:$4 sm:$0xff]  }
 0x395   : > { %5743 = vmatprep.subr.bf16.mxu0 %v6016_v32 }
 0x398   : > { %5744 = vmatpush3.bf16.msra.mxu0 %v6016_v32  ;;  %v6077_v32 = vld [vmem:[%s7436_s10 + $0x120] ss:$8 sps:$4 sm:$0xff]  }
 0x399   : > { %5745 = vmatprep.subr.bf16.mxu0 %v6017_v34 }
 0x39c   : > { %5746 = vmatpush3.bf16.msra.mxu0 %v6017_v34 }
 0x39d   : > { %5747 = vmatprep.subr.bf16.mxu0 %v6018_v35 }
 0x3a0   : > { %5748 = vmatpush3.bf16.msra.mxu0 %v6018_v35  ;;  %v6082_v35 = vld [vmem:[%s7436_s10 + $0x134] ss:$8 sps:$4 sm:$0xff]  }
 0x3a1   : > { %5749 = vmatprep.subr.bf16.mxu0 %v6019_v57 }
 0x3a4   : > { %5750 = vmatpush3.bf16.msra.mxu0 %v6019_v57  ;;  %v6080_v57 = vld [vmem:[%s7436_s10 + $0x130] ss:$8 sps:$4 sm:$0xff]  }
 0x3a5   : > { %5751 = vmatprep.subr.bf16.mxu0 %v6020_v15 }
 0x3a8   : > { %5752 = vmatpush3.bf16.msra.mxu0 %v6020_v15  ;;  %v6085_v15 = vld [vmem:[%s7436_s10 + $0x144] ss:$8 sps:$4 sm:$0xff]  }
 0x3a9   : > { %5753 = vmatprep.subr.bf16.mxu0 %v6021_v36 }
 0x3ac   : > { %5754 = vmatpush3.bf16.msra.mxu0 %v6021_v36  ;;  %v6083_v36 = vld [vmem:[%s7436_s10 + $0x140] ss:$8 sps:$4 sm:$0xff]  }
 0x3ad   : > { %5755 = vmatprep.subr.bf16.mxu0 %v6022_v37 }
 0x3b0   : > { %5756 = vmatpush3.bf16.msra.mxu0 %v6022_v37  ;;  %v6088_v37 = vld [vmem:[%s7436_s10 + $0x154] ss:$8 sps:$4 sm:$0xff]  }
 0x3b1   : > { %3108 = vmatprep.subr.bf16.mxu0 %v6028_v38  ;;  %v6086_v38 = vld [vmem:[%s7436_s10 + $0x150] ss:$8 sps:$4 sm:$0xff]  }
 0x3b3   : > { %5758 = vmatmul.mubr.bf16.vlgmr.msra.gmra.mrb[44].mxu0 %v2838_v41  ;;  %v6094_v41 = vld [vmem:[%s7436_s10 + $0x174] ss:$8 sps:$4 sm:$0xff]  }
 0x3b4   : > { %3109 = vmatpush1.bf16.msra.mxu0 %v6026_v40  ;;  %3140 = vmatprep.mubr.bf16.mxu0 %v6248_v5  ;;  %v6089_v40 = vld [vmem:[%s7436_s10 + $0x160] ss:$8 sps:$4 sm:$0xff]  }
 0x3b5   : > { %3110 = vmatprep.subr.bf16.mxu0 %v6034_v42  ;;  %v6092_v42 = vld [vmem:[%s7436_s10 + $0x170] ss:$8 sps:$4 sm:$0xff]  }
 0x3b8   : > { %3111 = vmatpush1.bf16.msra.mxu0 %v6032_v43  ;;  %v6097_v43 = vld [vmem:[%s7436_s10 + $0x184] ss:$8 sps:$4 sm:$0xff]  }
 0x3b9   : > { %3112 = vmatprep.subr.bf16.mxu0 %v6040_v44 }
 0x3bc   : > { %3113 = vmatpush1.bf16.msra.mxu0 %v6038_v45 }
 0x3bd   : > { %3114 = vmatprep.subr.bf16.mxu0 %v6046_v46  ;;  %v6095_v46 = vld [vmem:[%s7436_s10 + $0x180] ss:$8 sps:$4 sm:$0xff]  }
 0x3c0   : > { %3115 = vmatpush1.bf16.msra.mxu0 %v6044_v47 }
 0x3c1   : > { %3116 = vmatprep.subr.bf16.mxu0 %v6052_v50  ;;  %v6103_v50 = vld [vmem:[%s7436_s10 + $0x1a4] ss:$8 sps:$4 sm:$0xff]  }
 0x3c4   : > { %3117 = vmatpush1.bf16.msra.mxu0 %v6050_v51 }
 0x3c5   : > { %3118 = vmatprep.subr.bf16.mxu0 %v6058_v54  ;;  %v6106_v54 = vld [vmem:[%s7436_s10 + $0x1b4] ss:$8 sps:$4 sm:$0xff]  }
 0x3c8   : > { %3119 = vmatpush1.bf16.msra.mxu0 %v6056_v55  ;;  %v6104_v55 = vld [vmem:[%s7436_s10 + $0x1b0] ss:$8 sps:$4 sm:$0xff]  }
 0x3c9   : > { %3120 = vmatprep.subr.bf16.mxu0 %v6064_v58  ;;  %v6107_v58 = vld [vmem:[%s7436_s10 + $0x1c0] ss:$8 sps:$4 sm:$0xff]  }
 0x3cc   : > { %3121 = vmatpush1.bf16.msra.mxu0 %v6062_v60  ;;  %v6110_v60 = vld [vmem:[%s7436_s10 + $0x1d0] ss:$8 sps:$4 sm:$0xff]  }
 0x3cd   : > { %3122 = vmatprep.subr.bf16.mxu0 %v6070_v62  ;;  %v6113_v62 = vld [vmem:[%s7436_s10 + $0x1e0] ss:$8 sps:$4 sm:$0xff]  }
 0x3d0   : > { %3123 = vmatpush1.bf16.msra.mxu0 %v6068_v0  ;;  %v6116_v0 = vld [vmem:[%s7436_s10 + $0x1f0] ss:$8 sps:$4 sm:$0xff]  }
 0x486   : > { %v5759_v2 = vpop.f32.mrb[44].mxu0 }
 0x487   : > { %v2964_v4 = vmul.f32 %v5759_v2, %v4986_v24  ;;  %v2938_v6 = vpop.f32.mrb[45].mxu0 }
 0x488   : > { %v2962_v26 = vmul.f32 %v4986_v24, %v2938_v6  ;;  %v5760_v7 = vpop.f32.mrb[46].mxu0  ;;  %v6124_v6 = vld [vmem:[%s7436_s10 + $0x214] ss:$8 sps:$4 sm:$0xff]  }
 0x489   : > { %v2974_v8 = vadd.f32 %v4987_v3, %v2964_v4  ;;  %v2941_v9 = vpop.f32.mrb[47].mxu0  ;;  %v6127_v7 = vld [vmem:[%s7436_s10 + $0x224] ss:$8 sps:$4 sm:$0xff]  }
 0x48a   : > { %v2972_v10 = vadd.f32 %v4987_v3, %v2962_v26  ;;  %v2963_v11 = vmul.f32 %v4986_v24, %v2941_v9  ;;  %v6122_v26 = vld [vmem:[%s7436_s10 + $0x210] ss:$8 sps:$4 sm:$0xff]   ;;  %v6125_v9 = vld [vmem:[%s7436_s10 + $0x220] ss:$8 sps:$4 sm:$0xff]  }
 0x48b   : > { %v2977_v12 = vmax.f32 %v2974_v8, 0.0 }
 0x48c   : > { %v2975_v13 = vmax.f32 %v2972_v10, 0.0  ;;  %v2973_v14 = vadd.f32 %v4987_v3, %v2963_v11  ;;  %v6119_v3 = vld [vmem:[%s7436_s10 + $0x200] ss:$8 sps:$4 sm:$0xff]   ;;  %v6130_v11 = vld [vmem:[%s7436_s10 + $0x234] ss:$8 sps:$4 sm:$0xff]  }
 0x48d   : > { %2984 = vst [vmem:[#allocation4 + $0x14] sm:$0x1f] %v2977_v12  ;;  %v6128_v12 = vld [vmem:[%s7436_s10 + $0x230] ss:$8 sps:$4 sm:$0xff]  }
 0x48e   : > { %2982 = vst [vmem:[#allocation4 + $0x4] sm:$0xff] %v2975_v13  ;;  %v2976_v16 = vmax.f32 %v2973_v14, 0.0  ;;  %v6131_v14 = vld [vmem:[%s7436_s10 + $0x240] ss:$8 sps:$4 sm:$0xff]  }
 0x490   : > { %2983 = vst [vmem:[#allocation4 + $0xc] sm:$0xff] %v2976_v16  ;;  %v6998_v17 = vpack.c.bf16 %v2976_v16, %v2975_v13  ;;  %v6133_v13 = vld [vmem:[%s7436_s10 + $0x244] ss:$8 sps:$4 sm:$0xff]   ;;  %v6136_v16 = vld [vmem:[%s7436_s10 + $0x254] ss:$8 sps:$4 sm:$0xff]  }
 0x495   : > { %v3006_v19 = vld [vmem:[#allocation4 + $0x1] sm:$0xff] }
 0x496   : > { %v2985_v21 = vld [vmem:[#allocation4] sm:$0xff] }
 0x497   : > { %v3007_v20 = vld [vmem:[#allocation4 + $0x9] sm:$0xff]  ;;  %v3008_v23 = vld [vmem:[#allocation4 + $0x11] sm:$0x1f] }
 0x498   : > { %v7003_v22 = vld [vmem:[#allocation4 + $0x8] sm:$0xff]  ;;  %v3009_v25 = vpack.c.bf16 %v3007_v20, %v3006_v19  ;;  %v2987_v31 = vld [vmem:[#allocation4 + $0x10] sm:$0x1f]  ;;  %v3010_v33 = vpack.c.bf16 %v3008_v23, %v3008_v23 }
 0x499   : > { %v2988_v27 = vpack.c.bf16 %v7003_v22, %v2985_v21  ;;  %v2989_v34 = vpack.c.bf16 %v2987_v31, %v2987_v31  ;;  %v3291_v44 = vld [vmem:[#allocation4 + $0xa] sm:$0xff]  ;;  %v3290_v45 = vld [vmem:[#allocation4 + $0x2] sm:$0xff]  ;;  %v3292_v51 = vld [vmem:[#allocation4 + $0x12] sm:$0x1f] }
 0x49a   : > { %3141 = vmatmul.mubr.bf16.vlgmr.msra.gmra.mrb[48].mxu0 %v3009_v25  ;;  %v3293_v47 = vpack.c.bf16 %v3291_v44, %v3290_v45  ;;  %v3294_v53 = vpack.c.bf16 %v3292_v51, %v3292_v51  ;;  %v3450_v24 = vld [vmem:[#allocation4 + $0xb] sm:$0xff]  ;;  %v3449_v2 = vld [vmem:[#allocation4 + $0x3] sm:$0xff]  ;;  %v3451_v8 = vld [vmem:[#allocation4 + $0x13] sm:$0x1f] }
 0x49b   : > { %3272 = vmatmul.mubr.bf16.vlgmr.msra.gmra.mrb[4].mxu1 %v2988_v27  ;;  %3150 = vmatprep.mubr.bf16.mxu0 %v6248_v5  ;;  %v3452_v4 = vpack.c.bf16 %v3450_v24, %v3449_v2  ;;  %v3453_v10 = vpack.c.bf16 %v3451_v8, %v3451_v8  ;;  %v6139_v19 = vld [vmem:[%s7436_s10 + $0x264] ss:$8 sps:$4 sm:$0xff]   ;;  %v6137_v20 = vld [vmem:[%s7436_s10 + $0x260] ss:$8 sps:$4 sm:$0xff]   ;;  %v6142_v21 = vld [vmem:[%s7436_s10 + $0x274] ss:$8 sps:$4 sm:$0xff]  }
 0x49c   : > { %3393 = vmatpush1.bf16.msra.mxu1 %v6071_v18  ;;  %3281 = vmatprep.mubr.bf16.mxu1 %v6248_v5  ;;  %v6134_v18 = vld [vmem:[%s7436_s10 + $0x250] ss:$8 sps:$4 sm:$0xff]   ;;  %v6145_v27 = vld [vmem:[%s7436_s10 + $0x284] ss:$8 sps:$4 sm:$0xff]   ;;  %v6167_v44 = vld [vmem:[%s7436_s10 + $0x300] ss:$8 sps:$4 sm:$0xff]  }
 0x49d   : > { %3394 = vmatprep.subr.bf16.mxu1 %v6076_v28  ;;  %v6140_v25 = vld [vmem:[%s7436_s10 + $0x270] ss:$8 sps:$4 sm:$0xff]   ;;  %v6143_v28 = vld [vmem:[%s7436_s10 + $0x280] ss:$8 sps:$4 sm:$0xff]   ;;  %v6151_v23 = vld [vmem:[%s7436_s10 + $0x2a4] ss:$8 sps:$4 sm:$0xff]  }
 0x49e   : > { %v3610_v31 = vld [vmem:[#allocation4 + $0x14] sm:$0x1f]  ;;  %v6191_v24 = vld [vmem:[%s7436_s10 + $0x380] ss:$8 sps:$4 sm:$0xff]  }
 0x4a0   : > { %3395 = vmatpush1.bf16.msra.mxu1 %v6074_v29  ;;  %v6148_v29 = vld [vmem:[%s7436_s10 + $0x294] ss:$8 sps:$4 sm:$0xff]  }
 0x4a1   : > { %3396 = vmatprep.subr.bf16.mxu1 %v6079_v30  ;;  %v6146_v30 = vld [vmem:[%s7436_s10 + $0x290] ss:$8 sps:$4 sm:$0xff]  }
 0x4a2   : > { %3151 = vmatmul.mubr.bf16.gmra.mrb[52].mxu0 %v3010_v33  ;;  %v3612_v33 = vpack.c.bf16 %v3610_v31, %v3610_v31  ;;  %v6223_v31 = vld [vmem:[%s7436_s10 + $0x424] ss:$8 sps:$4 sm:$0xff]  }
 0x4a3   : > { %3282 = vmatmul.mubr.bf16.gmra.mrb[8].mxu1 %v2989_v34  ;;  %v6152_v34 = vld [vmem:[%s7436_s10 + $0x2b0] ss:$8 sps:$4 sm:$0xff]  }
 0x4a4   : > { %3397 = vmatpush1.bf16.msra.mxu1 %v6077_v32  ;;  %3424 = vmatprep.mubr.bf16.mxu1 %v6248_v5  ;;  %v6149_v32 = vld [vmem:[%s7436_s10 + $0x2a0] ss:$8 sps:$4 sm:$0xff]  }
 0x4a5   : > { %3398 = vmatprep.subr.bf16.mxu1 %v6082_v35  ;;  %v6157_v35 = vld [vmem:[%s7436_s10 + $0x2c4] ss:$8 sps:$4 sm:$0xff]  }
 0x4a8   : > { %3399 = vmatpush1.bf16.msra.mxu1 %v6080_v57  ;;  %v6155_v57 = vld [vmem:[%s7436_s10 + $0x2c0] ss:$8 sps:$4 sm:$0xff]  }
 0x4a9   : > { %3400 = vmatprep.subr.bf16.mxu1 %v6085_v15  ;;  %v6160_v15 = vld [vmem:[%s7436_s10 + $0x2d4] ss:$8 sps:$4 sm:$0xff]  }
 0x4ac   : > { %3401 = vmatpush1.bf16.msra.mxu1 %v6083_v36  ;;  %v6158_v36 = vld [vmem:[%s7436_s10 + $0x2d0] ss:$8 sps:$4 sm:$0xff]  }
 0x4ad   : > { %3402 = vmatprep.subr.bf16.mxu1 %v6088_v37  ;;  %v6163_v37 = vld [vmem:[%s7436_s10 + $0x2e4] ss:$8 sps:$4 sm:$0xff]  }
 0x4b0   : > { %3403 = vmatpush1.bf16.msra.mxu1 %v6086_v38  ;;  %v6161_v38 = vld [vmem:[%s7436_s10 + $0x2e0] ss:$8 sps:$4 sm:$0xff]  }
 0x4b1   : > { %3404 = vmatprep.subr.bf16.mxu1 %v6091_v39  ;;  %v6166_v39 = vld [vmem:[%s7436_s10 + $0x2f4] ss:$8 sps:$4 sm:$0xff]  }
 0x4b4   : > { %3405 = vmatpush1.bf16.msra.mxu1 %v6089_v40  ;;  %v6164_v40 = vld [vmem:[%s7436_s10 + $0x2f0] ss:$8 sps:$4 sm:$0xff]  }
 0x4b5   : > { %3406 = vmatprep.subr.bf16.mxu1 %v6094_v41  ;;  %v6169_v41 = vld [vmem:[%s7436_s10 + $0x304] ss:$8 sps:$4 sm:$0xff]  }
 0x4b8   : > { %3407 = vmatpush1.bf16.msra.mxu1 %v6092_v42  ;;  %v3767_v42 = vld [vmem:[#allocation4 + $0x5] sm:$0xff] }
 0x4b9   : > { %3551 = vmatprep.subr.bf16.mxu1 %v6097_v43  ;;  %v3768_v43 = vld [vmem:[#allocation4 + $0xd] sm:$0xff] }
 0x4ba   : > { %v3770_v45 = vpack.c.bf16 %v3768_v43, %v3767_v42  ;;  %v6233_v42 = vld [vmem:[%s7436_s10 + $0x460] ss:$8 sps:$4 sm:$0xff]  }
 0x4bb   : > { %3425 = vmatmul.mubr.bf16.vlgmr.msra.gmra.mrb[4].mxu1 %v3293_v47  ;;  %v6170_v47 = vld [vmem:[%s7436_s10 + $0x310] ss:$8 sps:$4 sm:$0xff]  }
 0x4bc   : > { %3552 = vmatpush1.bf16.msra.mxu1 %v6095_v46  ;;  %3434 = vmatprep.mubr.bf16.mxu1 %v6248_v5  ;;  %v6172_v46 = vld [vmem:[%s7436_s10 + $0x314] ss:$8 sps:$4 sm:$0xff]  }
 0x4bd   : > { %3553 = vmatprep.subr.bf16.mxu1 %v6100_v48  ;;  %v6175_v48 = vld [vmem:[%s7436_s10 + $0x324] ss:$8 sps:$4 sm:$0xff]  }
 0x4c0   : > { %3554 = vmatpush1.bf16.msra.mxu1 %v6098_v49  ;;  %v3769_v49 = vld [vmem:[#allocation4 + $0x15] sm:$0x1f] }
 0x4c1   : > { %3555 = vmatprep.subr.bf16.mxu1 %v6103_v50  ;;  %v6173_v50 = vld [vmem:[%s7436_s10 + $0x320] ss:$8 sps:$4 sm:$0xff]   ;;  %v3771_v51 = vpack.c.bf16 %v3769_v49, %v3769_v49 }
 0x4c3   : > { %3435 = vmatmul.mubr.bf16.gmra.mrb[8].mxu1 %v3294_v53  ;;  %v6176_v53 = vld [vmem:[%s7436_s10 + $0x330] ss:$8 sps:$4 sm:$0xff]  }
 0x4c4   : > { %3556 = vmatpush1.bf16.msra.mxu1 %v6101_v52  ;;  %3583 = vmatprep.mubr.bf16.mxu1 %v6248_v5  ;;  %v6178_v52 = vld [vmem:[%s7436_s10 + $0x334] ss:$8 sps:$4 sm:$0xff]  }
 0x4c5   : > { %3557 = vmatprep.subr.bf16.mxu1 %v6106_v54  ;;  %v6181_v54 = vld [vmem:[%s7436_s10 + $0x344] ss:$8 sps:$4 sm:$0xff]  }
 0x4c8   : > { %3558 = vmatpush1.bf16.msra.mxu1 %v6104_v55  ;;  %v6179_v55 = vld [vmem:[%s7436_s10 + $0x340] ss:$8 sps:$4 sm:$0xff]  }
 0x4c9   : > { %3559 = vmatprep.subr.bf16.mxu1 %v6109_v56  ;;  %v6184_v56 = vld [vmem:[%s7436_s10 + $0x354] ss:$8 sps:$4 sm:$0xff]  }
 0x4cc   : > { %3560 = vmatpush1.bf16.msra.mxu1 %v6107_v58  ;;  %v6182_v58 = vld [vmem:[%s7436_s10 + $0x350] ss:$8 sps:$4 sm:$0xff]  }
 0x4cd   : > { %3561 = vmatprep.subr.bf16.mxu1 %v6112_v59  ;;  %v6187_v59 = vld [vmem:[%s7436_s10 + $0x364] ss:$8 sps:$4 sm:$0xff]  }
 0x4d0   : > { %3562 = vmatpush1.bf16.msra.mxu1 %v6110_v60  ;;  %v6185_v60 = vld [vmem:[%s7436_s10 + $0x360] ss:$8 sps:$4 sm:$0xff]  }
 0x4d1   : > { %3563 = vmatprep.subr.bf16.mxu1 %v6115_v61  ;;  %v6190_v61 = vld [vmem:[%s7436_s10 + $0x374] ss:$8 sps:$4 sm:$0xff]  }
 0x4d4   : > { %3564 = vmatpush1.bf16.msra.mxu1 %v6113_v62  ;;  %v6188_v62 = vld [vmem:[%s7436_s10 + $0x370] ss:$8 sps:$4 sm:$0xff]  }
 0x4d5   : > { %3565 = vmatprep.subr.bf16.mxu1 %v6118_v63  ;;  %v6193_v63 = vld [vmem:[%s7436_s10 + $0x384] ss:$8 sps:$4 sm:$0xff]  }
 0x4d8   : > { %3566 = vmatpush1.bf16.msra.mxu1 %v6116_v0  ;;  %v3926_v0 = vld [vmem:[#allocation4 + $0x6] sm:$0xff] }
 0x4d9   : > { %3710 = vmatprep.subr.bf16.mxu1 %v6121_v1  ;;  %v3927_v1 = vld [vmem:[#allocation4 + $0xe] sm:$0xff] }
 0x4da   : > { %v3929_v2 = vpack.c.bf16 %v3927_v1, %v3926_v0 }
 0x4db   : > { %3584 = vmatmul.mubr.bf16.vlgmr.msra.gmra.mrb[4].mxu1 %v3452_v4  ;;  %v6194_v4 = vld [vmem:[%s7436_s10 + $0x390] ss:$8 sps:$4 sm:$0xff]  }
 0x4dc   : > { %3711 = vmatpush1.bf16.msra.mxu1 %v6119_v3  ;;  %3593 = vmatprep.mubr.bf16.mxu1 %v6248_v5  ;;  %v6196_v3 = vld [vmem:[%s7436_s10 + $0x394] ss:$8 sps:$4 sm:$0xff]  }
 0x4dd   : > { %3712 = vmatprep.subr.bf16.mxu1 %v6124_v6  ;;  %v6199_v6 = vld [vmem:[%s7436_s10 + $0x3a4] ss:$8 sps:$4 sm:$0xff]  }
 0x4e0   : > { %3713 = vmatpush1.bf16.msra.mxu1 %v6122_v26  ;;  %v3928_v26 = vld [vmem:[#allocation4 + $0x16] sm:$0x1f] }
 0x4e1   : > { %3714 = vmatprep.subr.bf16.mxu1 %v6127_v7  ;;  %v6197_v7 = vld [vmem:[%s7436_s10 + $0x3a0] ss:$8 sps:$4 sm:$0xff]   ;;  %v3930_v8 = vpack.c.bf16 %v3928_v26, %v3928_v26 }
 0x4e3   : > { %3594 = vmatmul.mubr.bf16.gmra.mrb[8].mxu1 %v3453_v10  ;;  %v6200_v10 = vld [vmem:[%s7436_s10 + $0x3b0] ss:$8 sps:$4 sm:$0xff]  }
 0x4e4   : > { %3715 = vmatpush1.bf16.msra.mxu1 %v6125_v9  ;;  %3742 = vmatprep.mubr.bf16.mxu1 %v6248_v5  ;;  %v6202_v9 = vld [vmem:[%s7436_s10 + $0x3b4] ss:$8 sps:$4 sm:$0xff]  }
 0x4e5   : > { %3716 = vmatprep.subr.bf16.mxu1 %v6130_v11  ;;  %v6205_v11 = vld [vmem:[%s7436_s10 + $0x3c4] ss:$8 sps:$4 sm:$0xff]  }
 0x4e8   : > { %3717 = vmatpush1.bf16.msra.mxu1 %v6128_v12  ;;  %v6203_v12 = vld [vmem:[%s7436_s10 + $0x3c0] ss:$8 sps:$4 sm:$0xff]  }
 0x4e9   : > { %3718 = vmatprep.subr.bf16.mxu1 %v6133_v13  ;;  %v6208_v13 = vld [vmem:[%s7436_s10 + $0x3d4] ss:$8 sps:$4 sm:$0xff]  }
 0x4ec   : > { %3719 = vmatpush1.bf16.msra.mxu1 %v6131_v14  ;;  %v6206_v14 = vld [vmem:[%s7436_s10 + $0x3d0] ss:$8 sps:$4 sm:$0xff]  }
 0x4ed   : > { %3720 = vmatprep.subr.bf16.mxu1 %v6136_v16  ;;  %v6211_v16 = vld [vmem:[%s7436_s10 + $0x3e4] ss:$8 sps:$4 sm:$0xff]  }
 0x4f0   : > { %3721 = vmatpush1.bf16.msra.mxu1 %v6134_v18  ;;  %v6209_v18 = vld [vmem:[%s7436_s10 + $0x3e0] ss:$8 sps:$4 sm:$0xff]  }
 0x4f1   : > { %3722 = vmatprep.subr.bf16.mxu1 %v6139_v19  ;;  %v6214_v19 = vld [vmem:[%s7436_s10 + $0x3f4] ss:$8 sps:$4 sm:$0xff]  }
 0x4f4   : > { %3723 = vmatpush1.bf16.msra.mxu1 %v6137_v20  ;;  %v6212_v20 = vld [vmem:[%s7436_s10 + $0x3f0] ss:$8 sps:$4 sm:$0xff]  }
 0x4f5   : > { %3724 = vmatprep.subr.bf16.mxu1 %v6142_v21  ;;  %v6217_v21 = vld [vmem:[%s7436_s10 + $0x404] ss:$8 sps:$4 sm:$0xff]  }
 0x4f8   : > { %3725 = vmatpush1.bf16.msra.mxu1 %v6140_v25  ;;  %v4085_v25 = vld [vmem:[#allocation4 + $0x7] sm:$0xff] }
 0x4f9   : > { %3869 = vmatprep.subr.bf16.mxu1 %v6145_v27  ;;  %v4086_v27 = vld [vmem:[#allocation4 + $0xf] sm:$0xff] }
 0x4fb   : > { %3743 = vmatmul.mubr.bf16.vlgmr.msra.gmra.mrb[4].mxu1 %v6998_v17  ;;  %v6154_v17 = vld [vmem:[%s7436_s10 + $0x2b4] ss:$8 sps:$4 sm:$0xff]  }
 0x4fc   : > { %3870 = vmatpush1.bf16.msra.mxu1 %v6143_v28  ;;  %3752 = vmatprep.mubr.bf16.mxu1 %v6248_v5  ;;  %v6215_v28 = vld [vmem:[%s7436_s10 + $0x400] ss:$8 sps:$4 sm:$0xff]  }
 0x4fd   : > { %3871 = vmatprep.subr.bf16.mxu1 %v6148_v29  ;;  %v4088_v29 = vpack.c.bf16 %v4086_v27, %v4085_v25 }
 0x500   : > { %3872 = vmatpush1.bf16.msra.mxu1 %v6146_v30  ;;  %v6220_v30 = vld [vmem:[%s7436_s10 + $0x414] ss:$8 sps:$4 sm:$0xff]  }
 0x501   : > { %3873 = vmatprep.subr.bf16.mxu1 %v6151_v23  ;;  %v6218_v23 = vld [vmem:[%s7436_s10 + $0x410] ss:$8 sps:$4 sm:$0xff]  }
 0x503   : > { %3753 = vmatmul.mubr.bf16.gmra.mrb[8].mxu1 %v3612_v33  ;;  %v6221_v33 = vld [vmem:[%s7436_s10 + $0x420] ss:$8 sps:$4 sm:$0xff]  }
 0x504   : > { %3874 = vmatpush1.bf16.msra.mxu1 %v6149_v32  ;;  %3901 = vmatprep.mubr.bf16.mxu1 %v6248_v5  ;;  %v4087_v32 = vld [vmem:[#allocation4 + $0x17] sm:$0x1f] }
 0x505   : > { %3875 = vmatprep.subr.bf16.mxu1 %v6154_v17  ;;  %v4089_v17 = vpack.c.bf16 %v4087_v32, %v4087_v32 }
 0x508   : > { %3876 = vmatpush1.bf16.msra.mxu1 %v6152_v34  ;;  %v6226_v34 = vld [vmem:[%s7436_s10 + $0x434] ss:$8 sps:$4 sm:$0xff]  }
 0x509   : > { %3877 = vmatprep.subr.bf16.mxu1 %v6157_v35  ;;  %v6224_v35 = vld [vmem:[%s7436_s10 + $0x430] ss:$8 sps:$4 sm:$0xff]  }
 0x50c   : > { %3878 = vmatpush1.bf16.msra.mxu1 %v6155_v57  ;;  %v6229_v57 = vld [vmem:[%s7436_s10 + $0x444] ss:$8 sps:$4 sm:$0xff]  }
 0x50d   : > { %3879 = vmatprep.subr.bf16.mxu1 %v6160_v15  ;;  %v6227_v15 = vld [vmem:[%s7436_s10 + $0x440] ss:$8 sps:$4 sm:$0xff]  }
 0x510   : > { %3880 = vmatpush1.bf16.msra.mxu1 %v6158_v36  ;;  %v6232_v36 = vld [vmem:[%s7436_s10 + $0x454] ss:$8 sps:$4 sm:$0xff]  }
 0x511   : > { %3881 = vmatprep.subr.bf16.mxu1 %v6163_v37  ;;  %v6230_v37 = vld [vmem:[%s7436_s10 + $0x450] ss:$8 sps:$4 sm:$0xff]  }
 0x514   : > { %3882 = vmatpush1.bf16.msra.mxu1 %v6161_v38  ;;  %v6235_v38 = vld [vmem:[%s7436_s10 + $0x464] ss:$8 sps:$4 sm:$0xff]  }
 0x515   : > { %3883 = vmatprep.subr.bf16.mxu1 %v6166_v39 }
 0x518   : > { %3884 = vmatpush1.bf16.msra.mxu1 %v6164_v40 }
 0x519   : > { %4028 = vmatprep.subr.bf16.mxu1 %v6169_v41 }
 0x51b   : > { %3902 = vmatmul.mubr.bf16.vlgmr.msra.gmra.mrb[4].mxu1 %v3770_v45  ;;  %v6236_v45 = vld [vmem:[%s7436_s10 + $0x470] ss:$8 sps:$4 sm:$0xff]  }
 0x51c   : > { %4029 = vmatpush1.bf16.msra.mxu1 %v6167_v44  ;;  %3911 = vmatprep.mubr.bf16.mxu1 %v6248_v5  ;;  %v6238_v44 = vld [vmem:[%s7436_s10 + $0x474] ss:$8 sps:$4 sm:$0xff]  }
 0x51d   : > { %4030 = vmatprep.subr.bf16.mxu1 %v6172_v46 }
 0x520   : > { %4031 = vmatpush1.bf16.msra.mxu1 %v6170_v47  ;;  %v4245_v47 = vld [vmem:[#allocation4 + $0x10] sm:$0xff] }
 0x521   : > { %4032 = vmatprep.subr.bf16.mxu1 %v6175_v48 }
 0x523   : > { %3912 = vmatmul.mubr.bf16.gmra.mrb[8].mxu1 %v3771_v51  ;;  %v4247_v51 = vpack.c.bf16 %v4245_v47, %v7003_v22  ;;  %v4421_v22 = vld [vmem:[%s7438_s12] sm:$0x3] }
 0x524   : > { %4033 = vmatpush1.bf16.msra.mxu1 %v6173_v50  ;;  %4060 = vmatprep.mubr.bf16.mxu1 %v6248_v5 }
 0x525   : > { %4034 = vmatprep.subr.bf16.mxu1 %v6178_v52  ;;  %v4246_v52 = vld [vmem:[#allocation4 + $0x18] sm:$0x1f] }
 0x528   : > { %4035 = vmatpush1.bf16.msra.mxu1 %v6176_v53  ;;  %v4248_v53 = vpack.c.bf16 %v4246_v52, %v4246_v52 }
 0x529   : > { %4036 = vmatprep.subr.bf16.mxu1 %v6181_v54  ;;  %v4405_v54 = vlaneseq }
 0x52b   : > { %vm4575_vm11 = vcmp.lt.s32.totalorder %v4405_v54, 256 }
 0x52c   : > { %4037 = vmatpush1.bf16.msra.mxu1 %v6179_v55  ;;  %v7359_v55 = vshrl.u32 %v4405_v54, 7 }
 0x52d   : > { %4038 = vmatprep.subr.bf16.mxu1 %v6184_v56 }
 0x52e   : > { %v4407_v56 = vsub.s32 0, %v7359_v55 }
 0x530   : > { %4039 = vmatpush1.bf16.msra.mxu1 %v6182_v58  ;;  %v4403_v58 = vld [vmem:[%s7437_s11] sm:$0x3] }
 0x531   : > { %4040 = vmatprep.subr.bf16.mxu1 %v6187_v59  ;;  %v4411_v59 = vsub.s32 1, %v7359_v55 }
 0x534   : > { %4041 = vmatpush1.bf16.msra.mxu1 %v6185_v60 }
 0x535   : > { %4042 = vmatprep.subr.bf16.mxu1 %v6190_v61  ;;  %v7371_v61 = vrot.slane %v4403_v58, %v4411_v59 }
 0x538   : > { %4043 = vmatpush1.bf16.msra.mxu1 %v6188_v62 }
 0x539   : > { %4187 = vmatprep.subr.bf16.mxu1 %v6193_v63  ;;  %v7373_v63 = vrot.slane %v4421_v22, %v4407_v56 }
 0x53b   : > { %4061 = vmatmul.mubr.bf16.vlgmr.msra.gmra.mrb[4].mxu1 %v3929_v2 }
 0x53c   : > { %4188 = vmatpush1.bf16.msra.mxu1 %v6191_v24  ;;  %4070 = vmatprep.mubr.bf16.mxu1 %v6248_v5  ;;  %v7375_v24 = vrot.slane %v4421_v22, %v4411_v59 }
 0x53d   : > { %4189 = vmatprep.subr.bf16.mxu1 %v6196_v3 }
 0x540   : > { %4190 = vmatpush1.bf16.msra.mxu1 %v6194_v4 }
 0x541   : > { %4191 = vmatprep.subr.bf16.mxu1 %v6199_v6 }
 0x543   : > { %4071 = vmatmul.mubr.bf16.gmra.mrb[8].mxu1 %v3930_v8 }
 0x544   : > { %4192 = vmatpush1.bf16.msra.mxu1 %v6197_v7  ;;  %4219 = vmatprep.mubr.bf16.mxu1 %v6248_v5 }
 0x545   : > { %4193 = vmatprep.subr.bf16.mxu1 %v6202_v9 }
 0x548   : > { %4194 = vmatpush1.bf16.msra.mxu1 %v6200_v10 }
 0x549   : > { %4195 = vmatprep.subr.bf16.mxu1 %v6205_v11 }
 0x54c   : > { %4196 = vmatpush1.bf16.msra.mxu1 %v6203_v12 }
 0x54d   : > { %4197 = vmatprep.subr.bf16.mxu1 %v6208_v13 }
 0x550   : > { %4198 = vmatpush1.bf16.msra.mxu1 %v6206_v14 }
 0x551   : > { %4199 = vmatprep.subr.bf16.mxu1 %v6211_v16 }
 0x554   : > { %4200 = vmatpush1.bf16.msra.mxu1 %v6209_v18 }
 0x555   : > { %4201 = vmatprep.subr.bf16.mxu1 %v6214_v19 }
 0x558   : > { %4202 = vmatpush1.bf16.msra.mxu1 %v6212_v20 }
 0x559   : > { %4346 = vmatprep.subr.bf16.mxu1 %v6217_v21 }
 0x55b   : > { %4220 = vmatmul.mubr.bf16.vlgmr.msra.gmra.mrb[4].mxu1 %v4088_v29 }
 0x55c   : > { %4347 = vmatpush1.bf16.msra.mxu1 %v6215_v28  ;;  %4229 = vmatprep.mubr.bf16.mxu1 %v6248_v5 }
 0x55d   : > { %4348 = vmatprep.subr.bf16.mxu1 %v6220_v30 }
 0x560   : > { %4349 = vmatpush1.bf16.msra.mxu1 %v6218_v23 }
 0x561   : > { %4350 = vmatprep.subr.bf16.mxu1 %v6223_v31 }
 0x563   : > { %4230 = vmatmul.mubr.bf16.gmra.mrb[8].mxu1 %v4089_v17 }
 0x564   : > { %4351 = vmatpush1.bf16.msra.mxu1 %v6221_v33  ;;  %4378 = vmatprep.mubr.bf16.mxu1 %v6248_v5 }
 0x565   : > { %4352 = vmatprep.subr.bf16.mxu1 %v6226_v34 }
 0x568   : > { %4353 = vmatpush1.bf16.msra.mxu1 %v6224_v35 }
 0x569   : > { %4354 = vmatprep.subr.bf16.mxu1 %v6229_v57 }
 0x56c   : > { %4355 = vmatpush1.bf16.msra.mxu1 %v6227_v15 }
 0x56d   : > { %4356 = vmatprep.subr.bf16.mxu1 %v6232_v36  ;;  %v3142_v39 = vpop.f32.mrb[48].mxu0 }
 0x56e   : > { %v3144_v40 = vpop.f32.mrb[49].mxu0 }
 0x56f   : > { %v3146_v41 = vpop.f32.mrb[50].mxu0 }
 0x570   : > { %4357 = vmatpush1.bf16.msra.mxu1 %v6230_v37  ;;  %v3148_v43 = vpop.f32.mrb[51].mxu0 }
 0x571   : > { %4358 = vmatprep.subr.bf16.mxu1 %v6235_v38 }
 0x574   : > { %4359 = vmatpush1.bf16.msra.mxu1 %v6233_v42 }
 0x575   : > { %4360 = vmatprep.subr.bf16.mxu1 %v6238_v44  ;;  %v7352_v46 = vpop.f32.mrb[52].mxu0 }
 0x576   : > { %v7354_v48 = vpop.f32.mrb[53].mxu0 }
 0x577   : > { %v3156_v49 = vpop.f32.mrb[54].mxu0 }
 0x578   : > { %4361 = vmatpush1.bf16.msra.mxu1 %v6236_v45  ;;  %v3157_v50 = vpop.f32.mrb[55].mxu0 }
 0x57b   : > { %4379 = vmatmul.mubr.bf16.vlgmr.msra.gmra.mrb[4].mxu1 %v4247_v51 }
 0x57c   : > { %4388 = vmatprep.mubr.bf16.mxu1 %v6248_v5  ;;  %v7369_v5 = vrot.slane %v4403_v58, %v4407_v56 }
 0x583   : > { %4389 = vmatmul.mubr.bf16.gmra.mrb[8].mxu1 %v4248_v53 }
 0x64e   : > { %v4380_v60 = vpop.f32.mrb[4].mxu1 }
 0x64f   : > { %v5761_v62 = vadd.f32 %v4380_v60, %v3142_v39  ;;  %v4382_v0 = vpop.f32.mrb[5].mxu1 }
 0x650   : > { %v5762_v1 = vadd.f32 %v4382_v0, %v3144_v40  ;;  %v4384_v2 = vpop.f32.mrb[6].mxu1 }
 0x651   : > { %v4415_v3 = vmul.f32 %v5761_v62, %v7369_v5  ;;  %v5763_v4 = vadd.f32 %v4384_v2, %v3146_v41  ;;  %v4386_v6 = vpop.f32.mrb[7].mxu1 }
 0x652   : > { %v4416_v26 = vmul.f32 %v5762_v1, %v7371_v61  ;;  %v5764_v7 = vadd.f32 %v4386_v6, %v3148_v43 }
 0x653   : > { %v4433_v8 = vadd.f32 %v7373_v63, %v4415_v3  ;;  %v4417_v9 = vmul.f32 %v5763_v4, %v7369_v5 }
 0x654   : > { %v4434_v10 = vadd.f32 %v7375_v24, %v4416_v26  ;;  %v4418_v11 = vmul.f32 %v5764_v7, %v7371_v61 }
 0x655   : > { %v4439_v12 = vmax.f32 %v4433_v8, 0.0  ;;  %v4435_v13 = vadd.f32 %v7373_v63, %v4417_v9 }
 0x656   : > { %v4440_v14 = vmax.f32 %v4434_v10, 0.0  ;;  %v4436_v16 = vadd.f32 %v7375_v24, %v4418_v11  ;;  %v4390_v18 = vpop.f32.mrb[8].mxu1 }
 0x657   : > { %v4446_v19 = vsel %vm4445_vm7, %v4439_v12, -inf  ;;  %v4463_v20 = vsel %vm4462_vm8, %v4439_v12, -inf  ;;  %v4480_v21 = vsel %vm4479_vm9, %v4439_v12, -inf  ;;  %v7388_v25 = vmax.f32 %v4435_v13, 0.0  ;;  %v4392_v27 = vpop.f32.mrb[9].mxu1 }
 0x658   : > { %v4447_v28 = vrot.slane %v4446_v19, 4  ;;  %v4464_v29 = vrot.slane %v4463_v20, 4  ;;  %v4453_v30 = vsel %vm4445_vm7, %v4440_v14, -inf  ;;  %v4470_v23 = vsel %vm4462_vm8, %v4440_v14, -inf  ;;  %v4394_v31 = vpop.f32.mrb[10].mxu1 }
 0x659   : > { %v4454_v32 = vrot.slane %v4453_v30, 4  ;;  %v4471_v33 = vrot.slane %v4470_v23, 4  ;;  %v4489_v17 = vsel %vm4479_vm9, %v4440_v14, -inf  ;;  %v4481_v34 = vsel %vm4445_vm7, %v7388_v25, -inf  ;;  %v4395_v35 = vpop.f32.mrb[11].mxu1 }
 0x65a   : > { %v4448_v57 = vmax.f32 %v4446_v19, %v4447_v28  ;;  %v4465_v15 = vmax.f32 %v4463_v20, %v4464_v29  ;;  %v4482_v36 = vmax.f32 %v4480_v21, %v4481_v34  ;;  %v4500_v37 = vsel %vm4462_vm8, %v7388_v25, -inf }
 0x65b   : > { %v4455_v38 = vmax.f32 %v4453_v30, %v4454_v32  ;;  %v4472_v39 = vmax.f32 %v4470_v23, %v4471_v33  ;;  %v4501_v40 = vrot.slane %v4500_v37, 4  ;;  %v7397_v41 = vmax.f32 %v4436_v16, 0.0 }
 0x65c   : > { %v4449_v42 = vrot.slane %v4448_v57, 2  ;;  %v4466_v43 = vrot.slane %v4465_v15, 2  ;;  %v4483_v44 = vrot.slane %v4482_v36, 4  ;;  %v5765_v45 = vadd.f32 %v4390_v18, %v7352_v46 }
 0x65d   : > { %v4456_v47 = vrot.slane %v4455_v38, 2  ;;  %v4473_v49 = vrot.slane %v4472_v39, 2  ;;  %v4502_v50 = vmax.f32 %v4500_v37, %v4501_v40  ;;  %v4490_v51 = vsel %vm4445_vm7, %v7397_v41, -inf }
 0x65e   : > { %v4450_v52 = vmax.f32 %v4448_v57, %v4449_v42  ;;  %v4467_v53 = vmax.f32 %v4465_v15, %v4466_v43  ;;  %v4484_v56 = vmax.f32 %v4482_v36, %v4483_v44  ;;  %v4491_v58 = vmax.f32 %v4489_v17, %v4490_v51 }
 0x65f   : > { %v4457_v59 = vmax.f32 %v4455_v38, %v4456_v47  ;;  %v4474_v22 = vmax.f32 %v4472_v39, %v4473_v49  ;;  %v4503_v60 = vrot.slane %v4502_v50, 2  ;;  %v4507_v62 = vsel %vm4462_vm8, %v7397_v41, -inf }
 0x660   : > { %v4451_v0 = vrot.slane %v4450_v52, 1  ;;  %v4468_v1 = vrot.slane %v4467_v53, 1  ;;  %v4485_v2 = vrot.slane %v4484_v56, 2  ;;  %v4492_v46 = vrot.slane %v4491_v58, 4 }
 0x661   : > { %v4458_v3 = vrot.slane %v4457_v59, 1  ;;  %v4475_v4 = vrot.slane %v4474_v22, 1  ;;  %v4504_v6 = vmax.f32 %v4502_v50, %v4503_v60  ;;  %v4508_v26 = vrot.slane %v4507_v62, 4 }
 0x662   : > { %v4452_v7 = vmax.f32 %v4450_v52, %v4451_v0  ;;  %v4469_v8 = vmax.f32 %v4467_v53, %v4468_v1  ;;  %v4486_v9 = vmax.f32 %v4484_v56, %v4485_v2  ;;  %v4493_v10 = vmax.f32 %v4491_v58, %v4492_v46 }
 0x663   : > { %v4505_v11 = vrot.slane %v4504_v6, 1  ;;  %v4509_v12 = vmax.f32 %v4507_v62, %v4508_v26  ;;  %v4419_v16 = vmul.f32 %v5765_v45, %v7369_v5  ;;  %v4459_v19 = vmax.f32 %v4457_v59, %v4458_v3 }
 0x664   : > { %v4487_v13 = vrot.slane %v4486_v9, 1  ;;  %v4494_v14 = vrot.slane %v4493_v10, 2  ;;  %v4477_v18 = vadd.f32 %v4469_v8, %v4452_v7  ;;  %v4476_v20 = vmax.f32 %v4474_v22, %v4475_v4 }
 0x665   : > { %v4510_v21 = vrot.slane %v4509_v12, 2  ;;  %v4437_v30 = vadd.f32 %v7373_v63, %v4419_v16  ;;  %v5766_v23 = vadd.f32 %v4392_v27, %v7354_v48  ;;  %v4506_v31 = vmax.f32 %v4504_v6, %v4505_v11 }
 0x666   : > { %v4488_v28 = vmax.f32 %v4486_v9, %v4487_v13  ;;  %v4495_v29 = vmax.f32 %v4493_v10, %v4494_v14  ;;  %v4478_v57 = vadd.f32 %v4476_v20, %v4459_v19  ;;  %v4516_v15 = vsel %vm4479_vm9, %v7388_v25, -inf }
 0x667   : > { %v4511_v32 = vmax.f32 %v4509_v12, %v4510_v21  ;;  %v4443_v34 = vmax.f32 %v4437_v30, 0.0  ;;  %v4420_v35 = vmul.f32 %v5766_v23, %v7371_v61  ;;  %v4525_v47 = vsel %vm4479_vm9, %v7397_v41, -inf }
 0x668   : > { %v4498_v33 = vadd.f32 %v4488_v28, %v4477_v18  ;;  %v4496_v17 = vrot.slane %v4495_v29, 1  ;;  %v6250_v26 = vmov 1966171168  }
 0x669   : > { %v4512_v5 = vrot.slane %v4511_v32, 1  ;;  %v4517_v38 = vsel %vm4445_vm7, %v4443_v34, -inf  ;;  %v4537_v63 = vsel %vm4536_vm10, %v4443_v34, -inf  ;;  %v4438_v39 = vadd.f32 %v7375_v24, %v4420_v35 }
 0x66a   : > { %v4514_v36 = vadd.f32 %v4506_v31, %v4498_v33  ;;  %v4497_v37 = vmax.f32 %v4495_v29, %v4496_v17  ;;  %v4518_v48 = vmax.f32 %v4516_v15, %v4517_v38  ;;  %v4538_v27 = vrot.slane %v4537_v63, 4 }
 0x66b   : > { %v4513_v42 = vmax.f32 %v4511_v32, %v4512_v5  ;;  %v4444_v61 = vmax.f32 %v4438_v39, 0.0  ;;  %v4559_v7 = vunpack.c.l.s4 %v6250_v26 }
 0x66c   : > { %v4499_v40 = vadd.f32 %v4497_v37, %v4478_v57  ;;  %v4519_v43 = vrot.slane %v4518_v48, 4  ;;  %v4539_v44 = vmax.f32 %v4537_v63, %v4538_v27 }
 0x66d   : > { %v4526_v50 = vsel %vm4445_vm7, %v4444_v61, -inf  ;;  %v4544_v51 = vsel %vm4536_vm10, %v4444_v61, -inf  ;;  %v4560_v12 = vunpack.c.0.s8 %v4559_v7 }
 0x66e   : > { %v4515_v45 = vadd.f32 %v4513_v42, %v4499_v40  ;;  %v4520_v25 = vmax.f32 %v4518_v48, %v4519_v43  ;;  %v4540_v49 = vrot.slane %v4539_v44, 2  ;;  %v4527_v52 = vmax.f32 %v4525_v47, %v4526_v50 }
 0x66f   : > { %v4545_v53 = vrot.slane %v4544_v51, 4  ;;  %v4563_v19 = vsub.s32 %v4560_v12, %v7359_v55 }
 0x670   : > { %v4521_v56 = vrot.slane %v4520_v25, 2  ;;  %v4541_v58 = vmax.f32 %v4539_v44, %v4540_v49  ;;  %v4528_v24 = vrot.slane %v4527_v52, 4 }
 0x671   : > { %v4546_v59 = vmax.f32 %v4544_v51, %v4545_v53 }
 0x672   : > { %v4522_v22 = vmax.f32 %v4520_v25, %v4521_v56  ;;  %v4529_v60 = vmax.f32 %v4527_v52, %v4528_v24  ;;  %v4542_v1 = vrot.slane %v4541_v58, 1 }
 0x673   : > { %v4547_v62 = vrot.slane %v4546_v59, 2 }
 0x674   : > { %v4523_v0 = vrot.slane %v4522_v22, 1  ;;  %v4530_v2 = vrot.slane %v4529_v60, 2  ;;  %v4543_v6 = vmax.f32 %v4541_v58, %v4542_v1 }
 0x675   : > { %v4548_v46 = vmax.f32 %v4546_v59, %v4547_v62 }
 0x676   : > { %v4524_v41 = vmax.f32 %v4522_v22, %v4523_v0  ;;  %v4531_v3 = vmax.f32 %v4529_v60, %v4530_v2 }
 0x677   : > { %v4549_v9 = vrot.slane %v4548_v46, 1 }
 0x678   : > { %v4534_v4 = vadd.f32 %v4524_v41, %v4514_v36  ;;  %v4532_v8 = vrot.slane %v4531_v3, 1 }
 0x679   : > { %v4550_v14 = vmax.f32 %v4548_v46, %v4549_v9 }
 0x67a   : > { %v4551_v10 = vadd.f32 %v4543_v6, %v4534_v4  ;;  %v4533_v11 = vmax.f32 %v4531_v3, %v4532_v8 }
 0x67c   : > { %v4535_v13 = vadd.f32 %v4533_v11, %v4515_v45  ;;  %v4553_v16 = vmul.f32 0.16666667, %v4551_v10 }
 0x67e   : > { %v4552_v18 = vadd.f32 %v4550_v14, %v4535_v13 }
 0x680   : > { %v4554_v20 = vmul.f32 0.16666667, %v4552_v18 }
 0x682   : > { %v4557_v21 = vcombine.low %v4553_v16, %v4554_v20 }
 0x684   : > { %v4564_v28 = vrot.slane %v4557_v21, %v4563_v19 }
 0x686   : > { %v4571_v29 = vrot.slane %v4564_v28, %v4563_v19 }
 0x688   : > { %4577 = vst.msk [vmem:[%s438_s20] sm:$0x3] %vm4575_vm11, %v4571_v29 }
 0x689 PF: > { %s23_s25 = sadd.s32 1, %s6245_s25  }
 0x68a   : > { %p20_p4 = scmp.ge.s32.totalorder %s23_s25, 4  }
 0x68c   :  { %22 = sbr.rel (!%p20_p4) target bundleno = 1 (0x1), region = 126 }

</bundles_post_ra>
